<compile_context>
chip_gen: v7x
topology: tpu7x:2x2x1
jax: 0.10.0
libtpu: 0.0.40
codegen_flags: <defaults>
</compile_context>

<pallas_src>
import functools

import numpy as np
import jax
import jax.numpy as jnp
from jax import lax
from jax.experimental import pallas as pl
from jax.experimental.pallas import tpu as pltpu

BN_EPS = 1e-5


# ---------------------------------------------------------------------------
# One-time weight / constant preprocessing (plain JAX / numpy, outside the kernel).
# ---------------------------------------------------------------------------

def _conv3x3_matrix(w, Hs, Ws):
    """Fold a (Cout, Cin, 3, 3) conv weight (stride=1, padding=1) into a
    (Cin*Hs*Ws, Cout*Hs*Ws) matmul matrix acting on NCHW-flattened activations."""
    Cout, Cin, KH, KW = w.shape
    hw = Hs * Ws
    S = np.zeros((KH * KW, hw, hw), np.float32)
    for kh in range(KH):
        for kw in range(KW):
            k = kh * KW + kw
            for h in range(Hs):
                for ww in range(Ws):
                    hi, wi = h + kh - 1, ww + kw - 1
                    if 0 <= hi < Hs and 0 <= wi < Ws:
                        S[k, hi * Ws + wi, h * Ws + ww] = 1.0
    S = jnp.asarray(S)
    wf = w.reshape(Cout, Cin, KH * KW).astype(jnp.float32)
    A = jnp.einsum('kpm,oik->ipom', S, wf)                # (Cin, hw, Cout, hw)
    return A.reshape(Cin * hw, Cout * hw)


def _pool2x2_cat_matrix(C, Hs, Ws):
    """Single (C*Hs*Ws, 4*C*H2*W2) 0/1 matrix: the four MaxPool2d(2,2) corner-selection
    matrices concatenated along the output axis (one MXU dot; max over the 4 chunks).
    Each chunk's columns are in flattened (c, h, w) order."""
    H2, W2 = Hs // 2, Ws // 2
    ncol = C * H2 * W2
    P = np.zeros((C * Hs * Ws, 4 * ncol), np.float32)
    for i in range(2):
        for j in range(2):
            k = i * 2 + j
            for c in range(C):
                for h2 in range(H2):
                    for w2 in range(W2):
                        P[c * Hs * Ws + (2 * h2 + i) * Ws + (2 * w2 + j),
                          k * ncol + c * H2 * W2 + h2 * W2 + w2] = 1.0
    return jnp.asarray(P)


def _bn_mask(C, n_cols):
    """(n_cols, C) 0/1 channel-membership matrix (channel-major columns)."""
    ch = n_cols // C
    m = np.zeros((n_cols, C), np.float32)
    for c in range(C):
        m[c * ch:(c + 1) * ch, c] = 1.0
    return jnp.asarray(m)


# ---------------------------------------------------------------------------
# The fused Pallas kernel.
# ---------------------------------------------------------------------------

def _make_fused_kernel(num_layers, seq_len, hidden):
    H4 = 4 * hidden

    def bn_relu(y, m_ref, g_ref, be_ref):
        # y: (B, n_cols), channel-major columns (2 channels). Training-mode BatchNorm + ReLU.
        Bn, n_cols = y.shape
        ch = n_cols // 2
        inv_n = 1.0 / float(Bn * ch)                       # 1 / (N*H*W) per channel
        # Channel sums on the MXU (no full cross-lane XLU reductions).
        s_b = jnp.dot(y, m_ref[...], preferred_element_type=jnp.float32)       # (B, 2)
        q_b = jnp.dot(y * y, m_ref[...], preferred_element_type=jnp.float32)   # (B, 2)
        mean = jnp.sum(s_b, axis=0, keepdims=True) * inv_n                     # (1, 2)
        ex2 = jnp.sum(q_b, axis=0, keepdims=True) * inv_n                      # (1, 2)
        scale2 = lax.rsqrt(ex2 - mean * mean + BN_EPS) * g_ref[...]            # (1, 2)
        shift2 = be_ref[...] - mean * scale2                                   # (1, 2)
        col = lax.broadcasted_iota(jnp.int32, (1, n_cols), 1)
        m0 = (col < ch).astype(jnp.float32)
        m1 = 1.0 - m0
        scale = scale2[:, 0:1] * m0 + scale2[:, 1:2] * m1                      # (1, n_cols)
        shift = shift2[:, 0:1] * m0 + shift2[:, 1:2] * m1
        return jnp.maximum(y * scale + shift, 0.0)

    def maxpool_cat(y, p):
        # One MXU dot against the concatenated corner matrix, then max of the 4 chunks.
        r = jnp.dot(y.astype(jnp.bfloat16), p, preferred_element_type=jnp.float32)
        q = r.shape[1] // 4
        return jnp.maximum(jnp.maximum(r[:, 0:q], r[:, q:2 * q]),
                           jnp.maximum(r[:, 2 * q:3 * q], r[:, 3 * q:4 * q]))

    def kernel(*refs):
        (x_ref, a1_ref, p1_ref, m1_ref, m2_ref, b1_ref, b2_ref,
         g1_ref, be1_ref, g2_ref, be2_ref, bias_ref) = refs[:12]
        a2_hbm, p2_hbm = refs[12], refs[13]
        w_hbm = refs[14:14 + 2 * num_layers]               # [wih_0, whh_0, wih_1, whh_1, ...]
        out_ref = refs[14 + 2 * num_layers]
        a2_buf = refs[15 + 2 * num_layers]
        p2_buf = refs[16 + 2 * num_layers]
        w_buf = refs[17 + 2 * num_layers: 17 + 4 * num_layers]
        sem = refs[17 + 4 * num_layers]

        # ---- Kick off DMA of later-stage constants; they overlap conv1/BN1/pool1. ----
        cp_a2 = pltpu.make_async_copy(a2_hbm, a2_buf, sem.at[0]); cp_a2.start()
        cp_p2 = pltpu.make_async_copy(p2_hbm, p2_buf, sem.at[1]); cp_p2.start()
        cps_w = []
        for i in range(2 * num_layers):
            cp = pltpu.make_async_copy(w_hbm[i], w_buf[i], sem.at[2 + i])
            cp.start()
            cps_w.append(cp)

        # ---- CNN feature extractor: lane-dense MXU matmuls (bf16 operands, f32 acc) ----
        x = x_ref[...].astype(jnp.bfloat16)                                    # (B, H*W)
        y1 = jnp.dot(x, a1_ref[...], preferred_element_type=jnp.float32) + b1_ref[...]
        y1 = bn_relu(y1, m1_ref, g1_ref, be1_ref)                              # (B, 2*H*W)
        x2 = maxpool_cat(y1, p1_ref[...])                                      # (B, 2*H2*W2)

        cp_a2.wait()
        y2 = jnp.dot(x2.astype(jnp.bfloat16), a2_buf[...],
                     preferred_element_type=jnp.float32) + b2_ref[...]
        y2 = bn_relu(y2, m2_ref, g2_ref, be2_ref)                              # (B, 2*H2*W2)
        cp_p2.wait()
        feats = maxpool_cat(y2, p2_buf[...])                                   # (B, feat)

        # ---- LSTM: batch=1, sequence length = B (batch_first reshape) ----
        # g-gate lane mask (hoisted): tanh(x) = 2*sigmoid(2x) - 1, 2x is baked into weights.
        gcol = lax.broadcasted_iota(jnp.int32, (1, H4), 1)
        gmask = jnp.logical_and(gcol >= 2 * hidden, gcol < 3 * hidden).astype(jnp.float32)
        gmul = gmask + 1.0

        cur = feats
        h = jnp.zeros((1, hidden), jnp.float32)
        for l in range(num_layers):
            cps_w[2 * l].wait()                            # w_ih_l arrived
            cps_w[2 * l + 1].wait()                        # w_hh_l arrived
            w_ih = w_buf[2 * l][...]                       # (in_dim, 4H) bf16
            w_hh = w_buf[2 * l + 1][...]                   # (H, 4H) f32
            # Hoisted input projection for the whole sequence.
            xp = jnp.dot(cur.astype(jnp.bfloat16), w_ih,
                         preferred_element_type=jnp.float32) + bias_ref[l:l + 1, :]
            h = jnp.zeros((1, hidden), jnp.float32)
            c = jnp.zeros((1, hidden), jnp.float32)
            hs = []
            last = (l == num_layers - 1)
            # TODO(synk): w_hh could be held weight-stationary in the MXU via
            # pltpu.matmul_push_rhs/matmul_acc_lhs/matmul_pop; kept as jnp.dot for portability.
            for t in range(seq_len):                       # fully unrolled, h/c in vregs
                gates = xp[t:t + 1, :] + jnp.dot(h, w_hh,
                                                 preferred_element_type=jnp.float32)
                act = jax.nn.sigmoid(gates)                # one transcendental over all 4H lanes
                act = act * gmul - gmask                   # g lanes -> 2*sigmoid(2x)-1 = tanh(x)
                i_g = act[:, 0:hidden]
                f_g = act[:, hidden:2 * hidden]
                g_g = act[:, 2 * hidden:3 * hidden]
                o_g = act[:, 3 * hidden:4 * hidden]
                c = f_g * c + i_g * g_g
                h = o_g * jnp.tanh(c)
                if not last:
                    hs.append(h)
            if not last:
                cur = jnp.concatenate(hs, axis=0)          # (seq_len, H), kept in vregs
        out_ref[...] = h                                   # hn[-1]

    return kernel


# ---------------------------------------------------------------------------
# Wrappers.
# ---------------------------------------------------------------------------

def prepare_kernel_params(params, H_img, W_img, hidden_size, num_layers):
    H2, W2 = H_img // 2, W_img // 2
    kp = {
        "A1": _conv3x3_matrix(params["w1"], H_img, W_img).astype(jnp.bfloat16),
        "P1": _pool2x2_cat_matrix(2, H_img, W_img).astype(jnp.bfloat16),
        "A2": _conv3x3_matrix(params["w2"], H2, W2).astype(jnp.bfloat16),
        "P2": _pool2x2_cat_matrix(2, H2, W2).astype(jnp.bfloat16),
        "m1": _bn_mask(2, 2 * H_img * W_img),
        "m2": _bn_mask(2, 2 * H2 * W2),
        # lane-dense conv-bias rows (channel-major columns)
        "b1c": jnp.repeat(params["b1"], H_img * W_img).reshape(1, -1).astype(jnp.float32),
        "b2c": jnp.repeat(params["b2"], H2 * W2).reshape(1, -1).astype(jnp.float32),
        "g1": params["g1"].reshape(1, 2).astype(jnp.float32),
        "be1": params["be1"].reshape(1, 2).astype(jnp.float32),
        "g2": params["g2"].reshape(1, 2).astype(jnp.float32),
        "be2": params["be2"].reshape(1, 2).astype(jnp.float32),
    }
    Hh = hidden_size
    gscale = np.ones((1, 4 * Hh), np.float32)
    gscale[:, 2 * Hh:3 * Hh] = 2.0                          # exact power-of-2 scale (bf16-safe)
    gscale = jnp.asarray(gscale)
    biases = []
    for l in range(num_layers):
        kp[f"wih_{l}"] = (params[f"w_ih_{l}"].T * gscale).astype(jnp.bfloat16)   # (in_dim, 4H)
        kp[f"whh_{l}"] = (params[f"w_hh_{l}"].T * gscale).astype(jnp.float32)    # (H, 4H)
        biases.append((params[f"b_ih_{l}"] + params[f"b_hh_{l}"]).reshape(1, 4 * Hh) * gscale)
    kp["bias"] = jnp.concatenate(biases, axis=0).astype(jnp.float32)             # (L, 4H)
    return kp


def lstm1_forward(x, kp, hidden_size, num_layers):
    B = x.shape[0]
    x2d = x.reshape(B, -1).astype(jnp.float32)             # NCHW flatten (Cin=1)
    kernel = _make_fused_kernel(num_layers, B, hidden_size)
    vmem = pl.BlockSpec(memory_space=pltpu.MemorySpace.VMEM)
    anyspec = pl.BlockSpec(memory_space=pl.ANY)             # stays in HBM; streamed in-kernel

    args = [x2d, kp["A1"], kp["P1"], kp["m1"], kp["m2"], kp["b1c"], kp["b2c"],
            kp["g1"], kp["be1"], kp["g2"], kp["be2"], kp["bias"],
            kp["A2"], kp["P2"]]
    for l in range(num_layers):
        args += [kp[f"wih_{l}"], kp[f"whh_{l}"]]
    in_specs = [vmem] * 12 + [anyspec] * (2 + 2 * num_layers)

    scratch = [pltpu.VMEM(kp["A2"].shape, jnp.bfloat16),
               pltpu.VMEM(kp["P2"].shape, jnp.bfloat16)]
    for l in range(num_layers):
        scratch.append(pltpu.VMEM(kp[f"wih_{l}"].shape, jnp.bfloat16))
        scratch.append(pltpu.VMEM(kp[f"whh_{l}"].shape, jnp.float32))
    scratch.append(pltpu.SemaphoreType.DMA((2 + 2 * num_layers,)))

    out = pl.pallas_call(
        kernel,
        out_shape=jax.ShapeDtypeStruct((1, hidden_size), jnp.float32),
        in_specs=in_specs,
        out_specs=vmem,
        scratch_shapes=scratch,
    )(*args)
    return out[0]                                           # (hidden_size,)


def init_params(key, input_size, hidden_size, num_layers):
    ks = jax.random.split(key, 4 + 4 * num_layers)

    def u(k, shape, scale):
        return jax.random.uniform(k, shape, jnp.float32, -scale, scale)

    p = {}
    p["w1"] = u(ks[0], (2, 1, 3, 3), 1.0 / 3.0)             # Conv2d(1, 2, 3, padding=1)
    p["b1"] = u(ks[1], (2,), 1.0 / 3.0)
    p["g1"] = jnp.ones((2,), jnp.float32)                   # BatchNorm2d(2) affine defaults
    p["be1"] = jnp.zeros((2,), jnp.float32)
    p["w2"] = u(ks[2], (2, 2, 3, 3), 1.0 / (18.0 ** 0.5))   # Conv2d(2, 2, 3, padding=1)
    p["b2"] = u(ks[3], (2,), 1.0 / (18.0 ** 0.5))
    p["g2"] = jnp.ones((2,), jnp.float32)
    p["be2"] = jnp.zeros((2,), jnp.float32)
    Hh = hidden_size
    stdv = 1.0 / (Hh ** 0.5)
    ki = 4
    for l in range(num_layers):
        in_dim = input_size if l == 0 else Hh
        p[f"w_ih_{l}"] = u(ks[ki + 0], (4 * Hh, in_dim), stdv)
        p[f"w_hh_{l}"] = u(ks[ki + 1], (4 * Hh, Hh), stdv)
        p[f"b_ih_{l}"] = u(ks[ki + 2], (4 * Hh,), stdv)
        p[f"b_hh_{l}"] = u(ks[ki + 3], (4 * Hh,), stdv)
        ki += 4
    return p


# Plain-JAX reference (mirrors the PyTorch forward in train() mode) for validation.
def reference_forward(x, params, hidden_size, num_layers):
    B = x.shape[0]

    def conv3x3(inp, w, b):
        Bc, Cin, Hs, Ws = inp.shape
        xp = jnp.pad(inp, ((0, 0), (0, 0), (1, 1), (1, 1)))
        out = jnp.zeros((Bc, w.shape[0], Hs, Ws), jnp.float32)
        for kh in range(3):
            for kw in range(3):
                out = out + jnp.einsum('bchw,oc->bohw',
                                       xp[:, :, kh:kh + Hs, kw:kw + Ws],
                                       w[:, :, kh, kw])
        return out + b[None, :, None, None]

    def bn_relu(y, gamma, beta):
        mean = jnp.mean(y, axis=(0, 2, 3), keepdims=True)
        var = jnp.mean((y - mean) ** 2, axis=(0, 2, 3), keepdims=True)
        yn = (y - mean) * jax.lax.rsqrt(var + BN_EPS)
        yn = yn * gamma[None, :, None, None] + beta[None, :, None, None]
        return jnp.maximum(yn, 0.0)

    def pool2x2(y):
        Bc, C, Hs, Ws = y.shape
        return y.reshape(Bc, C, Hs // 2, 2, Ws // 2, 2).max(axis=(3, 5))

    y = pool2x2(bn_relu(conv3x3(x, params["w1"], params["b1"]), params["g1"], params["be1"]))
    y = pool2x2(bn_relu(conv3x3(y, params["w2"], params["b2"]), params["g2"], params["be2"]))
    seq = y.reshape(B, -1)                                  # (seq=B, feat)
    Hh = hidden_size
    h = jnp.zeros((Hh,), jnp.float32)
    for l in range(num_layers):
        w_ih, w_hh = params[f"w_ih_{l}"], params[f"w_hh_{l}"]
        b = params[f"b_ih_{l}"] + params[f"b_hh_{l}"]
        h = jnp.zeros((Hh,), jnp.float32)
        c = jnp.zeros((Hh,), jnp.float32)
        outs = []
        for t in range(seq.shape[0]):
            g = w_ih @ seq[t] + w_hh @ h + b
            i_g = jax.nn.sigmoid(g[0:Hh]); f_g = jax.nn.sigmoid(g[Hh:2 * Hh])
            g_g = jnp.tanh(g[2 * Hh:3 * Hh]); o_g = jax.nn.sigmoid(g[3 * Hh:4 * Hh])
            c = f_g * c + i_g * g_g
            h = o_g * jnp.tanh(c)
            outs.append(h)
        seq = jnp.stack(outs, 0)
    return h                                                # hn[-1]


if __name__ == "__main__":
    # Shapes implied by forward(): 1 input channel; lstm input_size == 2*(H/4)*(W/4).
    B, H_img, W_img = 8, 16, 16          # batch of images -> LSTM sequence length 8
    hidden_size, num_layers = 32, 2
    input_size = 2 * (H_img // 4) * (W_img // 4)   # 32

    key = jax.random.PRNGKey(0)
    kx, kparam = jax.random.split(key)
    x = jax.random.normal(kx, (B, 1, H_img, W_img), jnp.float32)
    params = init_params(kparam, input_size, hidden_size, num_layers)
    kparams = prepare_kernel_params(params, H_img, W_img, hidden_size, num_layers)

    fwd = jax.jit(functools.partial(lstm1_forward,
                                    hidden_size=hidden_size, num_layers=num_layers))
    out = jax.block_until_ready(fwd(x, kparams))
    assert out.shape == (hidden_size,) and out.dtype == jnp.float32
    assert bool(jnp.all(jnp.isfinite(out)))

    ref = jax.block_until_ready(reference_forward(x, params, hidden_size, num_layers))
    # bf16 conv / pool / w_ih operands => slightly looser tolerance than pure-f32.
    assert jnp.allclose(out, ref, rtol=2e-2, atol=2e-2), \
        f"max abs err = {float(jnp.max(jnp.abs(out - ref)))}"
    print("KERNEL_OK")
</pallas_src>

<mosaic_0001>
module attributes {stable_mosaic.version = 11 : i64} {
  func.func @kernel(%arg0: memref<8x256xf32, #tpu.memory_space<vmem>>, %arg1: memref<256x512xbf16, #tpu.memory_space<vmem>>, %arg2: memref<512x512xbf16, #tpu.memory_space<vmem>>, %arg3: memref<512x2xf32, #tpu.memory_space<vmem>>, %arg4: memref<128x2xf32, #tpu.memory_space<vmem>>, %arg5: memref<1x512xf32, #tpu.memory_space<vmem>>, %arg6: memref<1x128xf32, #tpu.memory_space<vmem>>, %arg7: memref<1x2xf32, #tpu.memory_space<vmem>>, %arg8: memref<1x2xf32, #tpu.memory_space<vmem>>, %arg9: memref<1x2xf32, #tpu.memory_space<vmem>>, %arg10: memref<1x2xf32, #tpu.memory_space<vmem>>, %arg11: memref<2x128xf32, #tpu.memory_space<vmem>>, %arg12: memref<128x128xbf16, #tpu.memory_space<any>>, %arg13: memref<128x128xbf16, #tpu.memory_space<any>>, %arg14: memref<32x128xbf16, #tpu.memory_space<any>>, %arg15: memref<32x128xf32, #tpu.memory_space<any>>, %arg16: memref<32x128xbf16, #tpu.memory_space<any>>, %arg17: memref<32x128xf32, #tpu.memory_space<any>>, %arg18: memref<1x32xf32, #tpu.memory_space<vmem>>, %arg19: memref<128x128xbf16, #tpu.memory_space<vmem>>, %arg20: memref<128x128xbf16, #tpu.memory_space<vmem>>, %arg21: memref<32x128xbf16, #tpu.memory_space<vmem>>, %arg22: memref<32x128xf32, #tpu.memory_space<vmem>>, %arg23: memref<32x128xbf16, #tpu.memory_space<vmem>>, %arg24: memref<32x128xf32, #tpu.memory_space<vmem>>, %arg25: memref<6x!tpu.dma_semaphore, #tpu.memory_space<semaphore_mem>>) attributes {dimension_semantics = [], scalar_prefetch = 0 : i64, scratch_operands = 7 : i64, tpu.core_type = #tpu.core_type<tc>} {
    %c0_i32 = arith.constant 0 : i32
    %0 = tpu.memref_slice %arg25[%c0_i32] : memref<6x!tpu.dma_semaphore, #tpu.memory_space<semaphore_mem>> -> memref<1x!tpu.dma_semaphore, #tpu.memory_space<semaphore_mem>>
    %1 = tpu.memref_squeeze %0 : memref<1x!tpu.dma_semaphore, #tpu.memory_space<semaphore_mem>> -> memref<!tpu.dma_semaphore, #tpu.memory_space<semaphore_mem>>
    tpu.enqueue_dma source(%arg12 : memref<128x128xbf16, #tpu.memory_space<any>>) target(%arg19 : memref<128x128xbf16, #tpu.memory_space<vmem>>) target_semaphore(%1 : memref<!tpu.dma_semaphore, #tpu.memory_space<semaphore_mem>>)
    %c1_i32 = arith.constant 1 : i32
    %2 = tpu.memref_slice %arg25[%c1_i32] : memref<6x!tpu.dma_semaphore, #tpu.memory_space<semaphore_mem>> -> memref<1x!tpu.dma_semaphore, #tpu.memory_space<semaphore_mem>>
    %3 = tpu.memref_squeeze %2 : memref<1x!tpu.dma_semaphore, #tpu.memory_space<semaphore_mem>> -> memref<!tpu.dma_semaphore, #tpu.memory_space<semaphore_mem>>
    tpu.enqueue_dma source(%arg13 : memref<128x128xbf16, #tpu.memory_space<any>>) target(%arg20 : memref<128x128xbf16, #tpu.memory_space<vmem>>) target_semaphore(%3 : memref<!tpu.dma_semaphore, #tpu.memory_space<semaphore_mem>>)
    %c2_i32 = arith.constant 2 : i32
    %4 = tpu.memref_slice %arg25[%c2_i32] : memref<6x!tpu.dma_semaphore, #tpu.memory_space<semaphore_mem>> -> memref<1x!tpu.dma_semaphore, #tpu.memory_space<semaphore_mem>>
    %5 = tpu.memref_squeeze %4 : memref<1x!tpu.dma_semaphore, #tpu.memory_space<semaphore_mem>> -> memref<!tpu.dma_semaphore, #tpu.memory_space<semaphore_mem>>
    tpu.enqueue_dma source(%arg14 : memref<32x128xbf16, #tpu.memory_space<any>>) target(%arg21 : memref<32x128xbf16, #tpu.memory_space<vmem>>) target_semaphore(%5 : memref<!tpu.dma_semaphore, #tpu.memory_space<semaphore_mem>>)
    %c3_i32 = arith.constant 3 : i32
    %6 = tpu.memref_slice %arg25[%c3_i32] : memref<6x!tpu.dma_semaphore, #tpu.memory_space<semaphore_mem>> -> memref<1x!tpu.dma_semaphore, #tpu.memory_space<semaphore_mem>>
    %7 = tpu.memref_squeeze %6 : memref<1x!tpu.dma_semaphore, #tpu.memory_space<semaphore_mem>> -> memref<!tpu.dma_semaphore, #tpu.memory_space<semaphore_mem>>
    tpu.enqueue_dma source(%arg15 : memref<32x128xf32, #tpu.memory_space<any>>) target(%arg22 : memref<32x128xf32, #tpu.memory_space<vmem>>) target_semaphore(%7 : memref<!tpu.dma_semaphore, #tpu.memory_space<semaphore_mem>>)
    %c4_i32 = arith.constant 4 : i32
    %8 = tpu.memref_slice %arg25[%c4_i32] : memref<6x!tpu.dma_semaphore, #tpu.memory_space<semaphore_mem>> -> memref<1x!tpu.dma_semaphore, #tpu.memory_space<semaphore_mem>>
    %9 = tpu.memref_squeeze %8 : memref<1x!tpu.dma_semaphore, #tpu.memory_space<semaphore_mem>> -> memref<!tpu.dma_semaphore, #tpu.memory_space<semaphore_mem>>
    tpu.enqueue_dma source(%arg16 : memref<32x128xbf16, #tpu.memory_space<any>>) target(%arg23 : memref<32x128xbf16, #tpu.memory_space<vmem>>) target_semaphore(%9 : memref<!tpu.dma_semaphore, #tpu.memory_space<semaphore_mem>>)
    %c5_i32 = arith.constant 5 : i32
    %10 = tpu.memref_slice %arg25[%c5_i32] : memref<6x!tpu.dma_semaphore, #tpu.memory_space<semaphore_mem>> -> memref<1x!tpu.dma_semaphore, #tpu.memory_space<semaphore_mem>>
    %11 = tpu.memref_squeeze %10 : memref<1x!tpu.dma_semaphore, #tpu.memory_space<semaphore_mem>> -> memref<!tpu.dma_semaphore, #tpu.memory_space<semaphore_mem>>
    tpu.enqueue_dma source(%arg17 : memref<32x128xf32, #tpu.memory_space<any>>) target(%arg24 : memref<32x128xf32, #tpu.memory_space<vmem>>) target_semaphore(%11 : memref<!tpu.dma_semaphore, #tpu.memory_space<semaphore_mem>>)
    %c0 = arith.constant 0 : index
    %c0_0 = arith.constant 0 : index
    %12 = vector.load %arg0[%c0, %c0_0] : memref<8x256xf32, #tpu.memory_space<vmem>>, vector<8x256xf32>
    %13 = arith.truncf %12 : vector<8x256xf32> to vector<8x256xbf16>
    %c0_1 = arith.constant 0 : index
    %c0_2 = arith.constant 0 : index
    %14 = vector.load %arg1[%c0_1, %c0_2] : memref<256x512xbf16, #tpu.memory_space<vmem>>, vector<256x512xbf16>
    %cst = arith.constant dense<0.000000e+00> : vector<8x512xf32>
    %15 = tpu.matmul %13, %14, %cst {dimension_numbers = #tpu.dot_dimension_numbers<[1], [0], [0], [1], [0, 0, 1, 1], [], []>} : vector<8x256xbf16>, vector<256x512xbf16>, vector<8x512xf32> -> vector<8x512xf32>
    %c0_3 = arith.constant 0 : index
    %c0_4 = arith.constant 0 : index
    %16 = vector.load %arg5[%c0_3, %c0_4] : memref<1x512xf32, #tpu.memory_space<vmem>>, vector<1x512xf32>
    %17 = vector.broadcast %16 : vector<1x512xf32> to vector<8x512xf32>
    %18 = arith.addf %15, %17 : vector<8x512xf32>
    %c0_5 = arith.constant 0 : index
    %c0_6 = arith.constant 0 : index
    %19 = vector.load %arg3[%c0_5, %c0_6] : memref<512x2xf32, #tpu.memory_space<vmem>>, vector<512x2xf32>
    %cst_7 = arith.constant dense<0.000000e+00> : vector<8x2xf32>
    %20 = tpu.matmul %18, %19, %cst_7 {dimension_numbers = #tpu.dot_dimension_numbers<[1], [0], [0], [1], [0, 0, 1, 1], [], []>} : vector<8x512xf32>, vector<512x2xf32>, vector<8x2xf32> -> vector<8x2xf32>
    %21 = arith.mulf %18, %18 : vector<8x512xf32>
    %c0_8 = arith.constant 0 : index
    %c0_9 = arith.constant 0 : index
    %22 = vector.load %arg3[%c0_8, %c0_9] : memref<512x2xf32, #tpu.memory_space<vmem>>, vector<512x2xf32>
    %cst_10 = arith.constant dense<0.000000e+00> : vector<8x2xf32>
    %23 = tpu.matmul %21, %22, %cst_10 {dimension_numbers = #tpu.dot_dimension_numbers<[1], [0], [0], [1], [0, 0, 1, 1], [], []>} : vector<8x512xf32>, vector<512x2xf32>, vector<8x2xf32> -> vector<8x2xf32>
    %cst_11 = arith.constant dense<0.000000e+00> : vector<2xf32>
    %24 = vector.multi_reduction <add>, %20, %cst_11 [0] : vector<8x2xf32> to vector<2xf32>
    %25 = vector.shape_cast %24 : vector<2xf32> to vector<1x2xf32>
    %cst_12 = arith.constant 4.8828125E-4 : f32
    %26 = vector.broadcast %cst_12 : f32 to vector<1x2xf32>
    %27 = arith.mulf %25, %26 : vector<1x2xf32>
    %cst_13 = arith.constant dense<0.000000e+00> : vector<2xf32>
    %28 = vector.multi_reduction <add>, %23, %cst_13 [0] : vector<8x2xf32> to vector<2xf32>
    %29 = vector.shape_cast %28 : vector<2xf32> to vector<1x2xf32>
    %cst_14 = arith.constant 4.8828125E-4 : f32
    %30 = vector.broadcast %cst_14 : f32 to vector<1x2xf32>
    %31 = arith.mulf %29, %30 : vector<1x2xf32>
    %32 = arith.mulf %27, %27 : vector<1x2xf32>
    %33 = arith.subf %31, %32 : vector<1x2xf32>
    %cst_15 = arith.constant 9.99999974E-6 : f32
    %34 = vector.broadcast %cst_15 : f32 to vector<1x2xf32>
    %35 = arith.addf %33, %34 : vector<1x2xf32>
    %36 = math.rsqrt %35 : vector<1x2xf32>
    %c0_16 = arith.constant 0 : index
    %c0_17 = arith.constant 0 : index
    %37 = vector.load %arg7[%c0_16, %c0_17] : memref<1x2xf32, #tpu.memory_space<vmem>>, vector<1x2xf32>
    %38 = arith.mulf %36, %37 : vector<1x2xf32>
    %c0_18 = arith.constant 0 : index
    %c0_19 = arith.constant 0 : index
    %39 = vector.load %arg8[%c0_18, %c0_19] : memref<1x2xf32, #tpu.memory_space<vmem>>, vector<1x2xf32>
    %40 = arith.mulf %27, %38 : vector<1x2xf32>
    %41 = arith.subf %39, %40 : vector<1x2xf32>
    %42 = tpu.iota {dimensions = array<i32: 1>} : vector<1x512xi32>
    %c256_i32 = arith.constant 256 : i32
    %43 = vector.broadcast %c256_i32 : i32 to vector<1x512xi32>
    %44 = arith.cmpi slt, %42, %43 : vector<1x512xi32>
    %45 = arith.extui %44 : vector<1x512xi1> to vector<1x512xi32>
    %46 = arith.sitofp %45 : vector<1x512xi32> to vector<1x512xf32>
    %cst_20 = arith.constant 1.000000e+00 : f32
    %47 = vector.broadcast %cst_20 : f32 to vector<1x512xf32>
    %48 = arith.subf %47, %46 : vector<1x512xf32>
    %49 = vector.extract_strided_slice %38 {offsets = [0, 0], sizes = [1, 1], strides = [1, 1]} : vector<1x2xf32> to vector<1x1xf32>
    %50 = vector.broadcast %49 : vector<1x1xf32> to vector<1x512xf32>
    %51 = arith.mulf %50, %46 : vector<1x512xf32>
    %52 = vector.extract_strided_slice %38 {offsets = [0, 1], sizes = [1, 1], strides = [1, 1]} : vector<1x2xf32> to vector<1x1xf32>
    %53 = vector.broadcast %52 : vector<1x1xf32> to vector<1x512xf32>
    %54 = arith.mulf %53, %48 : vector<1x512xf32>
    %55 = arith.addf %51, %54 : vector<1x512xf32>
    %56 = vector.extract_strided_slice %41 {offsets = [0, 0], sizes = [1, 1], strides = [1, 1]} : vector<1x2xf32> to vector<1x1xf32>
    %57 = vector.broadcast %56 : vector<1x1xf32> to vector<1x512xf32>
    %58 = arith.mulf %57, %46 : vector<1x512xf32>
    %59 = vector.extract_strided_slice %41 {offsets = [0, 1], sizes = [1, 1], strides = [1, 1]} : vector<1x2xf32> to vector<1x1xf32>
    %60 = vector.broadcast %59 : vector<1x1xf32> to vector<1x512xf32>
    %61 = arith.mulf %60, %48 : vector<1x512xf32>
    %62 = arith.addf %58, %61 : vector<1x512xf32>
    %63 = vector.broadcast %55 : vector<1x512xf32> to vector<8x512xf32>
    %64 = arith.mulf %18, %63 : vector<8x512xf32>
    %65 = vector.broadcast %62 : vector<1x512xf32> to vector<8x512xf32>
    %66 = arith.addf %64, %65 : vector<8x512xf32>
    %cst_21 = arith.constant 0.000000e+00 : f32
    %67 = vector.broadcast %cst_21 : f32 to vector<8x512xf32>
    %68 = arith.maximumf %66, %67 : vector<8x512xf32>
    %c0_22 = arith.constant 0 : index
    %c0_23 = arith.constant 0 : index
    %69 = vector.load %arg2[%c0_22, %c0_23] : memref<512x512xbf16, #tpu.memory_space<vmem>>, vector<512x512xbf16>
    %70 = arith.truncf %68 : vector<8x512xf32> to vector<8x512xbf16>
    %cst_24 = arith.constant dense<0.000000e+00> : vector<8x512xf32>
    %71 = tpu.matmul %70, %69, %cst_24 {dimension_numbers = #tpu.dot_dimension_numbers<[1], [0], [0], [1], [0, 0, 1, 1], [], []>} : vector<8x512xbf16>, vector<512x512xbf16>, vector<8x512xf32> -> vector<8x512xf32>
    %72 = vector.extract_strided_slice %71 {offsets = [0, 0], sizes = [8, 128], strides = [1, 1]} : vector<8x512xf32> to vector<8x128xf32>
    %73 = vector.extract_strided_slice %71 {offsets = [0, 128], sizes = [8, 128], strides = [1, 1]} : vector<8x512xf32> to vector<8x128xf32>
    %74 = arith.maximumf %72, %73 : vector<8x128xf32>
    %75 = vector.extract_strided_slice %71 {offsets = [0, 256], sizes = [8, 128], strides = [1, 1]} : vector<8x512xf32> to vector<8x128xf32>
    %76 = vector.extract_strided_slice %71 {offsets = [0, 384], sizes = [8, 128], strides = [1, 1]} : vector<8x512xf32> to vector<8x128xf32>
    %77 = arith.maximumf %75, %76 : vector<8x128xf32>
    %78 = arith.maximumf %74, %77 : vector<8x128xf32>
    %c0_i32_25 = arith.constant 0 : i32
    %79 = tpu.memref_slice %arg25[%c0_i32_25] : memref<6x!tpu.dma_semaphore, #tpu.memory_space<semaphore_mem>> -> memref<1x!tpu.dma_semaphore, #tpu.memory_space<semaphore_mem>>
    %80 = tpu.memref_squeeze %79 : memref<1x!tpu.dma_semaphore, #tpu.memory_space<semaphore_mem>> -> memref<!tpu.dma_semaphore, #tpu.memory_space<semaphore_mem>>
    tpu.wait_dma2 semaphore(%80 : memref<!tpu.dma_semaphore, #tpu.memory_space<semaphore_mem>>) src(%arg12 : memref<128x128xbf16, #tpu.memory_space<any>>) dst(%arg19 : memref<128x128xbf16, #tpu.memory_space<vmem>>)
    %81 = arith.truncf %78 : vector<8x128xf32> to vector<8x128xbf16>
    %c0_26 = arith.constant 0 : index
    %c0_27 = arith.constant 0 : index
    %82 = vector.load %arg19[%c0_26, %c0_27] : memref<128x128xbf16, #tpu.memory_space<vmem>>, vector<128x128xbf16>
    %cst_28 = arith.constant dense<0.000000e+00> : vector<8x128xf32>
    %83 = tpu.matmul %81, %82, %cst_28 {dimension_numbers = #tpu.dot_dimension_numbers<[1], [0], [0], [1], [0, 0, 1, 1], [], []>} : vector<8x128xbf16>, vector<128x128xbf16>, vector<8x128xf32> -> vector<8x128xf32>
    %c0_29 = arith.constant 0 : index
    %c0_30 = arith.constant 0 : index
    %84 = vector.load %arg6[%c0_29, %c0_30] : memref<1x128xf32, #tpu.memory_space<vmem>>, vector<1x128xf32>
    %85 = vector.broadcast %84 : vector<1x128xf32> to vector<8x128xf32>
    %86 = arith.addf %83, %85 : vector<8x128xf32>
    %c0_31 = arith.constant 0 : index
    %c0_32 = arith.constant 0 : index
    %87 = vector.load %arg4[%c0_31, %c0_32] : memref<128x2xf32, #tpu.memory_space<vmem>>, vector<128x2xf32>
    %cst_33 = arith.constant dense<0.000000e+00> : vector<8x2xf32>
    %88 = tpu.matmul %86, %87, %cst_33 {dimension_numbers = #tpu.dot_dimension_numbers<[1], [0], [0], [1], [0, 0, 1, 1], [], []>} : vector<8x128xf32>, vector<128x2xf32>, vector<8x2xf32> -> vector<8x2xf32>
    %89 = arith.mulf %86, %86 : vector<8x128xf32>
    %c0_34 = arith.constant 0 : index
    %c0_35 = arith.constant 0 : index
    %90 = vector.load %arg4[%c0_34, %c0_35] : memref<128x2xf32, #tpu.memory_space<vmem>>, vector<128x2xf32>
    %cst_36 = arith.constant dense<0.000000e+00> : vector<8x2xf32>
    %91 = tpu.matmul %89, %90, %cst_36 {dimension_numbers = #tpu.dot_dimension_numbers<[1], [0], [0], [1], [0, 0, 1, 1], [], []>} : vector<8x128xf32>, vector<128x2xf32>, vector<8x2xf32> -> vector<8x2xf32>
    %cst_37 = arith.constant dense<0.000000e+00> : vector<2xf32>
    %92 = vector.multi_reduction <add>, %88, %cst_37 [0] : vector<8x2xf32> to vector<2xf32>
    %93 = vector.shape_cast %92 : vector<2xf32> to vector<1x2xf32>
    %cst_38 = arith.constant 0.001953125 : f32
    %94 = vector.broadcast %cst_38 : f32 to vector<1x2xf32>
    %95 = arith.mulf %93, %94 : vector<1x2xf32>
    %cst_39 = arith.constant dense<0.000000e+00> : vector<2xf32>
    %96 = vector.multi_reduction <add>, %91, %cst_39 [0] : vector<8x2xf32> to vector<2xf32>
    %97 = vector.shape_cast %96 : vector<2xf32> to vector<1x2xf32>
    %cst_40 = arith.constant 0.001953125 : f32
    %98 = vector.broadcast %cst_40 : f32 to vector<1x2xf32>
    %99 = arith.mulf %97, %98 : vector<1x2xf32>
    %100 = arith.mulf %95, %95 : vector<1x2xf32>
    %101 = arith.subf %99, %100 : vector<1x2xf32>
    %cst_41 = arith.constant 9.99999974E-6 : f32
    %102 = vector.broadcast %cst_41 : f32 to vector<1x2xf32>
    %103 = arith.addf %101, %102 : vector<1x2xf32>
    %104 = math.rsqrt %103 : vector<1x2xf32>
    %c0_42 = arith.constant 0 : index
    %c0_43 = arith.constant 0 : index
    %105 = vector.load %arg9[%c0_42, %c0_43] : memref<1x2xf32, #tpu.memory_space<vmem>>, vector<1x2xf32>
    %106 = arith.mulf %104, %105 : vector<1x2xf32>
    %c0_44 = arith.constant 0 : index
    %c0_45 = arith.constant 0 : index
    %107 = vector.load %arg10[%c0_44, %c0_45] : memref<1x2xf32, #tpu.memory_space<vmem>>, vector<1x2xf32>
    %108 = arith.mulf %95, %106 : vector<1x2xf32>
    %109 = arith.subf %107, %108 : vector<1x2xf32>
    %110 = tpu.iota {dimensions = array<i32: 1>} : vector<1x128xi32>
    %c64_i32 = arith.constant 64 : i32
    %111 = vector.broadcast %c64_i32 : i32 to vector<1x128xi32>
    %112 = arith.cmpi slt, %110, %111 : vector<1x128xi32>
    %113 = arith.extui %112 : vector<1x128xi1> to vector<1x128xi32>
    %114 = arith.sitofp %113 : vector<1x128xi32> to vector<1x128xf32>
    %cst_46 = arith.constant 1.000000e+00 : f32
    %115 = vector.broadcast %cst_46 : f32 to vector<1x128xf32>
    %116 = arith.subf %115, %114 : vector<1x128xf32>
    %117 = vector.extract_strided_slice %106 {offsets = [0, 0], sizes = [1, 1], strides = [1, 1]} : vector<1x2xf32> to vector<1x1xf32>
    %118 = vector.broadcast %117 : vector<1x1xf32> to vector<1x128xf32>
    %119 = arith.mulf %118, %114 : vector<1x128xf32>
    %120 = vector.extract_strided_slice %106 {offsets = [0, 1], sizes = [1, 1], strides = [1, 1]} : vector<1x2xf32> to vector<1x1xf32>
    %121 = vector.broadcast %120 : vector<1x1xf32> to vector<1x128xf32>
    %122 = arith.mulf %121, %116 : vector<1x128xf32>
    %123 = arith.addf %119, %122 : vector<1x128xf32>
    %124 = vector.extract_strided_slice %109 {offsets = [0, 0], sizes = [1, 1], strides = [1, 1]} : vector<1x2xf32> to vector<1x1xf32>
    %125 = vector.broadcast %124 : vector<1x1xf32> to vector<1x128xf32>
    %126 = arith.mulf %125, %114 : vector<1x128xf32>
    %127 = vector.extract_strided_slice %109 {offsets = [0, 1], sizes = [1, 1], strides = [1, 1]} : vector<1x2xf32> to vector<1x1xf32>
    %128 = vector.broadcast %127 : vector<1x1xf32> to vector<1x128xf32>
    %129 = arith.mulf %128, %116 : vector<1x128xf32>
    %130 = arith.addf %126, %129 : vector<1x128xf32>
    %131 = vector.broadcast %123 : vector<1x128xf32> to vector<8x128xf32>
    %132 = arith.mulf %86, %131 : vector<8x128xf32>
    %133 = vector.broadcast %130 : vector<1x128xf32> to vector<8x128xf32>
    %134 = arith.addf %132, %133 : vector<8x128xf32>
    %cst_47 = arith.constant 0.000000e+00 : f32
    %135 = vector.broadcast %cst_47 : f32 to vector<8x128xf32>
    %136 = arith.maximumf %134, %135 : vector<8x128xf32>
    %c1_i32_48 = arith.constant 1 : i32
    %137 = tpu.memref_slice %arg25[%c1_i32_48] : memref<6x!tpu.dma_semaphore, #tpu.memory_space<semaphore_mem>> -> memref<1x!tpu.dma_semaphore, #tpu.memory_space<semaphore_mem>>
    %138 = tpu.memref_squeeze %137 : memref<1x!tpu.dma_semaphore, #tpu.memory_space<semaphore_mem>> -> memref<!tpu.dma_semaphore, #tpu.memory_space<semaphore_mem>>
    tpu.wait_dma2 semaphore(%138 : memref<!tpu.dma_semaphore, #tpu.memory_space<semaphore_mem>>) src(%arg13 : memref<128x128xbf16, #tpu.memory_space<any>>) dst(%arg20 : memref<128x128xbf16, #tpu.memory_space<vmem>>)
    %c0_49 = arith.constant 0 : index
    %c0_50 = arith.constant 0 : index
    %139 = vector.load %arg20[%c0_49, %c0_50] : memref<128x128xbf16, #tpu.memory_space<vmem>>, vector<128x128xbf16>
    %140 = arith.truncf %136 : vector<8x128xf32> to vector<8x128xbf16>
    %cst_51 = arith.constant dense<0.000000e+00> : vector<8x128xf32>
    %141 = tpu.matmul %140, %139, %cst_51 {dimension_numbers = #tpu.dot_dimension_numbers<[1], [0], [0], [1], [0, 0, 1, 1], [], []>} : vector<8x128xbf16>, vector<128x128xbf16>, vector<8x128xf32> -> vector<8x128xf32>
    %142 = vector.extract_strided_slice %141 {offsets = [0, 0], sizes = [8, 32], strides = [1, 1]} : vector<8x128xf32> to vector<8x32xf32>
    %143 = vector.extract_strided_slice %141 {offsets = [0, 32], sizes = [8, 32], strides = [1, 1]} : vector<8x128xf32> to vector<8x32xf32>
    %144 = arith.maximumf %142, %143 : vector<8x32xf32>
    %145 = vector.extract_strided_slice %141 {offsets = [0, 64], sizes = [8, 32], strides = [1, 1]} : vector<8x128xf32> to vector<8x32xf32>
    %146 = vector.extract_strided_slice %141 {offsets = [0, 96], sizes = [8, 32], strides = [1, 1]} : vector<8x128xf32> to vector<8x32xf32>
    %147 = arith.maximumf %145, %146 : vector<8x32xf32>
    %148 = arith.maximumf %144, %147 : vector<8x32xf32>
    %149 = tpu.iota {dimensions = array<i32: 1>} : vector<1x128xi32>
    %c64_i32_52 = arith.constant 64 : i32
    %150 = vector.broadcast %c64_i32_52 : i32 to vector<1x128xi32>
    %151 = arith.cmpi sge, %149, %150 : vector<1x128xi32>
    %c96_i32 = arith.constant 96 : i32
    %152 = vector.broadcast %c96_i32 : i32 to vector<1x128xi32>
    %153 = arith.cmpi slt, %149, %152 : vector<1x128xi32>
    %154 = arith.andi %151, %153 : vector<1x128xi1>
    %155 = arith.extui %154 : vector<1x128xi1> to vector<1x128xi32>
    %156 = arith.sitofp %155 : vector<1x128xi32> to vector<1x128xf32>
    %cst_53 = arith.constant 1.000000e+00 : f32
    %157 = vector.broadcast %cst_53 : f32 to vector<1x128xf32>
    %158 = arith.addf %156, %157 : vector<1x128xf32>
    %c2_i32_54 = arith.constant 2 : i32
    %159 = tpu.memref_slice %arg25[%c2_i32_54] : memref<6x!tpu.dma_semaphore, #tpu.memory_space<semaphore_mem>> -> memref<1x!tpu.dma_semaphore, #tpu.memory_space<semaphore_mem>>
    %160 = tpu.memref_squeeze %159 : memref<1x!tpu.dma_semaphore, #tpu.memory_space<semaphore_mem>> -> memref<!tpu.dma_semaphore, #tpu.memory_space<semaphore_mem>>
    tpu.wait_dma2 semaphore(%160 : memref<!tpu.dma_semaphore, #tpu.memory_space<semaphore_mem>>) src(%arg14 : memref<32x128xbf16, #tpu.memory_space<any>>) dst(%arg21 : memref<32x128xbf16, #tpu.memory_space<vmem>>)
    %c3_i32_55 = arith.constant 3 : i32
    %161 = tpu.memref_slice %arg25[%c3_i32_55] : memref<6x!tpu.dma_semaphore, #tpu.memory_space<semaphore_mem>> -> memref<1x!tpu.dma_semaphore, #tpu.memory_space<semaphore_mem>>
    %162 = tpu.memref_squeeze %161 : memref<1x!tpu.dma_semaphore, #tpu.memory_space<semaphore_mem>> -> memref<!tpu.dma_semaphore, #tpu.memory_space<semaphore_mem>>
    tpu.wait_dma2 semaphore(%162 : memref<!tpu.dma_semaphore, #tpu.memory_space<semaphore_mem>>) src(%arg15 : memref<32x128xf32, #tpu.memory_space<any>>) dst(%arg22 : memref<32x128xf32, #tpu.memory_space<vmem>>)
    %c0_56 = arith.constant 0 : index
    %c0_57 = arith.constant 0 : index
    %163 = vector.load %arg21[%c0_56, %c0_57] : memref<32x128xbf16, #tpu.memory_space<vmem>>, vector<32x128xbf16>
    %c0_58 = arith.constant 0 : index
    %c0_59 = arith.constant 0 : index
    %164 = vector.load %arg22[%c0_58, %c0_59] : memref<32x128xf32, #tpu.memory_space<vmem>>, vector<32x128xf32>
    %165 = arith.truncf %148 : vector<8x32xf32> to vector<8x32xbf16>
    %cst_60 = arith.constant dense<0.000000e+00> : vector<8x128xf32>
    %166 = tpu.matmul %165, %163, %cst_60 {dimension_numbers = #tpu.dot_dimension_numbers<[1], [0], [0], [1], [0, 0, 1, 1], [], []>} : vector<8x32xbf16>, vector<32x128xbf16>, vector<8x128xf32> -> vector<8x128xf32>
    %c0_61 = arith.constant 0 : index
    %c0_62 = arith.constant 0 : index
    %167 = vector.load %arg11[%c0_61, %c0_62] : memref<2x128xf32, #tpu.memory_space<vmem>>, vector<1x128xf32>
    %168 = vector.broadcast %167 : vector<1x128xf32> to vector<8x128xf32>
    %169 = arith.addf %166, %168 : vector<8x128xf32>
    %cst_63 = arith.constant 0.000000e+00 : f32
    %170 = vector.broadcast %cst_63 : f32 to vector<1x32xf32>
    %cst_64 = arith.constant 0.000000e+00 : f32
    %171 = vector.broadcast %cst_64 : f32 to vector<1x32xf32>
    %172 = vector.extract_strided_slice %169 {offsets = [0, 0], sizes = [1, 128], strides = [1, 1]} : vector<8x128xf32> to vector<1x128xf32>
    %cst_65 = arith.constant dense<0.000000e+00> : vector<1x128xf32>
    %173 = tpu.matmul %170, %164, %cst_65 {dimension_numbers = #tpu.dot_dimension_numbers<[1], [0], [0], [1], [0, 0, 1, 1], [], []>} : vector<1x32xf32>, vector<32x128xf32>, vector<1x128xf32> -> vector<1x128xf32>
    %174 = arith.addf %172, %173 : vector<1x128xf32>
    %175 = arith.negf %174 : vector<1x128xf32>
    %176 = math.exp %175 : vector<1x128xf32>
    %cst_66 = arith.constant 1.000000e+00 : f32
    %177 = vector.broadcast %cst_66 : f32 to vector<1x128xf32>
    %178 = arith.addf %177, %176 : vector<1x128xf32>
    %179 = arith.divf %177, %178 : vector<1x128xf32>
    %180 = arith.mulf %179, %158 : vector<1x128xf32>
    %181 = arith.subf %180, %156 : vector<1x128xf32>
    %182 = vector.extract_strided_slice %181 {offsets = [0, 0], sizes = [1, 32], strides = [1, 1]} : vector<1x128xf32> to vector<1x32xf32>
    %183 = vector.extract_strided_slice %181 {offsets = [0, 32], sizes = [1, 32], strides = [1, 1]} : vector<1x128xf32> to vector<1x32xf32>
    %184 = vector.extract_strided_slice %181 {offsets = [0, 64], sizes = [1, 32], strides = [1, 1]} : vector<1x128xf32> to vector<1x32xf32>
    %185 = vector.extract_strided_slice %181 {offsets = [0, 96], sizes = [1, 32], strides = [1, 1]} : vector<1x128xf32> to vector<1x32xf32>
    %186 = arith.mulf %183, %171 : vector<1x32xf32>
    %187 = arith.mulf %182, %184 : vector<1x32xf32>
    %188 = arith.addf %186, %187 : vector<1x32xf32>
    %189 = math.tanh %188 : vector<1x32xf32>
    %190 = arith.mulf %185, %189 : vector<1x32xf32>
    %191 = vector.extract_strided_slice %169 {offsets = [1, 0], sizes = [1, 128], strides = [1, 1]} : vector<8x128xf32> to vector<1x128xf32>
    %cst_67 = arith.constant dense<0.000000e+00> : vector<1x128xf32>
    %192 = tpu.matmul %190, %164, %cst_67 {dimension_numbers = #tpu.dot_dimension_numbers<[1], [0], [0], [1], [0, 0, 1, 1], [], []>} : vector<1x32xf32>, vector<32x128xf32>, vector<1x128xf32> -> vector<1x128xf32>
    %193 = arith.addf %191, %192 : vector<1x128xf32>
    %194 = arith.negf %193 : vector<1x128xf32>
    %195 = math.exp %194 : vector<1x128xf32>
    %cst_68 = arith.constant 1.000000e+00 : f32
    %196 = vector.broadcast %cst_68 : f32 to vector<1x128xf32>
    %197 = arith.addf %196, %195 : vector<1x128xf32>
    %198 = arith.divf %196, %197 : vector<1x128xf32>
    %199 = arith.mulf %198, %158 : vector<1x128xf32>
    %200 = arith.subf %199, %156 : vector<1x128xf32>
    %201 = vector.extract_strided_slice %200 {offsets = [0, 0], sizes = [1, 32], strides = [1, 1]} : vector<1x128xf32> to vector<1x32xf32>
    %202 = vector.extract_strided_slice %200 {offsets = [0, 32], sizes = [1, 32], strides = [1, 1]} : vector<1x128xf32> to vector<1x32xf32>
    %203 = vector.extract_strided_slice %200 {offsets = [0, 64], sizes = [1, 32], strides = [1, 1]} : vector<1x128xf32> to vector<1x32xf32>
    %204 = vector.extract_strided_slice %200 {offsets = [0, 96], sizes = [1, 32], strides = [1, 1]} : vector<1x128xf32> to vector<1x32xf32>
    %205 = arith.mulf %202, %188 : vector<1x32xf32>
    %206 = arith.mulf %201, %203 : vector<1x32xf32>
    %207 = arith.addf %205, %206 : vector<1x32xf32>
    %208 = math.tanh %207 : vector<1x32xf32>
    %209 = arith.mulf %204, %208 : vector<1x32xf32>
    %210 = vector.extract_strided_slice %169 {offsets = [2, 0], sizes = [1, 128], strides = [1, 1]} : vector<8x128xf32> to vector<1x128xf32>
    %cst_69 = arith.constant dense<0.000000e+00> : vector<1x128xf32>
    %211 = tpu.matmul %209, %164, %cst_69 {dimension_numbers = #tpu.dot_dimension_numbers<[1], [0], [0], [1], [0, 0, 1, 1], [], []>} : vector<1x32xf32>, vector<32x128xf32>, vector<1x128xf32> -> vector<1x128xf32>
    %212 = arith.addf %210, %211 : vector<1x128xf32>
    %213 = arith.negf %212 : vector<1x128xf32>
    %214 = math.exp %213 : vector<1x128xf32>
    %cst_70 = arith.constant 1.000000e+00 : f32
    %215 = vector.broadcast %cst_70 : f32 to vector<1x128xf32>
    %216 = arith.addf %215, %214 : vector<1x128xf32>
    %217 = arith.divf %215, %216 : vector<1x128xf32>
    %218 = arith.mulf %217, %158 : vector<1x128xf32>
    %219 = arith.subf %218, %156 : vector<1x128xf32>
    %220 = vector.extract_strided_slice %219 {offsets = [0, 0], sizes = [1, 32], strides = [1, 1]} : vector<1x128xf32> to vector<1x32xf32>
    %221 = vector.extract_strided_slice %219 {offsets = [0, 32], sizes = [1, 32], strides = [1, 1]} : vector<1x128xf32> to vector<1x32xf32>
    %222 = vector.extract_strided_slice %219 {offsets = [0, 64], sizes = [1, 32], strides = [1, 1]} : vector<1x128xf32> to vector<1x32xf32>
    %223 = vector.extract_strided_slice %219 {offsets = [0, 96], sizes = [1, 32], strides = [1, 1]} : vector<1x128xf32> to vector<1x32xf32>
    %224 = arith.mulf %221, %207 : vector<1x32xf32>
    %225 = arith.mulf %220, %222 : vector<1x32xf32>
    %226 = arith.addf %224, %225 : vector<1x32xf32>
    %227 = math.tanh %226 : vector<1x32xf32>
    %228 = arith.mulf %223, %227 : vector<1x32xf32>
    %229 = vector.extract_strided_slice %169 {offsets = [3, 0], sizes = [1, 128], strides = [1, 1]} : vector<8x128xf32> to vector<1x128xf32>
    %cst_71 = arith.constant dense<0.000000e+00> : vector<1x128xf32>
    %230 = tpu.matmul %228, %164, %cst_71 {dimension_numbers = #tpu.dot_dimension_numbers<[1], [0], [0], [1], [0, 0, 1, 1], [], []>} : vector<1x32xf32>, vector<32x128xf32>, vector<1x128xf32> -> vector<1x128xf32>
    %231 = arith.addf %229, %230 : vector<1x128xf32>
    %232 = arith.negf %231 : vector<1x128xf32>
    %233 = math.exp %232 : vector<1x128xf32>
    %cst_72 = arith.constant 1.000000e+00 : f32
    %234 = vector.broadcast %cst_72 : f32 to vector<1x128xf32>
    %235 = arith.addf %234, %233 : vector<1x128xf32>
    %236 = arith.divf %234, %235 : vector<1x128xf32>
    %237 = arith.mulf %236, %158 : vector<1x128xf32>
    %238 = arith.subf %237, %156 : vector<1x128xf32>
    %239 = vector.extract_strided_slice %238 {offsets = [0, 0], sizes = [1, 32], strides = [1, 1]} : vector<1x128xf32> to vector<1x32xf32>
    %240 = vector.extract_strided_slice %238 {offsets = [0, 32], sizes = [1, 32], strides = [1, 1]} : vector<1x128xf32> to vector<1x32xf32>
    %241 = vector.extract_strided_slice %238 {offsets = [0, 64], sizes = [1, 32], strides = [1, 1]} : vector<1x128xf32> to vector<1x32xf32>
    %242 = vector.extract_strided_slice %238 {offsets = [0, 96], sizes = [1, 32], strides = [1, 1]} : vector<1x128xf32> to vector<1x32xf32>
    %243 = arith.mulf %240, %226 : vector<1x32xf32>
    %244 = arith.mulf %239, %241 : vector<1x32xf32>
    %245 = arith.addf %243, %244 : vector<1x32xf32>
    %246 = math.tanh %245 : vector<1x32xf32>
    %247 = arith.mulf %242, %246 : vector<1x32xf32>
    %248 = vector.extract_strided_slice %169 {offsets = [4, 0], sizes = [1, 128], strides = [1, 1]} : vector<8x128xf32> to vector<1x128xf32>
    %cst_73 = arith.constant dense<0.000000e+00> : vector<1x128xf32>
    %249 = tpu.matmul %247, %164, %cst_73 {dimension_numbers = #tpu.dot_dimension_numbers<[1], [0], [0], [1], [0, 0, 1, 1], [], []>} : vector<1x32xf32>, vector<32x128xf32>, vector<1x128xf32> -> vector<1x128xf32>
    %250 = arith.addf %248, %249 : vector<1x128xf32>
    %251 = arith.negf %250 : vector<1x128xf32>
    %252 = math.exp %251 : vector<1x128xf32>
    %cst_74 = arith.constant 1.000000e+00 : f32
    %253 = vector.broadcast %cst_74 : f32 to vector<1x128xf32>
    %254 = arith.addf %253, %252 : vector<1x128xf32>
    %255 = arith.divf %253, %254 : vector<1x128xf32>
    %256 = arith.mulf %255, %158 : vector<1x128xf32>
    %257 = arith.subf %256, %156 : vector<1x128xf32>
    %258 = vector.extract_strided_slice %257 {offsets = [0, 0], sizes = [1, 32], strides = [1, 1]} : vector<1x128xf32> to vector<1x32xf32>
    %259 = vector.extract_strided_slice %257 {offsets = [0, 32], sizes = [1, 32], strides = [1, 1]} : vector<1x128xf32> to vector<1x32xf32>
    %260 = vector.extract_strided_slice %257 {offsets = [0, 64], sizes = [1, 32], strides = [1, 1]} : vector<1x128xf32> to vector<1x32xf32>
    %261 = vector.extract_strided_slice %257 {offsets = [0, 96], sizes = [1, 32], strides = [1, 1]} : vector<1x128xf32> to vector<1x32xf32>
    %262 = arith.mulf %259, %245 : vector<1x32xf32>
    %263 = arith.mulf %258, %260 : vector<1x32xf32>
    %264 = arith.addf %262, %263 : vector<1x32xf32>
    %265 = math.tanh %264 : vector<1x32xf32>
    %266 = arith.mulf %261, %265 : vector<1x32xf32>
    %267 = vector.extract_strided_slice %169 {offsets = [5, 0], sizes = [1, 128], strides = [1, 1]} : vector<8x128xf32> to vector<1x128xf32>
    %cst_75 = arith.constant dense<0.000000e+00> : vector<1x128xf32>
    %268 = tpu.matmul %266, %164, %cst_75 {dimension_numbers = #tpu.dot_dimension_numbers<[1], [0], [0], [1], [0, 0, 1, 1], [], []>} : vector<1x32xf32>, vector<32x128xf32>, vector<1x128xf32> -> vector<1x128xf32>
    %269 = arith.addf %267, %268 : vector<1x128xf32>
    %270 = arith.negf %269 : vector<1x128xf32>
    %271 = math.exp %270 : vector<1x128xf32>
    %cst_76 = arith.constant 1.000000e+00 : f32
    %272 = vector.broadcast %cst_76 : f32 to vector<1x128xf32>
    %273 = arith.addf %272, %271 : vector<1x128xf32>
    %274 = arith.divf %272, %273 : vector<1x128xf32>
    %275 = arith.mulf %274, %158 : vector<1x128xf32>
    %276 = arith.subf %275, %156 : vector<1x128xf32>
    %277 = vector.extract_strided_slice %276 {offsets = [0, 0], sizes = [1, 32], strides = [1, 1]} : vector<1x128xf32> to vector<1x32xf32>
    %278 = vector.extract_strided_slice %276 {offsets = [0, 32], sizes = [1, 32], strides = [1, 1]} : vector<1x128xf32> to vector<1x32xf32>
    %279 = vector.extract_strided_slice %276 {offsets = [0, 64], sizes = [1, 32], strides = [1, 1]} : vector<1x128xf32> to vector<1x32xf32>
    %280 = vector.extract_strided_slice %276 {offsets = [0, 96], sizes = [1, 32], strides = [1, 1]} : vector<1x128xf32> to vector<1x32xf32>
    %281 = arith.mulf %278, %264 : vector<1x32xf32>
    %282 = arith.mulf %277, %279 : vector<1x32xf32>
    %283 = arith.addf %281, %282 : vector<1x32xf32>
    %284 = math.tanh %283 : vector<1x32xf32>
    %285 = arith.mulf %280, %284 : vector<1x32xf32>
    %286 = vector.extract_strided_slice %169 {offsets = [6, 0], sizes = [1, 128], strides = [1, 1]} : vector<8x128xf32> to vector<1x128xf32>
    %cst_77 = arith.constant dense<0.000000e+00> : vector<1x128xf32>
    %287 = tpu.matmul %285, %164, %cst_77 {dimension_numbers = #tpu.dot_dimension_numbers<[1], [0], [0], [1], [0, 0, 1, 1], [], []>} : vector<1x32xf32>, vector<32x128xf32>, vector<1x128xf32> -> vector<1x128xf32>
    %288 = arith.addf %286, %287 : vector<1x128xf32>
    %289 = arith.negf %288 : vector<1x128xf32>
    %290 = math.exp %289 : vector<1x128xf32>
    %cst_78 = arith.constant 1.000000e+00 : f32
    %291 = vector.broadcast %cst_78 : f32 to vector<1x128xf32>
    %292 = arith.addf %291, %290 : vector<1x128xf32>
    %293 = arith.divf %291, %292 : vector<1x128xf32>
    %294 = arith.mulf %293, %158 : vector<1x128xf32>
    %295 = arith.subf %294, %156 : vector<1x128xf32>
    %296 = vector.extract_strided_slice %295 {offsets = [0, 0], sizes = [1, 32], strides = [1, 1]} : vector<1x128xf32> to vector<1x32xf32>
    %297 = vector.extract_strided_slice %295 {offsets = [0, 32], sizes = [1, 32], strides = [1, 1]} : vector<1x128xf32> to vector<1x32xf32>
    %298 = vector.extract_strided_slice %295 {offsets = [0, 64], sizes = [1, 32], strides = [1, 1]} : vector<1x128xf32> to vector<1x32xf32>
    %299 = vector.extract_strided_slice %295 {offsets = [0, 96], sizes = [1, 32], strides = [1, 1]} : vector<1x128xf32> to vector<1x32xf32>
    %300 = arith.mulf %297, %283 : vector<1x32xf32>
    %301 = arith.mulf %296, %298 : vector<1x32xf32>
    %302 = arith.addf %300, %301 : vector<1x32xf32>
    %303 = math.tanh %302 : vector<1x32xf32>
    %304 = arith.mulf %299, %303 : vector<1x32xf32>
    %305 = vector.extract_strided_slice %169 {offsets = [7, 0], sizes = [1, 128], strides = [1, 1]} : vector<8x128xf32> to vector<1x128xf32>
    %cst_79 = arith.constant dense<0.000000e+00> : vector<1x128xf32>
    %306 = tpu.matmul %304, %164, %cst_79 {dimension_numbers = #tpu.dot_dimension_numbers<[1], [0], [0], [1], [0, 0, 1, 1], [], []>} : vector<1x32xf32>, vector<32x128xf32>, vector<1x128xf32> -> vector<1x128xf32>
    %307 = arith.addf %305, %306 : vector<1x128xf32>
    %308 = arith.negf %307 : vector<1x128xf32>
    %309 = math.exp %308 : vector<1x128xf32>
    %cst_80 = arith.constant 1.000000e+00 : f32
    %310 = vector.broadcast %cst_80 : f32 to vector<1x128xf32>
    %311 = arith.addf %310, %309 : vector<1x128xf32>
    %312 = arith.divf %310, %311 : vector<1x128xf32>
    %313 = arith.mulf %312, %158 : vector<1x128xf32>
    %314 = arith.subf %313, %156 : vector<1x128xf32>
    %315 = vector.extract_strided_slice %314 {offsets = [0, 0], sizes = [1, 32], strides = [1, 1]} : vector<1x128xf32> to vector<1x32xf32>
    %316 = vector.extract_strided_slice %314 {offsets = [0, 32], sizes = [1, 32], strides = [1, 1]} : vector<1x128xf32> to vector<1x32xf32>
    %317 = vector.extract_strided_slice %314 {offsets = [0, 64], sizes = [1, 32], strides = [1, 1]} : vector<1x128xf32> to vector<1x32xf32>
    %318 = vector.extract_strided_slice %314 {offsets = [0, 96], sizes = [1, 32], strides = [1, 1]} : vector<1x128xf32> to vector<1x32xf32>
    %319 = arith.mulf %316, %302 : vector<1x32xf32>
    %320 = arith.mulf %315, %317 : vector<1x32xf32>
    %321 = arith.addf %319, %320 : vector<1x32xf32>
    %322 = math.tanh %321 : vector<1x32xf32>
    %323 = arith.mulf %318, %322 : vector<1x32xf32>
    %324 = tpu.concatenate %190, %209, %228, %247, %266, %285, %304, %323 in 0 : vector<1x32xf32>, vector<1x32xf32>, vector<1x32xf32>, vector<1x32xf32>, vector<1x32xf32>, vector<1x32xf32>, vector<1x32xf32>, vector<1x32xf32> -> vector<8x32xf32>
    %c4_i32_81 = arith.constant 4 : i32
    %325 = tpu.memref_slice %arg25[%c4_i32_81] : memref<6x!tpu.dma_semaphore, #tpu.memory_space<semaphore_mem>> -> memref<1x!tpu.dma_semaphore, #tpu.memory_space<semaphore_mem>>
    %326 = tpu.memref_squeeze %325 : memref<1x!tpu.dma_semaphore, #tpu.memory_space<semaphore_mem>> -> memref<!tpu.dma_semaphore, #tpu.memory_space<semaphore_mem>>
    tpu.wait_dma2 semaphore(%326 : memref<!tpu.dma_semaphore, #tpu.memory_space<semaphore_mem>>) src(%arg16 : memref<32x128xbf16, #tpu.memory_space<any>>) dst(%arg23 : memref<32x128xbf16, #tpu.memory_space<vmem>>)
    %c5_i32_82 = arith.constant 5 : i32
    %327 = tpu.memref_slice %arg25[%c5_i32_82] : memref<6x!tpu.dma_semaphore, #tpu.memory_space<semaphore_mem>> -> memref<1x!tpu.dma_semaphore, #tpu.memory_space<semaphore_mem>>
    %328 = tpu.memref_squeeze %327 : memref<1x!tpu.dma_semaphore, #tpu.memory_space<semaphore_mem>> -> memref<!tpu.dma_semaphore, #tpu.memory_space<semaphore_mem>>
    tpu.wait_dma2 semaphore(%328 : memref<!tpu.dma_semaphore, #tpu.memory_space<semaphore_mem>>) src(%arg17 : memref<32x128xf32, #tpu.memory_space<any>>) dst(%arg24 : memref<32x128xf32, #tpu.memory_space<vmem>>)
    %c0_83 = arith.constant 0 : index
    %c0_84 = arith.constant 0 : index
    %329 = vector.load %arg23[%c0_83, %c0_84] : memref<32x128xbf16, #tpu.memory_space<vmem>>, vector<32x128xbf16>
    %c0_85 = arith.constant 0 : index
    %c0_86 = arith.constant 0 : index
    %330 = vector.load %arg24[%c0_85, %c0_86] : memref<32x128xf32, #tpu.memory_space<vmem>>, vector<32x128xf32>
    %331 = arith.truncf %324 : vector<8x32xf32> to vector<8x32xbf16>
    %cst_87 = arith.constant dense<0.000000e+00> : vector<8x128xf32>
    %332 = tpu.matmul %331, %329, %cst_87 {dimension_numbers = #tpu.dot_dimension_numbers<[1], [0], [0], [1], [0, 0, 1, 1], [], []>} : vector<8x32xbf16>, vector<32x128xbf16>, vector<8x128xf32> -> vector<8x128xf32>
    %c1 = arith.constant 1 : index
    %c0_88 = arith.constant 0 : index
    %333 = vector.load %arg11[%c1, %c0_88] : memref<2x128xf32, #tpu.memory_space<vmem>>, vector<1x128xf32>
    %334 = vector.broadcast %333 : vector<1x128xf32> to vector<8x128xf32>
    %335 = arith.addf %332, %334 : vector<8x128xf32>
    %cst_89 = arith.constant 0.000000e+00 : f32
    %336 = vector.broadcast %cst_89 : f32 to vector<1x32xf32>
    %cst_90 = arith.constant 0.000000e+00 : f32
    %337 = vector.broadcast %cst_90 : f32 to vector<1x32xf32>
    %338 = vector.extract_strided_slice %335 {offsets = [0, 0], sizes = [1, 128], strides = [1, 1]} : vector<8x128xf32> to vector<1x128xf32>
    %cst_91 = arith.constant dense<0.000000e+00> : vector<1x128xf32>
    %339 = tpu.matmul %336, %330, %cst_91 {dimension_numbers = #tpu.dot_dimension_numbers<[1], [0], [0], [1], [0, 0, 1, 1], [], []>} : vector<1x32xf32>, vector<32x128xf32>, vector<1x128xf32> -> vector<1x128xf32>
    %340 = arith.addf %338, %339 : vector<1x128xf32>
    %341 = arith.negf %340 : vector<1x128xf32>
    %342 = math.exp %341 : vector<1x128xf32>
    %cst_92 = arith.constant 1.000000e+00 : f32
    %343 = vector.broadcast %cst_92 : f32 to vector<1x128xf32>
    %344 = arith.addf %343, %342 : vector<1x128xf32>
    %345 = arith.divf %343, %344 : vector<1x128xf32>
    %346 = arith.mulf %345, %158 : vector<1x128xf32>
    %347 = arith.subf %346, %156 : vector<1x128xf32>
    %348 = vector.extract_strided_slice %347 {offsets = [0, 0], sizes = [1, 32], strides = [1, 1]} : vector<1x128xf32> to vector<1x32xf32>
    %349 = vector.extract_strided_slice %347 {offsets = [0, 32], sizes = [1, 32], strides = [1, 1]} : vector<1x128xf32> to vector<1x32xf32>
    %350 = vector.extract_strided_slice %347 {offsets = [0, 64], sizes = [1, 32], strides = [1, 1]} : vector<1x128xf32> to vector<1x32xf32>
    %351 = vector.extract_strided_slice %347 {offsets = [0, 96], sizes = [1, 32], strides = [1, 1]} : vector<1x128xf32> to vector<1x32xf32>
    %352 = arith.mulf %349, %337 : vector<1x32xf32>
    %353 = arith.mulf %348, %350 : vector<1x32xf32>
    %354 = arith.addf %352, %353 : vector<1x32xf32>
    %355 = math.tanh %354 : vector<1x32xf32>
    %356 = arith.mulf %351, %355 : vector<1x32xf32>
    %357 = vector.extract_strided_slice %335 {offsets = [1, 0], sizes = [1, 128], strides = [1, 1]} : vector<8x128xf32> to vector<1x128xf32>
    %cst_93 = arith.constant dense<0.000000e+00> : vector<1x128xf32>
    %358 = tpu.matmul %356, %330, %cst_93 {dimension_numbers = #tpu.dot_dimension_numbers<[1], [0], [0], [1], [0, 0, 1, 1], [], []>} : vector<1x32xf32>, vector<32x128xf32>, vector<1x128xf32> -> vector<1x128xf32>
    %359 = arith.addf %357, %358 : vector<1x128xf32>
    %360 = arith.negf %359 : vector<1x128xf32>
    %361 = math.exp %360 : vector<1x128xf32>
    %cst_94 = arith.constant 1.000000e+00 : f32
    %362 = vector.broadcast %cst_94 : f32 to vector<1x128xf32>
    %363 = arith.addf %362, %361 : vector<1x128xf32>
    %364 = arith.divf %362, %363 : vector<1x128xf32>
    %365 = arith.mulf %364, %158 : vector<1x128xf32>
    %366 = arith.subf %365, %156 : vector<1x128xf32>
    %367 = vector.extract_strided_slice %366 {offsets = [0, 0], sizes = [1, 32], strides = [1, 1]} : vector<1x128xf32> to vector<1x32xf32>
    %368 = vector.extract_strided_slice %366 {offsets = [0, 32], sizes = [1, 32], strides = [1, 1]} : vector<1x128xf32> to vector<1x32xf32>
    %369 = vector.extract_strided_slice %366 {offsets = [0, 64], sizes = [1, 32], strides = [1, 1]} : vector<1x128xf32> to vector<1x32xf32>
    %370 = vector.extract_strided_slice %366 {offsets = [0, 96], sizes = [1, 32], strides = [1, 1]} : vector<1x128xf32> to vector<1x32xf32>
    %371 = arith.mulf %368, %354 : vector<1x32xf32>
    %372 = arith.mulf %367, %369 : vector<1x32xf32>
    %373 = arith.addf %371, %372 : vector<1x32xf32>
    %374 = math.tanh %373 : vector<1x32xf32>
    %375 = arith.mulf %370, %374 : vector<1x32xf32>
    %376 = vector.extract_strided_slice %335 {offsets = [2, 0], sizes = [1, 128], strides = [1, 1]} : vector<8x128xf32> to vector<1x128xf32>
    %cst_95 = arith.constant dense<0.000000e+00> : vector<1x128xf32>
    %377 = tpu.matmul %375, %330, %cst_95 {dimension_numbers = #tpu.dot_dimension_numbers<[1], [0], [0], [1], [0, 0, 1, 1], [], []>} : vector<1x32xf32>, vector<32x128xf32>, vector<1x128xf32> -> vector<1x128xf32>
    %378 = arith.addf %376, %377 : vector<1x128xf32>
    %379 = arith.negf %378 : vector<1x128xf32>
    %380 = math.exp %379 : vector<1x128xf32>
    %cst_96 = arith.constant 1.000000e+00 : f32
    %381 = vector.broadcast %cst_96 : f32 to vector<1x128xf32>
    %382 = arith.addf %381, %380 : vector<1x128xf32>
    %383 = arith.divf %381, %382 : vector<1x128xf32>
    %384 = arith.mulf %383, %158 : vector<1x128xf32>
    %385 = arith.subf %384, %156 : vector<1x128xf32>
    %386 = vector.extract_strided_slice %385 {offsets = [0, 0], sizes = [1, 32], strides = [1, 1]} : vector<1x128xf32> to vector<1x32xf32>
    %387 = vector.extract_strided_slice %385 {offsets = [0, 32], sizes = [1, 32], strides = [1, 1]} : vector<1x128xf32> to vector<1x32xf32>
    %388 = vector.extract_strided_slice %385 {offsets = [0, 64], sizes = [1, 32], strides = [1, 1]} : vector<1x128xf32> to vector<1x32xf32>
    %389 = vector.extract_strided_slice %385 {offsets = [0, 96], sizes = [1, 32], strides = [1, 1]} : vector<1x128xf32> to vector<1x32xf32>
    %390 = arith.mulf %387, %373 : vector<1x32xf32>
    %391 = arith.mulf %386, %388 : vector<1x32xf32>
    %392 = arith.addf %390, %391 : vector<1x32xf32>
    %393 = math.tanh %392 : vector<1x32xf32>
    %394 = arith.mulf %389, %393 : vector<1x32xf32>
    %395 = vector.extract_strided_slice %335 {offsets = [3, 0], sizes = [1, 128], strides = [1, 1]} : vector<8x128xf32> to vector<1x128xf32>
    %cst_97 = arith.constant dense<0.000000e+00> : vector<1x128xf32>
    %396 = tpu.matmul %394, %330, %cst_97 {dimension_numbers = #tpu.dot_dimension_numbers<[1], [0], [0], [1], [0, 0, 1, 1], [], []>} : vector<1x32xf32>, vector<32x128xf32>, vector<1x128xf32> -> vector<1x128xf32>
    %397 = arith.addf %395, %396 : vector<1x128xf32>
    %398 = arith.negf %397 : vector<1x128xf32>
    %399 = math.exp %398 : vector<1x128xf32>
    %cst_98 = arith.constant 1.000000e+00 : f32
    %400 = vector.broadcast %cst_98 : f32 to vector<1x128xf32>
    %401 = arith.addf %400, %399 : vector<1x128xf32>
    %402 = arith.divf %400, %401 : vector<1x128xf32>
    %403 = arith.mulf %402, %158 : vector<1x128xf32>
    %404 = arith.subf %403, %156 : vector<1x128xf32>
    %405 = vector.extract_strided_slice %404 {offsets = [0, 0], sizes = [1, 32], strides = [1, 1]} : vector<1x128xf32> to vector<1x32xf32>
    %406 = vector.extract_strided_slice %404 {offsets = [0, 32], sizes = [1, 32], strides = [1, 1]} : vector<1x128xf32> to vector<1x32xf32>
    %407 = vector.extract_strided_slice %404 {offsets = [0, 64], sizes = [1, 32], strides = [1, 1]} : vector<1x128xf32> to vector<1x32xf32>
    %408 = vector.extract_strided_slice %404 {offsets = [0, 96], sizes = [1, 32], strides = [1, 1]} : vector<1x128xf32> to vector<1x32xf32>
    %409 = arith.mulf %406, %392 : vector<1x32xf32>
    %410 = arith.mulf %405, %407 : vector<1x32xf32>
    %411 = arith.addf %409, %410 : vector<1x32xf32>
    %412 = math.tanh %411 : vector<1x32xf32>
    %413 = arith.mulf %408, %412 : vector<1x32xf32>
    %414 = vector.extract_strided_slice %335 {offsets = [4, 0], sizes = [1, 128], strides = [1, 1]} : vector<8x128xf32> to vector<1x128xf32>
    %cst_99 = arith.constant dense<0.000000e+00> : vector<1x128xf32>
    %415 = tpu.matmul %413, %330, %cst_99 {dimension_numbers = #tpu.dot_dimension_numbers<[1], [0], [0], [1], [0, 0, 1, 1], [], []>} : vector<1x32xf32>, vector<32x128xf32>, vector<1x128xf32> -> vector<1x128xf32>
    %416 = arith.addf %414, %415 : vector<1x128xf32>
    %417 = arith.negf %416 : vector<1x128xf32>
    %418 = math.exp %417 : vector<1x128xf32>
    %cst_100 = arith.constant 1.000000e+00 : f32
    %419 = vector.broadcast %cst_100 : f32 to vector<1x128xf32>
    %420 = arith.addf %419, %418 : vector<1x128xf32>
    %421 = arith.divf %419, %420 : vector<1x128xf32>
    %422 = arith.mulf %421, %158 : vector<1x128xf32>
    %423 = arith.subf %422, %156 : vector<1x128xf32>
    %424 = vector.extract_strided_slice %423 {offsets = [0, 0], sizes = [1, 32], strides = [1, 1]} : vector<1x128xf32> to vector<1x32xf32>
    %425 = vector.extract_strided_slice %423 {offsets = [0, 32], sizes = [1, 32], strides = [1, 1]} : vector<1x128xf32> to vector<1x32xf32>
    %426 = vector.extract_strided_slice %423 {offsets = [0, 64], sizes = [1, 32], strides = [1, 1]} : vector<1x128xf32> to vector<1x32xf32>
    %427 = vector.extract_strided_slice %423 {offsets = [0, 96], sizes = [1, 32], strides = [1, 1]} : vector<1x128xf32> to vector<1x32xf32>
    %428 = arith.mulf %425, %411 : vector<1x32xf32>
    %429 = arith.mulf %424, %426 : vector<1x32xf32>
    %430 = arith.addf %428, %429 : vector<1x32xf32>
    %431 = math.tanh %430 : vector<1x32xf32>
    %432 = arith.mulf %427, %431 : vector<1x32xf32>
    %433 = vector.extract_strided_slice %335 {offsets = [5, 0], sizes = [1, 128], strides = [1, 1]} : vector<8x128xf32> to vector<1x128xf32>
    %cst_101 = arith.constant dense<0.000000e+00> : vector<1x128xf32>
    %434 = tpu.matmul %432, %330, %cst_101 {dimension_numbers = #tpu.dot_dimension_numbers<[1], [0], [0], [1], [0, 0, 1, 1], [], []>} : vector<1x32xf32>, vector<32x128xf32>, vector<1x128xf32> -> vector<1x128xf32>
    %435 = arith.addf %433, %434 : vector<1x128xf32>
    %436 = arith.negf %435 : vector<1x128xf32>
    %437 = math.exp %436 : vector<1x128xf32>
    %cst_102 = arith.constant 1.000000e+00 : f32
    %438 = vector.broadcast %cst_102 : f32 to vector<1x128xf32>
    %439 = arith.addf %438, %437 : vector<1x128xf32>
    %440 = arith.divf %438, %439 : vector<1x128xf32>
    %441 = arith.mulf %440, %158 : vector<1x128xf32>
    %442 = arith.subf %441, %156 : vector<1x128xf32>
    %443 = vector.extract_strided_slice %442 {offsets = [0, 0], sizes = [1, 32], strides = [1, 1]} : vector<1x128xf32> to vector<1x32xf32>
    %444 = vector.extract_strided_slice %442 {offsets = [0, 32], sizes = [1, 32], strides = [1, 1]} : vector<1x128xf32> to vector<1x32xf32>
    %445 = vector.extract_strided_slice %442 {offsets = [0, 64], sizes = [1, 32], strides = [1, 1]} : vector<1x128xf32> to vector<1x32xf32>
    %446 = vector.extract_strided_slice %442 {offsets = [0, 96], sizes = [1, 32], strides = [1, 1]} : vector<1x128xf32> to vector<1x32xf32>
    %447 = arith.mulf %444, %430 : vector<1x32xf32>
    %448 = arith.mulf %443, %445 : vector<1x32xf32>
    %449 = arith.addf %447, %448 : vector<1x32xf32>
    %450 = math.tanh %449 : vector<1x32xf32>
    %451 = arith.mulf %446, %450 : vector<1x32xf32>
    %452 = vector.extract_strided_slice %335 {offsets = [6, 0], sizes = [1, 128], strides = [1, 1]} : vector<8x128xf32> to vector<1x128xf32>
    %cst_103 = arith.constant dense<0.000000e+00> : vector<1x128xf32>
    %453 = tpu.matmul %451, %330, %cst_103 {dimension_numbers = #tpu.dot_dimension_numbers<[1], [0], [0], [1], [0, 0, 1, 1], [], []>} : vector<1x32xf32>, vector<32x128xf32>, vector<1x128xf32> -> vector<1x128xf32>
    %454 = arith.addf %452, %453 : vector<1x128xf32>
    %455 = arith.negf %454 : vector<1x128xf32>
    %456 = math.exp %455 : vector<1x128xf32>
    %cst_104 = arith.constant 1.000000e+00 : f32
    %457 = vector.broadcast %cst_104 : f32 to vector<1x128xf32>
    %458 = arith.addf %457, %456 : vector<1x128xf32>
    %459 = arith.divf %457, %458 : vector<1x128xf32>
    %460 = arith.mulf %459, %158 : vector<1x128xf32>
    %461 = arith.subf %460, %156 : vector<1x128xf32>
    %462 = vector.extract_strided_slice %461 {offsets = [0, 0], sizes = [1, 32], strides = [1, 1]} : vector<1x128xf32> to vector<1x32xf32>
    %463 = vector.extract_strided_slice %461 {offsets = [0, 32], sizes = [1, 32], strides = [1, 1]} : vector<1x128xf32> to vector<1x32xf32>
    %464 = vector.extract_strided_slice %461 {offsets = [0, 64], sizes = [1, 32], strides = [1, 1]} : vector<1x128xf32> to vector<1x32xf32>
    %465 = vector.extract_strided_slice %461 {offsets = [0, 96], sizes = [1, 32], strides = [1, 1]} : vector<1x128xf32> to vector<1x32xf32>
    %466 = arith.mulf %463, %449 : vector<1x32xf32>
    %467 = arith.mulf %462, %464 : vector<1x32xf32>
    %468 = arith.addf %466, %467 : vector<1x32xf32>
    %469 = math.tanh %468 : vector<1x32xf32>
    %470 = arith.mulf %465, %469 : vector<1x32xf32>
    %471 = vector.extract_strided_slice %335 {offsets = [7, 0], sizes = [1, 128], strides = [1, 1]} : vector<8x128xf32> to vector<1x128xf32>
    %cst_105 = arith.constant dense<0.000000e+00> : vector<1x128xf32>
    %472 = tpu.matmul %470, %330, %cst_105 {dimension_numbers = #tpu.dot_dimension_numbers<[1], [0], [0], [1], [0, 0, 1, 1], [], []>} : vector<1x32xf32>, vector<32x128xf32>, vector<1x128xf32> -> vector<1x128xf32>
    %473 = arith.addf %471, %472 : vector<1x128xf32>
    %474 = arith.negf %473 : vector<1x128xf32>
    %475 = math.exp %474 : vector<1x128xf32>
    %cst_106 = arith.constant 1.000000e+00 : f32
    %476 = vector.broadcast %cst_106 : f32 to vector<1x128xf32>
    %477 = arith.addf %476, %475 : vector<1x128xf32>
    %478 = arith.divf %476, %477 : vector<1x128xf32>
    %479 = arith.mulf %478, %158 : vector<1x128xf32>
    %480 = arith.subf %479, %156 : vector<1x128xf32>
    %481 = vector.extract_strided_slice %480 {offsets = [0, 0], sizes = [1, 32], strides = [1, 1]} : vector<1x128xf32> to vector<1x32xf32>
    %482 = vector.extract_strided_slice %480 {offsets = [0, 32], sizes = [1, 32], strides = [1, 1]} : vector<1x128xf32> to vector<1x32xf32>
    %483 = vector.extract_strided_slice %480 {offsets = [0, 64], sizes = [1, 32], strides = [1, 1]} : vector<1x128xf32> to vector<1x32xf32>
    %484 = vector.extract_strided_slice %480 {offsets = [0, 96], sizes = [1, 32], strides = [1, 1]} : vector<1x128xf32> to vector<1x32xf32>
    %485 = arith.mulf %482, %468 : vector<1x32xf32>
    %486 = arith.mulf %481, %483 : vector<1x32xf32>
    %487 = arith.addf %485, %486 : vector<1x32xf32>
    %488 = math.tanh %487 : vector<1x32xf32>
    %489 = arith.mulf %484, %488 : vector<1x32xf32>
    %c0_107 = arith.constant 0 : index
    %c0_108 = arith.constant 0 : index
    %490 = vector.load %arg18[%c0_107, %c0_108] : memref<1x32xf32, #tpu.memory_space<vmem>>, vector<1x32xf32>
    tpu.vector_store %arg18[%c0_107, %c0_108], %489 {strides = array<i32>} : memref<1x32xf32, #tpu.memory_space<vmem>>, vector<1x32xf32>,
    return
  }
}

</mosaic_0001>

<bundles_post_ra>
// kernel: lstm1_forward.1
= control target key start
LH: loop header
LB: loop body
LE: loop exit
PB: predicated region body
PF: predicated region fallthrough
CT: control target
= control target key end

     0   :  { %s7385_s0 = inlined_call_operand.vmem [shape: f32[8,256], index: 0, kind: input, shape index: {}]   ;;  %s7386_s1 = inlined_call_operand.vmem [shape: bf16[256,512], index: 1, kind: input, shape index: {}]   ;;  %s7387_s2 = inlined_call_operand.hbm [shape: bf16[512,512], index: 2, kind: input, shape index: {}]   ;;  %s7388_s3 = inlined_call_operand.vmem [shape: f32[512,2], index: 3, kind: input, shape index: {}]   ;;  %s7389_s4 = inlined_call_operand.vmem [shape: f32[128,2], index: 4, kind: input, shape index: {}]   ;;  %s7390_s5 = inlined_call_operand.vmem [shape: f32[1,512], index: 5, kind: input, shape index: {}]   ;;  %s7391_s6 = inlined_call_operand.vmem [shape: f32[1,128], index: 6, kind: input, shape index: {}]   ;;  %s7392_s7 = inlined_call_operand.vmem [shape: f32[1,2], index: 7, kind: input, shape index: {}]   ;;  %s7393_s8 = inlined_call_operand.vmem [shape: f32[1,2], index: 8, kind: input, shape index: {}]   ;;  %s7394_s9 = inlined_call_operand.vmem [shape: f32[1,2], index: 9, kind: input, shape index: {}]   ;;  %s7395_s10 = inlined_call_operand.vmem [shape: f32[1,2], index: 10, kind: input, shape index: {}]   ;;  %s7396_s11 = inlined_call_operand.vmem [shape: f32[2,128], index: 11, kind: input, shape index: {}]   ;;  %s7397_s12 = inlined_call_operand.vmem [shape: bf16[128,128], index: 12, kind: input, shape index: {}]   ;;  %s7398_s13 = inlined_call_operand.vmem [shape: bf16[128,128], index: 13, kind: input, shape index: {}]   ;;  %s7399_s14 = inlined_call_operand.vmem [shape: bf16[32,128], index: 14, kind: input, shape index: {}]   ;;  %s7400_s15 = inlined_call_operand.vmem [shape: f32[32,128], index: 15, kind: input, shape index: {}]   ;;  %s7401_s16 = inlined_call_operand.vmem [shape: bf16[32,128], index: 16, kind: input, shape index: {}]   ;;  %s7402_s17 = inlined_call_operand.vmem [shape: f32[32,128], index: 17, kind: input, shape index: {}]   ;;  %s7403_s18 = inlined_call_operand.hbm [shape: f32[1,32], index: 18, kind: output, shape index: {}]  }
   0x1   :  { %7407 = sst [smem:[#allocation43_spill]] %s7385_s0 }
   0x2   :  { %7408 = sst [smem:[#allocation44_spill]] %s7386_s1 }
   0x3   :  { %7409 = sst [smem:[#allocation45_spill]] %s7387_s2 }
   0x4   :  { %23 = vsyncpa [#allocation10], 0 }
   0x5   :  { %24 = vsyncpa [#allocation11], 0  ;;  %s6138_s27 = smov [#allocation9]   ;;  %s7410_s0 = sld [smem:[#allocation45_spill]] }
   0x6   :  { %s34_s28 = sshll.u32 %s6138_s27, 4  ;;  %s35_s28 = int_to_ptr.vmem [resolvable:$true] %s34_s28 }
   0xb   :  { %s6078_s19 = scalar_lea.hbm %s7410_s0, 16384 }
   0xc   :  { %p6079_p0 = scmp.ne.s32.totalorder %s7410_s0, %s6078_s19  ;;  %p6082_p1 = scmp.lt.u32.totalorder %s6078_s19, %s7410_s0 }
   0xe   :  { %p6084_p2 = pnand %p6082_p1, %p6079_p0 }
  0x10   :  { %6087 = shalt.err (!%p6084_p2)
}
  0x11   :  { %s6088_s2 = scalar_lea.vmem %s35_s28, 16384  ;;  %p6093_p4 = scmp.lt.s32.totalorder %s35_s28, %s35_s28 }
  0x12   :  { %p6089_p3 = scmp.ne.s32.totalorder %s35_s28, %s6088_s2  ;;  %p6094_p5 = scmp.lt.s32.totalorder %s6088_s2, %s6088_s2 }
  0x14   :  { %p6095_p6 = por %p6094_p5, %p6093_p4 }
  0x16   :  { %p6096_p7 = pnand %p6095_p6, %p6089_p3 }
  0x18   :  { %6099 = shalt.err (!%p6096_p7)
}
  0x19   :  { %s6139_s23 = smov 256   ;;  %s6140_s24 = smov 16  }
  0x1a   :  { %40 = dma.hbm_to_vmem [thread:$0]  %s7410_s0, 16384, %s35_s28, [#allocation10], %s6139_s23, %s6139_s23, %s6140_s24  }
  0x1b   :  { %6122 = dma.done.wait [#allocation10], 16384  }
  0x1c   :  { %6123 = vsyncadd [#allocation10], 4294950912  ;;  %v6260_v0 = vld [vmem:[%s7397_s12] sm:$0xff]  ;;  %v6265_v1 = vld [vmem:[%s7397_s12 + $0x8] sm:$0xff] }
  0x1d   :  { %v6270_v2 = vld [vmem:[%s7397_s12 + $0x10] sm:$0xff]  ;;  %v6275_v3 = vld [vmem:[%s7397_s12 + $0x18] sm:$0xff]  ;;  %v6280_v4 = vld [vmem:[%s7397_s12 + $0x20] sm:$0xff] }
  0x1e   :  { %v6285_v5 = vld [vmem:[%s7397_s12 + $0x28] sm:$0xff]  ;;  %v6290_v6 = vld [vmem:[%s7397_s12 + $0x30] sm:$0xff]  ;;  %v6295_v7 = vld [vmem:[%s7397_s12 + $0x38] sm:$0xff] }
  0x1f   :  { %118 = vsyncadd [#allocation8], 1024  ;;  %v6300_v8 = vld [vmem:[%s7398_s13] sm:$0xff]  ;;  %v6305_v9 = vld [vmem:[%s7398_s13 + $0x8] sm:$0xff] }
  0x20   :  { %v6310_v10 = vld [vmem:[%s7398_s13 + $0x10] sm:$0xff]  ;;  %v6315_v11 = vld [vmem:[%s7398_s13 + $0x18] sm:$0xff]  ;;  %v6320_v12 = vld [vmem:[%s7398_s13 + $0x20] sm:$0xff] }
  0x21   :  { %7411 = vst [vmem:[#allocation27_spill] sm:$0xff] %v6320_v12  ;;  %v6325_v13 = vld [vmem:[%s7398_s13 + $0x28] sm:$0xff]  ;;  %v6330_v14 = vld [vmem:[%s7398_s13 + $0x30] sm:$0xff]  ;;  %v6335_v15 = vld [vmem:[%s7398_s13 + $0x38] sm:$0xff] }
  0x22   :  { %7412 = vst [vmem:[#allocation28_spill] sm:$0xff] %v6325_v13  ;;  %7413 = vst [vmem:[#allocation29_spill] sm:$0xff] %v6330_v14 }
  0x23   :  { %7414 = vst [vmem:[#allocation30_spill] sm:$0xff] %v6335_v15 }
  0x24   :  { %175 = vsyncadd [#allocation8 + $0x1], 1024  ;;  %v6340_v16 = vld [vmem:[%s7399_s14] sm:$0xff]  ;;  %v6345_v17 = vld [vmem:[%s7399_s14 + $0x8] sm:$0xff] }
  0x25   :  { %7415 = vst [vmem:[#allocation31_spill] sm:$0xff] %v6340_v16  ;;  %7416 = vst [vmem:[#allocation32_spill] sm:$0xff] %v6345_v17 }
  0x26   :  { %220 = vsyncadd [#allocation8 + $0x2], 256  ;;  %v6350_v18 = vld [vmem:[%s7400_s15] sm:$0xff]  ;;  %v6355_v19 = vld [vmem:[%s7400_s15 + $0x8] sm:$0xff] }
  0x27   :  { %7417 = vst [vmem:[#allocation33_spill] sm:$0xff] %v6350_v18  ;;  %7418 = vst [vmem:[#allocation34_spill] sm:$0xff] %v6355_v19  ;;  %v6360_v20 = vld [vmem:[%s7400_s15 + $0x10] sm:$0xff]  ;;  %v6365_v21 = vld [vmem:[%s7400_s15 + $0x18] sm:$0xff] }
  0x28   :  { %7419 = vst [vmem:[#allocation35_spill] sm:$0xff] %v6360_v20  ;;  %7420 = vst [vmem:[#allocation36_spill] sm:$0xff] %v6365_v21 }
  0x29   :  { %269 = vsyncadd [#allocation8 + $0x3], 512  ;;  %v6370_v22 = vld [vmem:[%s7401_s16] sm:$0xff]  ;;  %v6375_v23 = vld [vmem:[%s7401_s16 + $0x8] sm:$0xff] }
  0x2a   :  { %7421 = vst [vmem:[#allocation37_spill] sm:$0xff] %v6370_v22  ;;  %7422 = vst [vmem:[#allocation38_spill] sm:$0xff] %v6375_v23 }
  0x2b   :  { %314 = vsyncadd [#allocation8 + $0x4], 256  ;;  %v6380_v24 = vld [vmem:[%s7402_s17] sm:$0xff]  ;;  %v6385_v25 = vld [vmem:[%s7402_s17 + $0x8] sm:$0xff] }
  0x2c   :  { %7423 = vst [vmem:[#allocation39_spill] sm:$0xff] %v6380_v24  ;;  %7424 = vst [vmem:[#allocation40_spill] sm:$0xff] %v6385_v25  ;;  %v6390_v26 = vld [vmem:[%s7402_s17 + $0x10] sm:$0xff]  ;;  %v6395_v27 = vld [vmem:[%s7402_s17 + $0x18] sm:$0xff] }
  0x2d   :  { %7425 = vst [vmem:[#allocation41_spill] sm:$0xff] %v6390_v26  ;;  %7426 = vst [vmem:[#allocation42_spill] sm:$0xff] %v6395_v27 }
  0x2e   :  { %363 = vsyncadd [#allocation8 + $0x5], 512  ;;  %s7427_s22 = sld [smem:[#allocation44_spill]]  ;;  %s7428_s29 = sld [smem:[#allocation43_spill]]  ;;  %v868_v23 = vld [vmem:[%s7388_s3 + $0x60] sm:$0xff]  ;;  %vm1204_vm0 = vcmask 15360  }
  0x34   :  { %v5686_v28 = vld [vmem:[%s7427_s22 + $0x4] ss:$16 sps:$4 sm:$0xff]   ;;  %v5688_v29 = vld [vmem:[%s7427_s22 + $0xc] ss:$16 sps:$4 sm:$0xff]   ;;  %v5690_v30 = vld [vmem:[%s7427_s22] ss:$16 sps:$4 sm:$0xff]  }
  0x35   :  { %v5691_v31 = vld [vmem:[%s7427_s22 + $0x8] ss:$16 sps:$4 sm:$0xff]   ;;  %774 = vmatprep.subr.bf16.mxu0 %v5686_v28  ;;  %v5692_v32 = vld [vmem:[%s7427_s22 + $0x24] ss:$16 sps:$4 sm:$0xff]   ;;  %815 = vmatprep.subr.bf16.mxu1 %v5688_v29  ;;  %v5694_v33 = vld [vmem:[%s7427_s22 + $0x2c] ss:$16 sps:$4 sm:$0xff]  }
  0x36   :  { %775 = vmatpush1.bf16.msra.mxu0 %v5690_v30  ;;  %816 = vmatpush1.bf16.msra.mxu1 %v5691_v31  ;;  %v5696_v34 = vld [vmem:[%s7427_s22 + $0x20] ss:$16 sps:$4 sm:$0xff]   ;;  %v5697_v35 = vld [vmem:[%s7427_s22 + $0x28] ss:$16 sps:$4 sm:$0xff]   ;;  %v5698_v36 = vld [vmem:[%s7427_s22 + $0x44] ss:$16 sps:$4 sm:$0xff]  }
  0x37   :  { %776 = vmatprep.subr.bf16.mxu0 %v5692_v32  ;;  %817 = vmatprep.subr.bf16.mxu1 %v5694_v33  ;;  %v5700_v37 = vld [vmem:[%s7427_s22 + $0x4c] ss:$16 sps:$4 sm:$0xff]   ;;  %v5702_v38 = vld [vmem:[%s7427_s22 + $0x40] ss:$16 sps:$4 sm:$0xff]   ;;  %v5703_v39 = vld [vmem:[%s7427_s22 + $0x48] ss:$16 sps:$4 sm:$0xff]  }
  0x38   :  { %v5704_v40 = vld [vmem:[%s7427_s22 + $0x64] ss:$16 sps:$4 sm:$0xff]   ;;  %v5706_v41 = vld [vmem:[%s7427_s22 + $0x6c] ss:$16 sps:$4 sm:$0xff]   ;;  %v5708_v42 = vld [vmem:[%s7427_s22 + $0x60] ss:$16 sps:$4 sm:$0xff]  }
  0x39   :  { %v5709_v43 = vld [vmem:[%s7427_s22 + $0x68] ss:$16 sps:$4 sm:$0xff]   ;;  %v5710_v44 = vld [vmem:[%s7427_s22 + $0x84] ss:$16 sps:$4 sm:$0xff]   ;;  %v5712_v45 = vld [vmem:[%s7427_s22 + $0x8c] ss:$16 sps:$4 sm:$0xff]  }
  0x3a   :  { %777 = vmatpush1.bf16.msra.mxu0 %v5696_v34  ;;  %818 = vmatpush1.bf16.msra.mxu1 %v5697_v35  ;;  %v5714_v46 = vld [vmem:[%s7427_s22 + $0x80] ss:$16 sps:$4 sm:$0xff]   ;;  %v5715_v47 = vld [vmem:[%s7427_s22 + $0x88] ss:$16 sps:$4 sm:$0xff]   ;;  %v5716_v48 = vld [vmem:[%s7427_s22 + $0xa4] ss:$16 sps:$4 sm:$0xff]  }
  0x3b   :  { %778 = vmatprep.subr.bf16.mxu0 %v5698_v36  ;;  %819 = vmatprep.subr.bf16.mxu1 %v5700_v37  ;;  %v5718_v49 = vld [vmem:[%s7427_s22 + $0xac] ss:$16 sps:$4 sm:$0xff]   ;;  %v5720_v50 = vld [vmem:[%s7427_s22 + $0xa0] ss:$16 sps:$4 sm:$0xff]   ;;  %v5721_v51 = vld [vmem:[%s7427_s22 + $0xa8] ss:$16 sps:$4 sm:$0xff]  }
  0x3c   :  { %v5722_v52 = vld [vmem:[%s7427_s22 + $0xc4] ss:$16 sps:$4 sm:$0xff]   ;;  %v5724_v53 = vld [vmem:[%s7427_s22 + $0xcc] ss:$16 sps:$4 sm:$0xff]   ;;  %v5726_v54 = vld [vmem:[%s7427_s22 + $0xc0] ss:$16 sps:$4 sm:$0xff]  }
  0x3d   :  { %v5727_v55 = vld [vmem:[%s7427_s22 + $0xc8] ss:$16 sps:$4 sm:$0xff]   ;;  %v5728_v56 = vld [vmem:[%s7427_s22 + $0xe4] ss:$16 sps:$4 sm:$0xff]   ;;  %v5730_v57 = vld [vmem:[%s7427_s22 + $0xec] ss:$16 sps:$4 sm:$0xff]  }
  0x3e   :  { %779 = vmatpush1.bf16.msra.mxu0 %v5702_v38  ;;  %820 = vmatpush1.bf16.msra.mxu1 %v5703_v39  ;;  %v5732_v58 = vld [vmem:[%s7427_s22 + $0xe0] ss:$16 sps:$4 sm:$0xff]   ;;  %v5733_v59 = vld [vmem:[%s7427_s22 + $0xe8] ss:$16 sps:$4 sm:$0xff]   ;;  %v5734_v60 = vld [vmem:[%s7427_s22 + $0x104] ss:$16 sps:$4 sm:$0xff]  }
  0x3f   :  { %780 = vmatprep.subr.bf16.mxu0 %v5704_v40  ;;  %821 = vmatprep.subr.bf16.mxu1 %v5706_v41  ;;  %v5736_v61 = vld [vmem:[%s7427_s22 + $0x10c] ss:$16 sps:$4 sm:$0xff]   ;;  %v5738_v62 = vld [vmem:[%s7427_s22 + $0x100] ss:$16 sps:$4 sm:$0xff]   ;;  %v5739_v63 = vld [vmem:[%s7427_s22 + $0x108] ss:$16 sps:$4 sm:$0xff]  }
  0x40   :  { %v5740_v28 = vld [vmem:[%s7427_s22 + $0x124] ss:$16 sps:$4 sm:$0xff]   ;;  %v5742_v29 = vld [vmem:[%s7427_s22 + $0x12c] ss:$16 sps:$4 sm:$0xff]   ;;  %v5744_v30 = vld [vmem:[%s7427_s22 + $0x120] ss:$16 sps:$4 sm:$0xff]  }
  0x41   :  { %v5745_v31 = vld [vmem:[%s7427_s22 + $0x128] ss:$16 sps:$4 sm:$0xff]   ;;  %v5746_v32 = vld [vmem:[%s7427_s22 + $0x144] ss:$16 sps:$4 sm:$0xff]   ;;  %v5748_v33 = vld [vmem:[%s7427_s22 + $0x14c] ss:$16 sps:$4 sm:$0xff]  }
  0x42   :  { %781 = vmatpush1.bf16.msra.mxu0 %v5708_v42  ;;  %822 = vmatpush1.bf16.msra.mxu1 %v5709_v43  ;;  %v5750_v34 = vld [vmem:[%s7427_s22 + $0x140] ss:$16 sps:$4 sm:$0xff]   ;;  %v5751_v35 = vld [vmem:[%s7427_s22 + $0x148] ss:$16 sps:$4 sm:$0xff]   ;;  %v5752_v36 = vld [vmem:[%s7427_s22 + $0x164] ss:$16 sps:$4 sm:$0xff]  }
  0x43   :  { %782 = vmatprep.subr.bf16.mxu0 %v5710_v44  ;;  %823 = vmatprep.subr.bf16.mxu1 %v5712_v45  ;;  %v5754_v37 = vld [vmem:[%s7427_s22 + $0x16c] ss:$16 sps:$4 sm:$0xff]   ;;  %v5756_v39 = vld [vmem:[%s7427_s22 + $0x160] ss:$16 sps:$4 sm:$0xff]   ;;  %v5757_v41 = vld [vmem:[%s7427_s22 + $0x168] ss:$16 sps:$4 sm:$0xff]  }
  0x44   :  { %v365_v38 = vld [vmem:[%s7428_s29 + $0x8] sm:$0xff]  ;;  %v5758_v42 = vld [vmem:[%s7427_s22 + $0x184] ss:$16 sps:$4 sm:$0xff]   ;;  %v5762_v44 = vld [vmem:[%s7427_s22 + $0x180] ss:$16 sps:$4 sm:$0xff]  }
  0x45   :  { %v367_v40 = vpack.c.bf16 %v365_v38, %v365_v38  ;;  %v5760_v43 = vld [vmem:[%s7427_s22 + $0x18c] ss:$16 sps:$4 sm:$0xff]   ;;  %v5763_v45 = vld [vmem:[%s7427_s22 + $0x188] ss:$16 sps:$4 sm:$0xff]   ;;  %v858_v38 = vld [vmem:[%s7388_s3 + $0x10] sm:$0xff] }
  0x46   :  { %783 = vmatpush1.bf16.msra.mxu0 %v5714_v46  ;;  %824 = vmatpush1.bf16.msra.mxu1 %v5715_v47  ;;  %v5764_v46 = vld [vmem:[%s7427_s22 + $0x1a4] ss:$16 sps:$4 sm:$0xff]   ;;  %v5766_v47 = vld [vmem:[%s7427_s22 + $0x1ac] ss:$16 sps:$4 sm:$0xff]  }
  0x47   :  { %784 = vmatprep.subr.bf16.mxu0 %v5716_v48  ;;  %825 = vmatprep.subr.bf16.mxu1 %v5718_v49  ;;  %v5768_v48 = vld [vmem:[%s7427_s22 + $0x1a0] ss:$16 sps:$4 sm:$0xff]   ;;  %v5769_v49 = vld [vmem:[%s7427_s22 + $0x1a8] ss:$16 sps:$4 sm:$0xff]  }
  0x48   :  { %806 = vmatprep.mubr.bf16.mxu0 %v367_v40  ;;  %847 = vmatprep.mubr.bf16.mxu1 %v367_v40 }
  0x4a   :  { %785 = vmatpush1.bf16.msra.mxu0 %v5720_v50  ;;  %826 = vmatpush1.bf16.msra.mxu1 %v5721_v51  ;;  %v5770_v50 = vld [vmem:[%s7427_s22 + $0x1c4] ss:$16 sps:$4 sm:$0xff]   ;;  %v5772_v51 = vld [vmem:[%s7427_s22 + $0x1cc] ss:$16 sps:$4 sm:$0xff]  }
  0x4b   :  { %786 = vmatprep.subr.bf16.mxu0 %v5722_v52  ;;  %827 = vmatprep.subr.bf16.mxu1 %v5724_v53  ;;  %v5774_v52 = vld [vmem:[%s7427_s22 + $0x1c0] ss:$16 sps:$4 sm:$0xff]   ;;  %v5775_v53 = vld [vmem:[%s7427_s22 + $0x1c8] ss:$16 sps:$4 sm:$0xff]  }
  0x4e   :  { %787 = vmatpush1.bf16.msra.mxu0 %v5726_v54  ;;  %828 = vmatpush1.bf16.msra.mxu1 %v5727_v55  ;;  %v5776_v54 = vld [vmem:[%s7427_s22 + $0x1e4] ss:$16 sps:$4 sm:$0xff]   ;;  %v5778_v55 = vld [vmem:[%s7427_s22 + $0x1ec] ss:$16 sps:$4 sm:$0xff]  }
  0x4f   :  { %788 = vmatprep.subr.bf16.mxu0 %v5728_v56  ;;  %829 = vmatprep.subr.bf16.mxu1 %v5730_v57  ;;  %v5780_v56 = vld [vmem:[%s7427_s22 + $0x1e0] ss:$16 sps:$4 sm:$0xff]  }
  0x50   :  { %v872_v57 = vld [vmem:[%s7388_s3 + $0x80] sm:$0xff] }
  0x52   :  { %789 = vmatpush1.bf16.msra.mxu0 %v5732_v58  ;;  %830 = vmatpush1.bf16.msra.mxu1 %v5733_v59  ;;  %v873_v58 = vld [vmem:[%s7388_s3 + $0x88] sm:$0xff] }
  0x53   :  { %790 = vmatprep.subr.bf16.mxu0 %v5734_v60  ;;  %831 = vmatprep.subr.bf16.mxu1 %v5736_v61  ;;  %v5781_v59 = vld [vmem:[%s7427_s22 + $0x1e8] ss:$16 sps:$4 sm:$0xff]   ;;  %v364_v60 = vld [vmem:[%s7428_s29] sm:$0xff] }
  0x54   :  { %v904_v61 = vld [vmem:[%s7388_s3 + $0x180] sm:$0xff] }
  0x56   :  { %791 = vmatpush1.bf16.msra.mxu0 %v5738_v62  ;;  %832 = vmatpush1.bf16.msra.mxu1 %v5739_v63  ;;  %v905_v62 = vld [vmem:[%s7388_s3 + $0x188] sm:$0xff]  ;;  %v856_v63 = vld [vmem:[%s7388_s3] sm:$0xff] }
  0x57   :  { %792 = vmatprep.subr.bf16.mxu0 %v5740_v28  ;;  %833 = vmatprep.subr.bf16.mxu1 %v5742_v29  ;;  %v857_v28 = vld [vmem:[%s7388_s3 + $0x8] sm:$0xff]  ;;  %v888_v29 = vld [vmem:[%s7388_s3 + $0x100] sm:$0xff] }
  0x58   :  { %v6641_v40 = vpack.c.bf16 %v857_v28, %v856_v63  ;;  %v863_v63 = vld [vmem:[%s7388_s3 + $0x38] sm:$0xff] }
  0x5a   :  { %793 = vmatpush1.bf16.msra.mxu0 %v5744_v30  ;;  %834 = vmatpush1.bf16.msra.mxu1 %v5745_v31  ;;  %v6616_v30 = vpack.c.bf16 %v873_v58, %v872_v57  ;;  %v889_v31 = vld [vmem:[%s7388_s3 + $0x108] sm:$0xff] }
  0x5b   :  { %794 = vmatprep.subr.bf16.mxu0 %v5746_v32  ;;  %835 = vmatprep.subr.bf16.mxu1 %v5748_v33  ;;  %v874_v32 = vld [vmem:[%s7388_s3 + $0x90] sm:$0xff]  ;;  %v875_v33 = vld [vmem:[%s7388_s3 + $0x98] sm:$0xff] }
  0x5e   :  { %795 = vmatpush1.bf16.msra.mxu0 %v5750_v34  ;;  %836 = vmatpush1.bf16.msra.mxu1 %v5751_v35  ;;  %v6627_v34 = vpack.c.bf16 %v905_v62, %v904_v61  ;;  %v906_v35 = vld [vmem:[%s7388_s3 + $0x190] sm:$0xff] }
  0x5f   :  { %796 = vmatprep.subr.bf16.mxu0 %v5752_v36  ;;  %837 = vmatprep.subr.bf16.mxu1 %v5754_v37  ;;  %v907_v36 = vld [vmem:[%s7388_s3 + $0x198] sm:$0xff]  ;;  %v366_v37 = vpack.c.bf16 %v364_v60, %v364_v60  ;;  %v862_v62 = vld [vmem:[%s7388_s3 + $0x30] sm:$0xff] }
  0x60   :  { %v911_v60 = vld [vmem:[%s7388_s3 + $0x1b8] sm:$0xff] }
  0x62   :  { %797 = vmatpush1.bf16.msra.mxu0 %v5756_v39  ;;  %838 = vmatpush1.bf16.msra.mxu1 %v5757_v41  ;;  %v859_v39 = vld [vmem:[%s7388_s3 + $0x18] sm:$0xff]  ;;  %v890_v41 = vld [vmem:[%s7388_s3 + $0x110] sm:$0xff] }
  0x63   :  { %798 = vmatprep.subr.bf16.mxu0 %v5758_v42  ;;  %839 = vmatprep.subr.bf16.mxu1 %v5760_v43  ;;  %v891_v42 = vld [vmem:[%s7388_s3 + $0x118] sm:$0xff]  ;;  %v876_v43 = vld [vmem:[%s7388_s3 + $0xa0] sm:$0xff] }
  0x64   :  { %v6692_v57 = vpack.c.bf16 %v891_v42, %v890_v41  ;;  %v864_v41 = vld [vmem:[%s7388_s3 + $0x40] sm:$0xff]  ;;  %v865_v42 = vld [vmem:[%s7388_s3 + $0x48] sm:$0xff] }
  0x66   :  { %799 = vmatpush1.bf16.msra.mxu0 %v5762_v44  ;;  %840 = vmatpush1.bf16.msra.mxu1 %v5763_v45  ;;  %v877_v44 = vld [vmem:[%s7388_s3 + $0xa8] sm:$0xff]  ;;  %v6656_v45 = vpack.c.bf16 %v889_v31, %v888_v29  ;;  %v894_v29 = vld [vmem:[%s7388_s3 + $0x130] sm:$0xff]  ;;  %v895_v31 = vld [vmem:[%s7388_s3 + $0x138] sm:$0xff] }
  0x67   :  { %800 = vmatprep.subr.bf16.mxu0 %v5764_v46  ;;  %841 = vmatprep.subr.bf16.mxu1 %v5766_v47  ;;  %v6658_v46 = vpack.c.bf16 %v875_v33, %v874_v32  ;;  %v908_v47 = vld [vmem:[%s7388_s3 + $0x1a0] sm:$0xff]  ;;  %v6694_v58 = vpack.c.bf16 %v877_v44, %v876_v43  ;;  %v881_v33 = vld [vmem:[%s7388_s3 + $0xc8] sm:$0xff]  ;;  %v6748_v43 = vpack.c.bf16 %v863_v63, %v862_v62  ;;  %v898_v63 = vld [vmem:[%s7388_s3 + $0x150] sm:$0xff] }
  0x68   :  { %v880_v32 = vld [vmem:[%s7388_s3 + $0xc0] sm:$0xff]  ;;  %v6784_v62 = vpack.c.bf16 %v865_v42, %v864_v41  ;;  %v917_v41 = vld [vmem:[%s7388_s3 + $0x1e8] sm:$0xff] }
  0x69   :  { %v896_v44 = vld [vmem:[%s7388_s3 + $0x140] sm:$0xff] }
  0x6a   :  { %801 = vmatpush1.bf16.msra.mxu0 %v5768_v48  ;;  %842 = vmatpush1.bf16.msra.mxu1 %v5769_v49  ;;  %v909_v48 = vld [vmem:[%s7388_s3 + $0x1a8] sm:$0xff]  ;;  %v6667_v49 = vpack.c.bf16 %v907_v36, %v906_v35 }
  0x6b   :  { %802 = vmatprep.subr.bf16.mxu0 %v5770_v50  ;;  %843 = vmatprep.subr.bf16.mxu1 %v5772_v51  ;;  %v860_v50 = vld [vmem:[%s7388_s3 + $0x20] sm:$0xff]  ;;  %v861_v51 = vld [vmem:[%s7388_s3 + $0x28] sm:$0xff]  ;;  %v6703_v61 = vpack.c.bf16 %v909_v48, %v908_v47  ;;  %v882_v48 = vld [vmem:[%s7388_s3 + $0xd0] sm:$0xff] }
  0x6c   :  { %v6712_v28 = vpack.c.bf16 %v861_v51, %v860_v50  ;;  %v897_v47 = vld [vmem:[%s7388_s3 + $0x148] sm:$0xff]  ;;  %v883_v50 = vld [vmem:[%s7388_s3 + $0xd8] sm:$0xff]  ;;  %v6764_v51 = vpack.c.bf16 %v895_v31, %v894_v29  ;;  %v884_v31 = vld [vmem:[%s7388_s3 + $0xe0] sm:$0xff] }
  0x6d   :  { %v899_v29 = vld [vmem:[%s7388_s3 + $0x158] sm:$0xff] }
  0x6e   :  { %803 = vmatpush1.bf16.msra.mxu0 %v5774_v52  ;;  %844 = vmatpush1.bf16.msra.mxu1 %v5775_v53  ;;  %v6676_v52 = vpack.c.bf16 %v859_v39, %v858_v38  ;;  %v892_v53 = vld [vmem:[%s7388_s3 + $0x120] sm:$0xff]  ;;  %v913_v38 = vld [vmem:[%s7388_s3 + $0x1c8] sm:$0xff] }
  0x6f   :  { %804 = vmatprep.subr.bf16.mxu0 %v5776_v54  ;;  %845 = vmatprep.subr.bf16.mxu1 %v5778_v55  ;;  %v893_v54 = vld [vmem:[%s7388_s3 + $0x128] sm:$0xff]  ;;  %v878_v55 = vld [vmem:[%s7388_s3 + $0xb0] sm:$0xff] }
  0x70   :  { %v6728_v35 = vpack.c.bf16 %v893_v54, %v892_v53  ;;  %v6766_v53 = vpack.c.bf16 %v881_v33, %v880_v32  ;;  %v914_v54 = vld [vmem:[%s7388_s3 + $0x1d0] sm:$0xff]  ;;  %v885_v32 = vld [vmem:[%s7388_s3 + $0xe8] sm:$0xff]  ;;  %v6800_v33 = vpack.c.bf16 %v897_v47, %v896_v44 }
  0x71   :  { %v869_v44 = vld [vmem:[%s7388_s3 + $0x68] sm:$0xff] }
  0x72   :  { %805 = vmatpush1.bf16.msra.mxu0 %v5780_v56  ;;  %846 = vmatpush1.bf16.msra.mxu1 %v5781_v59  ;;  %v879_v56 = vld [vmem:[%s7388_s3 + $0xb8] sm:$0xff]  ;;  %v910_v59 = vld [vmem:[%s7388_s3 + $0x1b0] sm:$0xff] }
  0x73   :  { %5390 = vmatprep.subr.bf16.mxu0 %v6616_v30  ;;  %5422 = vmatprep.subr.bf16.mxu1 %v6627_v34  ;;  %v6730_v36 = vpack.c.bf16 %v879_v56, %v878_v55  ;;  %v6739_v39 = vpack.c.bf16 %v911_v60, %v910_v59  ;;  %v915_v55 = vld [vmem:[%s7388_s3 + $0x1d8] sm:$0xff]  ;;  %v866_v59 = vld [vmem:[%s7388_s3 + $0x50] sm:$0xff] }
  0x74   :  { %v867_v60 = vld [vmem:[%s7388_s3 + $0x58] sm:$0xff]  ;;  %v6811_v42 = vpack.c.bf16 %v915_v55, %v914_v54  ;;  %v6830_v54 = vpack.c.bf16 %v899_v29, %v898_v63  ;;  %v6832_v55 = vpack.c.bf16 %v885_v32, %v884_v31  ;;  %v886_v63 = vld [vmem:[%s7388_s3 + $0xf0] sm:$0xff] }
  0x75   :  { %807 = vmatmul.mubr.bf16.vlgmr.msra.gmra.mrb[0].mxu0 %v366_v37  ;;  %848 = vmatmul.mubr.bf16.vlgmr.msra.gmra.mrb[0].mxu1 %v366_v37  ;;  %v912_v37 = vld [vmem:[%s7388_s3 + $0x1c0] sm:$0xff]  ;;  %v6820_v47 = vpack.c.bf16 %v867_v60, %v866_v59  ;;  %v6838_v60 = vpack.c.bf16 %v869_v44, %v868_v23  ;;  %v887_v23 = vld [vmem:[%s7388_s3 + $0xf8] sm:$0xff]  ;;  %v918_v29 = vld [vmem:[%s7388_s3 + $0x1f0] sm:$0xff] }
  0x76   :  { %5392 = vmatpush3.bf16.msra.mxu0 %v6641_v40  ;;  %5424 = vmatpush3.bf16.msra.mxu1 %v6656_v45  ;;  %v6775_v56 = vpack.c.bf16 %v913_v38, %v912_v37  ;;  %v6802_v37 = vpack.c.bf16 %v883_v50, %v882_v48  ;;  %v916_v38 = vld [vmem:[%s7388_s3 + $0x1e0] sm:$0xff]  ;;  %v901_v50 = vld [vmem:[%s7388_s3 + $0x168] sm:$0xff]  ;;  %v6856_v31 = vpack.c.bf16 %v887_v23, %v886_v63  ;;  %v919_v32 = vld [vmem:[%s7388_s3 + $0x1f8] sm:$0xff]  ;;  %v434_v23 = vlaneseq }
  0x77   :  { %5394 = vmatprep.subr.bf16.mxu0 %v6658_v46  ;;  %5426 = vmatprep.subr.bf16.mxu1 %v6667_v49  ;;  %v900_v48 = vld [vmem:[%s7388_s3 + $0x160] sm:$0xff]  ;;  %v6835_v59 = vpack.c.bf16 %v917_v41, %v916_v38  ;;  %v870_v38 = vld [vmem:[%s7388_s3 + $0x70] sm:$0xff]  ;;  %v871_v41 = vld [vmem:[%s7388_s3 + $0x78] sm:$0xff]  ;;  %v6867_v44 = vpack.c.bf16 %v919_v32, %v918_v29 }
  0x78   :  { %v6842_v27 = vpack.c.bf16 %v901_v50, %v900_v48  ;;  %v6869_v48 = vpack.c.bf16 %v871_v41, %v870_v38  ;;  %v902_v50 = vld [vmem:[%s7388_s3 + $0x170] sm:$0xff]  ;;  %v903_v63 = vld [vmem:[%s7388_s3 + $0x178] sm:$0xff]  ;;  %v6882_v29 = vand.u32 127, %v434_v23  ;;  %v435_v32 = vshrl.u32 %v434_v23, 7  ;;  %v432_v41 = vld [vmem:[%s7390_s5] sm:$0xf] }
  0x79   :  { %v6878_v26 = vpack.c.bf16 %v903_v63, %v902_v50 }
  0x7a   :  { %5396 = vmatpush3.bf16.msra.mxu0 %v6676_v52  ;;  %5428 = vmatpush3.bf16.msra.mxu1 %v6692_v57  ;;  %v440_v38 = vsub.s32 1, %v435_v32  ;;  %v6890_v50 = vsub.s32 0, %v435_v32  ;;  %v448_v63 = vsub.s32 3, %v435_v32  ;;  %v444_v22 = vsub.s32 2, %v435_v32 }
  0x7b   :  { %5398 = vmatprep.subr.bf16.mxu0 %v6694_v58  ;;  %5430 = vmatprep.subr.bf16.mxu1 %v6703_v61 }
  0x7c   :  { %v441_v25 = vrot.slane %v432_v41, %v440_v38  ;;  %v437_v24 = vrot.slane %v432_v41, %v6890_v50  ;;  %v449_v17 = vrot.slane %v432_v41, %v448_v63  ;;  %v445_v20 = vrot.slane %v432_v41, %v444_v22  ;;  %v5830_v38 = vld [vmem:[#allocation9 + $0x100] ss:$16 sps:$4 sm:$0xff]   ;;  %v5833_v41 = vld [vmem:[#allocation9 + $0x108] ss:$16 sps:$4 sm:$0xff]   ;;  %v5838_v63 = vld [vmem:[#allocation9 + $0x124] ss:$16 sps:$4 sm:$0xff]  }
  0x7e   :  { %5400 = vmatpush3.bf16.msra.mxu0 %v6712_v28  ;;  %5432 = vmatpush3.bf16.msra.mxu1 %v6728_v35 }
  0x7f   :  { %5402 = vmatprep.subr.bf16.mxu0 %v6730_v36  ;;  %5434 = vmatprep.subr.bf16.mxu1 %v6739_v39 }
  0x82   :  { %5404 = vmatpush3.bf16.msra.mxu0 %v6748_v43  ;;  %5436 = vmatpush3.bf16.msra.mxu1 %v6764_v51 }
  0x83   :  { %5406 = vmatprep.subr.bf16.mxu0 %v6766_v53  ;;  %5438 = vmatprep.subr.bf16.mxu1 %v6775_v56 }
  0x86   :  { %5408 = vmatpush3.bf16.msra.mxu0 %v6784_v62  ;;  %5440 = vmatpush3.bf16.msra.mxu1 %v6800_v33 }
  0x87   :  { %5410 = vmatprep.subr.bf16.mxu0 %v6802_v37  ;;  %5442 = vmatprep.subr.bf16.mxu1 %v6811_v42 }
  0x8a   :  { %5412 = vmatpush3.bf16.msra.mxu0 %v6820_v47  ;;  %5444 = vmatpush3.bf16.msra.mxu1 %v6830_v54 }
  0x8b   :  { %5414 = vmatprep.subr.bf16.mxu0 %v6832_v55  ;;  %5446 = vmatprep.subr.bf16.mxu1 %v6835_v59 }
  0x8e   :  { %5416 = vmatpush3.bf16.msra.mxu0 %v6838_v60  ;;  %5448 = vmatpush3.bf16.msra.mxu1 %v6842_v27 }
  0x8f   :  { %5418 = vmatprep.subr.bf16.mxu0 %v6856_v31  ;;  %5450 = vmatprep.subr.bf16.mxu1 %v6867_v44 }
  0x92   :  { %5420 = vmatpush3.bf16.msra.mxu0 %v6869_v48  ;;  %5452 = vmatpush3.bf16.msra.mxu1 %v6878_v26 }
  0x93   :  { %5454 = vmatprep.subr.bf16.mxu0 %v6616_v30  ;;  %5486 = vmatprep.subr.bf16.mxu1 %v6627_v34 }
 0x148   :  { %v808_v21 = vpop.f32.mrb[0].mxu0  ;;  %v849_v16 = vpop.f32.mrb[0].mxu1 }
 0x149   :  { %v810_v30 = vpop.f32.mrb[1].mxu0  ;;  %v851_v34 = vpop.f32.mrb[1].mxu1  ;;  %v6895_v18 = vadd.f32 %v808_v21, %v437_v24  ;;  %v6899_v12 = vadd.f32 %v849_v16, %v445_v20  ;;  %v6141_v16 = vmov 1   ;;  %v5784_v20 = vld [vmem:[#allocation9 + $0x4] ss:$16 sps:$4 sm:$0xff]  }
 0x14a   :  { %v6893_v19 = vadd.f32 %v810_v30, %v441_v25  ;;  %v812_v23 = vpop.f32.mrb[2].mxu0  ;;  %v6897_v15 = vadd.f32 %v851_v34, %v449_v17  ;;  %v853_v14 = vpop.f32.mrb[2].mxu1  ;;  %5681 = vset.pattern.permute.xlu0 %v6141_v16  ;;  %5683 = vset.pattern.permute.xlu1 %v6141_v16  ;;  %v5782_v17 = vld [vmem:[#allocation9] ss:$16 sps:$4 sm:$0xff]   ;;  %v5785_v24 = vld [vmem:[#allocation9 + $0x8] ss:$16 sps:$4 sm:$0xff]  }
 0x14b   :  { %v813_v13 = vpop.f32.mrb[3].mxu0  ;;  %v854_v32 = vpop.f32.mrb[3].mxu1  ;;  %v1062_v14 = vmul.f32 %v6899_v12, %v6899_v12  ;;  %v5787_v25 = vld [vmem:[#allocation9 + $0xc] ss:$16 sps:$4 sm:$0xff]   ;;  %v5836_v34 = vld [vmem:[#allocation9 + $0x120] ss:$16 sps:$4 sm:$0xff]  }
 0x14c   :  { %984 = vmatprep.mubr.f32.mxu0 %v6893_v19  ;;  %v1061_v22 = vmul.f32 %v6893_v19, %v6893_v19  ;;  %1054 = vmatprep.mubr.f32.mxu1 %v6897_v15  ;;  %v1063_v21 = vmul.f32 %v6897_v15, %v6897_v15  ;;  %v1060_v13 = vmul.f32 %v6895_v18, %v6895_v18  ;;  %v5841_v30 = vld [vmem:[#allocation9 + $0x12c] ss:$16 sps:$4 sm:$0xff]   ;;  %v5839_v23 = vld [vmem:[#allocation9 + $0x128] ss:$16 sps:$4 sm:$0xff]   ;;  %v5844_v32 = vld [vmem:[#allocation9 + $0x144] ss:$16 sps:$4 sm:$0xff]  }
 0x14d   :  { %985 = vmatmul.mubr.f32.vlgmr.msra.gmra.mrb[4].mxu0 %v6895_v18  ;;  %1055 = vmatmul.mubr.f32.vlgmr.msra.gmra.mrb[4].mxu1 %v6899_v12 }
 0x14e   :  { %5456 = vmatpush3.bf16.msra.mxu0 %v6641_v40  ;;  %5488 = vmatpush3.bf16.msra.mxu1 %v6656_v45  ;;  %v5793_v40 = vld [vmem:[#allocation9 + $0x2c] ss:$16 sps:$4 sm:$0xff]   ;;  %v5791_v45 = vld [vmem:[#allocation9 + $0x28] ss:$16 sps:$4 sm:$0xff]  }
 0x14f   :  { %1128 = vmatprep.mubr.f32.mxu0 %v1061_v22  ;;  %1198 = vmatprep.mubr.f32.mxu1 %v1063_v21  ;;  %v5847_v22 = vld [vmem:[#allocation9 + $0x14c] ss:$16 sps:$4 sm:$0xff]   ;;  %v5842_v21 = vld [vmem:[#allocation9 + $0x140] ss:$16 sps:$4 sm:$0xff]  }
 0x150   :  { %5458 = vmatprep.subr.bf16.mxu0 %v6658_v46  ;;  %5490 = vmatprep.subr.bf16.mxu1 %v6667_v49  ;;  %v5796_v46 = vld [vmem:[#allocation9 + $0x44] ss:$16 sps:$4 sm:$0xff]   ;;  %v5799_v49 = vld [vmem:[#allocation9 + $0x4c] ss:$16 sps:$4 sm:$0xff]  }
 0x152   :  { %5460 = vmatpush3.bf16.msra.mxu0 %v6676_v52  ;;  %5492 = vmatpush3.bf16.msra.mxu1 %v6692_v57  ;;  %v5794_v52 = vld [vmem:[#allocation9 + $0x40] ss:$16 sps:$4 sm:$0xff]   ;;  %v5797_v57 = vld [vmem:[#allocation9 + $0x48] ss:$16 sps:$4 sm:$0xff]  }
 0x153   :  { %5462 = vmatprep.subr.bf16.mxu0 %v6694_v58  ;;  %5494 = vmatprep.subr.bf16.mxu1 %v6703_v61  ;;  %v5802_v58 = vld [vmem:[#allocation9 + $0x64] ss:$16 sps:$4 sm:$0xff]   ;;  %v5805_v61 = vld [vmem:[#allocation9 + $0x6c] ss:$16 sps:$4 sm:$0xff]  }
 0x156   :  { %5464 = vmatpush3.bf16.msra.mxu0 %v6712_v28  ;;  %5496 = vmatpush3.bf16.msra.mxu1 %v6728_v35  ;;  %v5800_v28 = vld [vmem:[#allocation9 + $0x60] ss:$16 sps:$4 sm:$0xff]   ;;  %v5803_v35 = vld [vmem:[#allocation9 + $0x68] ss:$16 sps:$4 sm:$0xff]  }
 0x157   :  { %5466 = vmatprep.subr.bf16.mxu0 %v6730_v36  ;;  %5498 = vmatprep.subr.bf16.mxu1 %v6739_v39  ;;  %v5808_v36 = vld [vmem:[#allocation9 + $0x84] ss:$16 sps:$4 sm:$0xff]   ;;  %v5811_v39 = vld [vmem:[#allocation9 + $0x8c] ss:$16 sps:$4 sm:$0xff]  }
 0x15a   :  { %5468 = vmatpush3.bf16.msra.mxu0 %v6748_v43  ;;  %5500 = vmatpush3.bf16.msra.mxu1 %v6764_v51  ;;  %v5806_v43 = vld [vmem:[#allocation9 + $0x80] ss:$16 sps:$4 sm:$0xff]   ;;  %v5809_v51 = vld [vmem:[#allocation9 + $0x88] ss:$16 sps:$4 sm:$0xff]  }
 0x15b   :  { %5470 = vmatprep.subr.bf16.mxu0 %v6766_v53  ;;  %5502 = vmatprep.subr.bf16.mxu1 %v6775_v56  ;;  %v5814_v53 = vld [vmem:[#allocation9 + $0xa4] ss:$16 sps:$4 sm:$0xff]   ;;  %v5817_v56 = vld [vmem:[#allocation9 + $0xac] ss:$16 sps:$4 sm:$0xff]  }
 0x15e   :  { %5472 = vmatpush3.bf16.msra.mxu0 %v6784_v62  ;;  %5504 = vmatpush3.bf16.msra.mxu1 %v6800_v33  ;;  %v5812_v62 = vld [vmem:[#allocation9 + $0xa0] ss:$16 sps:$4 sm:$0xff]   ;;  %v5815_v33 = vld [vmem:[#allocation9 + $0xa8] ss:$16 sps:$4 sm:$0xff]  }
 0x15f   :  { %5474 = vmatprep.subr.bf16.mxu0 %v6802_v37  ;;  %5506 = vmatprep.subr.bf16.mxu1 %v6811_v42  ;;  %v5820_v37 = vld [vmem:[#allocation9 + $0xc4] ss:$16 sps:$4 sm:$0xff]   ;;  %v5823_v42 = vld [vmem:[#allocation9 + $0xcc] ss:$16 sps:$4 sm:$0xff]  }
 0x162   :  { %5476 = vmatpush3.bf16.msra.mxu0 %v6820_v47  ;;  %5508 = vmatpush3.bf16.msra.mxu1 %v6830_v54  ;;  %v5818_v47 = vld [vmem:[#allocation9 + $0xc0] ss:$16 sps:$4 sm:$0xff]   ;;  %v5821_v54 = vld [vmem:[#allocation9 + $0xc8] ss:$16 sps:$4 sm:$0xff]  }
 0x163   :  { %5478 = vmatprep.subr.bf16.mxu0 %v6832_v55  ;;  %5510 = vmatprep.subr.bf16.mxu1 %v6835_v59  ;;  %v5826_v55 = vld [vmem:[#allocation9 + $0xe4] ss:$16 sps:$4 sm:$0xff]   ;;  %v5829_v59 = vld [vmem:[#allocation9 + $0xec] ss:$16 sps:$4 sm:$0xff]  }
 0x166   :  { %5480 = vmatpush3.bf16.msra.mxu0 %v6838_v60  ;;  %5512 = vmatpush3.bf16.msra.mxu1 %v6842_v27  ;;  %v5790_v27 = vld [vmem:[#allocation9 + $0x24] ss:$16 sps:$4 sm:$0xff]   ;;  %v5824_v60 = vld [vmem:[#allocation9 + $0xe0] ss:$16 sps:$4 sm:$0xff]  }
 0x167   :  { %5482 = vmatprep.subr.bf16.mxu0 %v6856_v31  ;;  %5514 = vmatprep.subr.bf16.mxu1 %v6867_v44  ;;  %v5827_v31 = vld [vmem:[#allocation9 + $0xe8] ss:$16 sps:$4 sm:$0xff]   ;;  %v5832_v44 = vld [vmem:[#allocation9 + $0x104] ss:$16 sps:$4 sm:$0xff]  }
 0x16a   :  { %5484 = vmatpush3.bf16.msra.mxu0 %v6869_v48  ;;  %5516 = vmatpush3.bf16.msra.mxu1 %v6878_v26  ;;  %v5788_v26 = vld [vmem:[#allocation9 + $0x20] ss:$16 sps:$4 sm:$0xff]   ;;  %v5835_v48 = vld [vmem:[#allocation9 + $0x10c] ss:$16 sps:$4 sm:$0xff]  }
 0x16b   :  { %2101 = vmatprep.subr.bf16.mxu0 %v5784_v20  ;;  %2183 = vmatprep.subr.bf16.mxu1 %v5787_v25  ;;  %v5848_v20 = vld [vmem:[#allocation9 + $0x160] ss:$16 sps:$4 sm:$0xff]  }
 0x16d   :  { %1129 = vmatmul.mubr.f32.vlgmr.msra.gmra.mrb[6].mxu0 %v1060_v13  ;;  %1199 = vmatmul.mubr.f32.vlgmr.msra.gmra.mrb[6].mxu1 %v1062_v14  ;;  %v5845_v13 = vld [vmem:[#allocation9 + $0x148] ss:$16 sps:$4 sm:$0xff]   ;;  %v5850_v14 = vld [vmem:[#allocation9 + $0x164] ss:$16 sps:$4 sm:$0xff]  }
 0x16e   :  { %2102 = vmatpush1.bf16.msra.mxu0 %v5782_v17  ;;  %2184 = vmatpush1.bf16.msra.mxu1 %v5785_v24  ;;  %v5853_v17 = vld [vmem:[#allocation9 + $0x16c] ss:$16 sps:$4 sm:$0xff]   ;;  %v5851_v24 = vld [vmem:[#allocation9 + $0x168] ss:$16 sps:$4 sm:$0xff]  }
 0x16f   :  { %2103 = vmatprep.subr.bf16.mxu0 %v5790_v27  ;;  %2185 = vmatprep.subr.bf16.mxu1 %v5793_v40 }
 0x172   :  { %2104 = vmatpush1.bf16.msra.mxu0 %v5788_v26  ;;  %2186 = vmatpush1.bf16.msra.mxu1 %v5791_v45 }
 0x173   :  { %2105 = vmatprep.subr.bf16.mxu0 %v5796_v46  ;;  %2187 = vmatprep.subr.bf16.mxu1 %v5799_v49 }
 0x176   :  { %2106 = vmatpush1.bf16.msra.mxu0 %v5794_v52  ;;  %2188 = vmatpush1.bf16.msra.mxu1 %v5797_v57 }
 0x177   :  { %2107 = vmatprep.subr.bf16.mxu0 %v5802_v58  ;;  %2189 = vmatprep.subr.bf16.mxu1 %v5805_v61 }
 0x17a   :  { %2108 = vmatpush1.bf16.msra.mxu0 %v5800_v28  ;;  %2190 = vmatpush1.bf16.msra.mxu1 %v5803_v35 }
 0x17b   :  { %2109 = vmatprep.subr.bf16.mxu0 %v5808_v36  ;;  %2191 = vmatprep.subr.bf16.mxu1 %v5811_v39 }
 0x17e   :  { %2110 = vmatpush1.bf16.msra.mxu0 %v5806_v43  ;;  %2192 = vmatpush1.bf16.msra.mxu1 %v5809_v51 }
 0x17f   :  { %2111 = vmatprep.subr.bf16.mxu0 %v5814_v53  ;;  %2193 = vmatprep.subr.bf16.mxu1 %v5817_v56 }
 0x182   :  { %2112 = vmatpush1.bf16.msra.mxu0 %v5812_v62  ;;  %2194 = vmatpush1.bf16.msra.mxu1 %v5815_v33 }
 0x183   :  { %2113 = vmatprep.subr.bf16.mxu0 %v5820_v37  ;;  %2195 = vmatprep.subr.bf16.mxu1 %v5823_v42 }
 0x186   :  { %2114 = vmatpush1.bf16.msra.mxu0 %v5818_v47  ;;  %2196 = vmatpush1.bf16.msra.mxu1 %v5821_v54 }
 0x187   :  { %2115 = vmatprep.subr.bf16.mxu0 %v5826_v55  ;;  %2197 = vmatprep.subr.bf16.mxu1 %v5829_v59 }
 0x18a   :  { %2116 = vmatpush1.bf16.msra.mxu0 %v5824_v60  ;;  %2198 = vmatpush1.bf16.msra.mxu1 %v5827_v31 }
 0x18b   :  { %2117 = vmatprep.subr.bf16.mxu0 %v5832_v44  ;;  %2199 = vmatprep.subr.bf16.mxu1 %v5835_v48 }
 0x18e   :  { %2118 = vmatpush1.bf16.msra.mxu0 %v5830_v38  ;;  %2200 = vmatpush1.bf16.msra.mxu1 %v5833_v41 }
 0x18f   :  { %2119 = vmatprep.subr.bf16.mxu0 %v5838_v63  ;;  %2201 = vmatprep.subr.bf16.mxu1 %v5841_v30  ;;  %v1225_v63 = vld [vmem:[%s7392_s7] sm:$0x1] }
 0x192   :  { %2120 = vmatpush1.bf16.msra.mxu0 %v5836_v34  ;;  %2202 = vmatpush1.bf16.msra.mxu1 %v5839_v23  ;;  %v1227_v23 = vld [vmem:[%s7393_s8] sm:$0x1] }
 0x193   :  { %2121 = vmatprep.subr.bf16.mxu0 %v5844_v32  ;;  %2203 = vmatprep.subr.bf16.mxu1 %v5847_v22  ;;  %v5854_v22 = vld [vmem:[#allocation9 + $0x180] ss:$16 sps:$4 sm:$0xff]  }
 0x196   :  { %2122 = vmatpush1.bf16.msra.mxu0 %v5842_v21  ;;  %2204 = vmatpush1.bf16.msra.mxu1 %v5845_v13  ;;  %v5856_v21 = vld [vmem:[#allocation9 + $0x184] ss:$16 sps:$4 sm:$0xff]   ;;  %v5857_v13 = vld [vmem:[#allocation9 + $0x188] ss:$16 sps:$4 sm:$0xff]  }
 0x197   :  { %2123 = vmatprep.subr.bf16.mxu0 %v5850_v14  ;;  %2205 = vmatprep.subr.bf16.mxu1 %v5853_v17  ;;  %v5859_v14 = vld [vmem:[#allocation9 + $0x18c] ss:$16 sps:$4 sm:$0xff]  }
 0x19a   :  { %2124 = vmatpush1.bf16.msra.mxu0 %v5848_v20  ;;  %2206 = vmatpush1.bf16.msra.mxu1 %v5851_v24  ;;  %v6142_v20 = vmov 0   ;;  %v5862_v24 = vld [vmem:[#allocation9 + $0x1a4] ss:$16 sps:$4 sm:$0xff]  }
 0x19b   :  { %2125 = vmatprep.subr.bf16.mxu0 %v5856_v21  ;;  %2207 = vmatprep.subr.bf16.mxu1 %v5859_v14  ;;  %v5878_v21 = vld [vmem:[#allocation9 + $0x200] ss:$16 sps:$4 sm:$0xff]   ;;  %v5886_v14 = vld [vmem:[#allocation9 + $0x224] ss:$16 sps:$4 sm:$0xff]  }
 0x19e   :  { %2126 = vmatpush1.bf16.msra.mxu0 %v5854_v22  ;;  %2208 = vmatpush1.bf16.msra.mxu1 %v5857_v13  ;;  %v5881_v13 = vld [vmem:[#allocation9 + $0x208] ss:$16 sps:$4 sm:$0xff]  }
 0x19f   :  { %2127 = vmatprep.subr.bf16.mxu0 %v5862_v24  ;;  %v5887_v24 = vld [vmem:[#allocation9 + $0x228] ss:$16 sps:$4 sm:$0xff]  }
 0x220   :  { %v4841_v25 = vpop.f32.mrb[4].mxu0  ;;  %v4876_v27 = vpop.f32.mrb[4].mxu1 }
 0x221   :  { %v4842_v40 = vpop.f32.mrb[5].mxu0  ;;  %v4877_v45 = vpop.f32.mrb[5].mxu1 }
 0x222   :  { %v4843_v26 = vadd.f32 %v4842_v40, %v4841_v25  ;;  %v4878_v46 = vadd.f32 %v4877_v45, %v4876_v27  ;;  %v5865_v25 = vld [vmem:[#allocation9 + $0x1ac] ss:$16 sps:$4 sm:$0xff]   ;;  %v5860_v27 = vld [vmem:[#allocation9 + $0x1a0] ss:$16 sps:$4 sm:$0xff]   ;;  %v5863_v40 = vld [vmem:[#allocation9 + $0x1a8] ss:$16 sps:$4 sm:$0xff]  }
 0x223   :  { %2209 = vmatprep.subr.bf16.mxu1 %v5865_v25  ;;  %2128 = vmatpush1.bf16.msra.mxu0 %v5860_v27  ;;  %v5871_v45 = vld [vmem:[#allocation9 + $0x1cc] ss:$16 sps:$4 sm:$0xff]   ;;  %v5892_v25 = vld [vmem:[#allocation9 + $0x244] ss:$16 sps:$4 sm:$0xff]  }
 0x224   :  { %v1057_v49 = vadd.f32 %v4878_v46, %v4843_v26  ;;  %2210 = vmatpush1.bf16.msra.mxu1 %v5863_v40  ;;  %v5868_v26 = vld [vmem:[#allocation9 + $0x1c4] ss:$16 sps:$4 sm:$0xff]   ;;  %v5866_v46 = vld [vmem:[#allocation9 + $0x1c0] ss:$16 sps:$4 sm:$0xff]   ;;  %v5895_v27 = vld [vmem:[#allocation9 + $0x24c] ss:$16 sps:$4 sm:$0xff]  }
 0x225   :  { %2129 = vmatprep.subr.bf16.mxu0 %v5868_v26  ;;  %2211 = vmatprep.subr.bf16.mxu1 %v5871_v45  ;;  %v5890_v40 = vld [vmem:[#allocation9 + $0x240] ss:$16 sps:$4 sm:$0xff]   ;;  %v5893_v26 = vld [vmem:[#allocation9 + $0x248] ss:$16 sps:$4 sm:$0xff]   ;;  %v5898_v45 = vld [vmem:[#allocation9 + $0x264] ss:$16 sps:$4 sm:$0xff]  }
 0x226   :  { %v1205_v52 = vsel %vm1204_vm0, %v1057_v49, 0.0  ;;  %v5869_v49 = vld [vmem:[#allocation9 + $0x1c8] ss:$16 sps:$4 sm:$0xff]  }
 0x227   :  { %v1206_v57 = vrot.slane %v1205_v52, 4  ;;  %2130 = vmatpush1.bf16.msra.mxu0 %v5866_v46  ;;  %v5901_v46 = vld [vmem:[#allocation9 + $0x26c] ss:$16 sps:$4 sm:$0xff]  }
 0x228   :  { %2212 = vmatpush1.bf16.msra.mxu1 %v5869_v49  ;;  %v5896_v49 = vld [vmem:[#allocation9 + $0x260] ss:$16 sps:$4 sm:$0xff]  }
 0x229   :  { %v1207_v58 = vadd.f32 %v1206_v57, %v1205_v52  ;;  %v5874_v52 = vld [vmem:[#allocation9 + $0x1e4] ss:$16 sps:$4 sm:$0xff]   ;;  %v5877_v57 = vld [vmem:[#allocation9 + $0x1ec] ss:$16 sps:$4 sm:$0xff]  }
 0x22a   :  { %2131 = vmatprep.subr.bf16.mxu0 %v5874_v52  ;;  %2213 = vmatprep.subr.bf16.mxu1 %v5877_v57  ;;  %v5899_v52 = vld [vmem:[#allocation9 + $0x268] ss:$16 sps:$4 sm:$0xff]   ;;  %v5904_v57 = vld [vmem:[#allocation9 + $0x284] ss:$16 sps:$4 sm:$0xff]  }
 0x22b   :  { %v1208_v61 = vrot.slane %v1207_v58, 2 }
 0x22d   :  { %v1209_v53 = vadd.f32 %v1208_v61, %v1207_v58  ;;  %v5872_v58 = vld [vmem:[#allocation9 + $0x1e0] ss:$16 sps:$4 sm:$0xff]   ;;  %v5875_v61 = vld [vmem:[#allocation9 + $0x1e8] ss:$16 sps:$4 sm:$0xff]  }
 0x22e   :  { %2132 = vmatpush1.bf16.msra.mxu0 %v5872_v58  ;;  %2214 = vmatpush1.bf16.msra.mxu1 %v5875_v61  ;;  %v5907_v58 = vld [vmem:[#allocation9 + $0x28c] ss:$16 sps:$4 sm:$0xff]   ;;  %v5902_v61 = vld [vmem:[#allocation9 + $0x280] ss:$16 sps:$4 sm:$0xff]  }
 0x22f   :  { %v1210_v33 = vrot.slane %v1209_v53, 1 }
 0x231   :  { %v1211_v47 = vadd.f32 %v1210_v33, %v1209_v53 }
 0x233   :  { %v1212_v59 = vmul.f32 0.00048828125, %v1211_v47 }
 0x235   :  { %v1221_v44 = vmul.f32 %v1212_v59, %v1212_v59 }
 0x240   :  { %v4911_v28 = vpop.f32.mrb[6].mxu0  ;;  %v4946_v35 = vpop.f32.mrb[6].mxu1 }
 0x241   :  { %v4912_v36 = vpop.f32.mrb[7].mxu0  ;;  %v4947_v43 = vpop.f32.mrb[7].mxu1 }
 0x242   :  { %v4913_v39 = vadd.f32 %v4912_v36, %v4911_v28  ;;  %v4948_v51 = vadd.f32 %v4947_v43, %v4946_v35  ;;  %v5880_v28 = vld [vmem:[#allocation9 + $0x204] ss:$16 sps:$4 sm:$0xff]   ;;  %v5883_v35 = vld [vmem:[#allocation9 + $0x20c] ss:$16 sps:$4 sm:$0xff]  }
 0x243   :  { %2142 = vmatprep.subr.bf16.mxu0 %v5880_v28  ;;  %2224 = vmatprep.subr.bf16.mxu1 %v5883_v35  ;;  %v5905_v28 = vld [vmem:[#allocation9 + $0x288] ss:$16 sps:$4 sm:$0xff]   ;;  %v5910_v35 = vld [vmem:[#allocation9 + $0x2a4] ss:$16 sps:$4 sm:$0xff]  }
 0x244   :  { %v1201_v56 = vadd.f32 %v4948_v51, %v4913_v39 }
 0x246   :  { %v1213_v62 = vsel %vm1204_vm0, %v1201_v56, 0.0 }
 0x247   :  { %v1214_v37 = vrot.slane %v1213_v62, 4 }
 0x249   :  { %v1215_v42 = vadd.f32 %v1214_v37, %v1213_v62 }
 0x24b   :  { %v1216_v54 = vrot.slane %v1215_v42, 2 }
 0x24d   :  { %v1217_v55 = vadd.f32 %v1216_v54, %v1215_v42 }
 0x24f   :  { %v1218_v60 = vrot.slane %v1217_v55, 1 }
 0x251   :  { %v1219_v31 = vadd.f32 %v1218_v60, %v1217_v55 }
 0x253   :  { %v1220_v48 = vmul.f32 0.00048828125, %v1219_v31 }
 0x255   :  { %v1222_v38 = vsub.f32 %v1220_v48, %v1221_v44 }
 0x257   :  { %v1223_v41 = vadd.f32 1e-05, %v1222_v38 }
 0x259   :  { %5974 = vrsqrt.f32 %v1223_v41 }
 0x263   :  { %v5975_v30 = vpop.eup %5974 }
 0x264   :  { %v1226_v34 = vmul.f32 %v5975_v30, %v1225_v63 }
 0x266   :  { %1261 = vperm.xlu0 %5681, %v1226_v34   ;;  %v1228_v32 = vmul.f32 %v1226_v34, %v1212_v59 }
 0x268   :  { %v1229_v17 = vsub.f32 %v1227_v23, %v1228_v32 }
 0x26a   :  { %5682 = vset.pattern.permute.xlu0 %v6142_v20  ;;  %1286 = vperm.xlu1 %5683, %v1229_v17  }
 0x26b   :  { %1253 = vperm.xlu0 %5682, %v1226_v34  }
 0x26e   :  { %5684 = vset.pattern.permute.xlu1 %v6142_v20 }
 0x26f   :  { %1274 = vperm.xlu1 %5684, %v1229_v17   ;;  %5685 = vset.pattern.permute.xlu0 %v6141_v16  ;;  %v5889_v17 = vld [vmem:[#allocation9 + $0x22c] ss:$16 sps:$4 sm:$0xff]  }
 0x2e5   :  { %v1262_v36 = vpop.permute.xlu0 %1261 }
 0x2e6   :  { %v1264_v39 = vmul.f32 0.0, %v1262_v36 }
 0x2e9   :  { %v1287_v43 = vpop.permute.xlu1 %1286 }
 0x2ea   :  { %v1254_v51 = vpop.permute.xlu0 %1253  ;;  %v1292_v53 = vrot.slane %v1287_v43, %v6890_v50  ;;  %v5911_v43 = vld [vmem:[#allocation9 + $0x2a8] ss:$16 sps:$4 sm:$0xff]  }
 0x2eb   :  { %v1258_v56 = vmul.f32 0.0, %v1254_v51  ;;  %v1268_v62 = vadd.f32 %v1264_v39, %v1254_v51  ;;  %v5908_v39 = vld [vmem:[#allocation9 + $0x2a0] ss:$16 sps:$4 sm:$0xff]   ;;  %v5916_v51 = vld [vmem:[#allocation9 + $0x2c4] ss:$16 sps:$4 sm:$0xff]  }
 0x2ec   :  { %v1293_v47 = vmul.f32 0.0, %v1292_v53 }
 0x2ed   :  { %v1270_v33 = vadd.f32 %v1262_v36, %v1258_v56  ;;  %v1304_v37 = vrot.slane %v1268_v62, %v6890_v50  ;;  %v5913_v36 = vld [vmem:[#allocation9 + $0x2ac] ss:$16 sps:$4 sm:$0xff]   ;;  %v5914_v56 = vld [vmem:[#allocation9 + $0x2c0] ss:$16 sps:$4 sm:$0xff]   ;;  %v5917_v62 = vld [vmem:[#allocation9 + $0x2c8] ss:$16 sps:$4 sm:$0xff]  }
 0x2ee   :  { %v1275_v42 = vpop.permute.xlu1 %1274 }
 0x2ef   :  { %v6959_v54 = vrot.slane %v1270_v33, %v6890_v50  ;;  %v1280_v55 = vrot.slane %v1275_v42, %v6890_v50  ;;  %v1317_v59 = vmul.f32 %v1304_v37, %v6895_v18  ;;  %v1318_v60 = vmul.f32 %v1304_v37, %v6893_v19  ;;  %v5922_v33 = vld [vmem:[#allocation9 + $0x2e4] ss:$16 sps:$4 sm:$0xff]   ;;  %v5925_v37 = vld [vmem:[#allocation9 + $0x2ec] ss:$16 sps:$4 sm:$0xff]   ;;  %v5920_v42 = vld [vmem:[#allocation9 + $0x2e0] ss:$16 sps:$4 sm:$0xff]  }
 0x2f1   :  { %v1283_v31 = vmul.f32 0.0, %v1280_v55  ;;  %v1297_v44 = vadd.f32 %v1293_v47, %v1280_v55  ;;  %v1320_v48 = vmul.f32 %v6959_v54, %v6897_v15  ;;  %v5884_v15 = vld [vmem:[#allocation9 + $0x220] ss:$16 sps:$4 sm:$0xff]   ;;  %v5923_v47 = vld [vmem:[#allocation9 + $0x2e8] ss:$16 sps:$4 sm:$0xff]  }
 0x2f2   :  { %v5928_v55 = vld [vmem:[#allocation9 + $0x304] ss:$16 sps:$4 sm:$0xff]  }
 0x2f3   :  { %v6966_v38 = vadd.f32 %v1292_v53, %v1283_v31  ;;  %v1321_v41 = vadd.f32 %v1317_v59, %v1297_v44  ;;  %v1322_v63 = vadd.f32 %v1318_v60, %v1297_v44  ;;  %v5919_v53 = vld [vmem:[#allocation9 + $0x2cc] ss:$16 sps:$4 sm:$0xff]   ;;  %v5926_v60 = vld [vmem:[#allocation9 + $0x300] ss:$16 sps:$4 sm:$0xff]   ;;  %v5929_v31 = vld [vmem:[#allocation9 + $0x308] ss:$16 sps:$4 sm:$0xff]  }
 0x2f4   :  { %v5931_v59 = vld [vmem:[#allocation9 + $0x30c] ss:$16 sps:$4 sm:$0xff]   ;;  %v5934_v44 = vld [vmem:[#allocation9 + $0x324] ss:$16 sps:$4 sm:$0xff]  }
 0x2f5   :  { %v1325_v30 = vmax.f32 %v1321_v41, 0.0  ;;  %v1326_v34 = vmax.f32 %v1322_v63, 0.0  ;;  %v1324_v23 = vadd.f32 %v1320_v48, %v6966_v38  ;;  %v5937_v48 = vld [vmem:[#allocation9 + $0x32c] ss:$16 sps:$4 sm:$0xff]   ;;  %v5932_v41 = vld [vmem:[#allocation9 + $0x320] ss:$16 sps:$4 sm:$0xff]  }
 0x2f6   :  { %v5935_v63 = vld [vmem:[#allocation9 + $0x328] ss:$16 sps:$4 sm:$0xff]  }
 0x2f7   :  { %v1457_v32 = vpack.c.bf16 %v1325_v30, %v1325_v30  ;;  %v1458_v22 = vpack.c.bf16 %v1326_v34, %v1326_v34  ;;  %v1328_v18 = vmax.f32 %v1324_v23, 0.0  ;;  %v5940_v30 = vld [vmem:[#allocation9 + $0x344] ss:$16 sps:$4 sm:$0xff]   ;;  %v5943_v34 = vld [vmem:[#allocation9 + $0x34c] ss:$16 sps:$4 sm:$0xff]  }
 0x2f8   :  { %v5938_v23 = vld [vmem:[#allocation9 + $0x340] ss:$16 sps:$4 sm:$0xff]  }
 0x2f9   :  { %2133 = vmatprep.mubr.bf16.mxu0 %v1458_v22  ;;  %2215 = vmatprep.mubr.bf16.mxu1 %v1458_v22  ;;  %v1460_v19 = vpack.c.bf16 %v1328_v18, %v1328_v18  ;;  %v5946_v22 = vld [vmem:[#allocation9 + $0x364] ss:$16 sps:$4 sm:$0xff]   ;;  %v5947_v18 = vld [vmem:[#allocation9 + $0x368] ss:$16 sps:$4 sm:$0xff]  }
 0x2fa   :  { %2134 = vmatmul.mubr.bf16.vlgmr.msra.gmra.mrb[8].mxu0 %v1457_v32  ;;  %2216 = vmatmul.mubr.bf16.vlgmr.msra.gmra.mrb[8].mxu1 %v1457_v32  ;;  %v5941_v32 = vld [vmem:[#allocation9 + $0x348] ss:$16 sps:$4 sm:$0xff]  }
 0x2fb   :  { %2143 = vmatpush1.bf16.msra.mxu0 %v5878_v21  ;;  %2225 = vmatpush1.bf16.msra.mxu1 %v5881_v13  ;;  %v5949_v21 = vld [vmem:[#allocation9 + $0x36c] ss:$16 sps:$4 sm:$0xff]   ;;  %v5944_v13 = vld [vmem:[#allocation9 + $0x360] ss:$16 sps:$4 sm:$0xff]  }
 0x2fc   :  { %2174 = vmatprep.mubr.bf16.mxu0 %v1460_v19  ;;  %2256 = vmatprep.mubr.bf16.mxu1 %v1460_v19  ;;  %v5952_v19 = vld [vmem:[#allocation9 + $0x384] ss:$16 sps:$4 sm:$0xff]  }
 0x2fd   :  { %2144 = vmatprep.subr.bf16.mxu0 %v5886_v14  ;;  %2226 = vmatprep.subr.bf16.mxu1 %v5889_v17  ;;  %v5955_v14 = vld [vmem:[#allocation9 + $0x38c] ss:$16 sps:$4 sm:$0xff]   ;;  %v5950_v17 = vld [vmem:[#allocation9 + $0x380] ss:$16 sps:$4 sm:$0xff]  }
 0x2ff   :  { %2145 = vmatpush1.bf16.msra.mxu0 %v5884_v15  ;;  %2227 = vmatpush1.bf16.msra.mxu1 %v5887_v24  ;;  %v5953_v15 = vld [vmem:[#allocation9 + $0x388] ss:$16 sps:$4 sm:$0xff]   ;;  %v5958_v24 = vld [vmem:[#allocation9 + $0x3a4] ss:$16 sps:$4 sm:$0xff]  }
 0x300   :  { %2146 = vmatprep.subr.bf16.mxu0 %v5892_v25  ;;  %2228 = vmatprep.subr.bf16.mxu1 %v5895_v27  ;;  %v5961_v25 = vld [vmem:[#allocation9 + $0x3ac] ss:$16 sps:$4 sm:$0xff]   ;;  %v5956_v27 = vld [vmem:[#allocation9 + $0x3a0] ss:$16 sps:$4 sm:$0xff]  }
 0x303   :  { %2147 = vmatpush1.bf16.msra.mxu0 %v5890_v40  ;;  %2229 = vmatpush1.bf16.msra.mxu1 %v5893_v26  ;;  %v5959_v40 = vld [vmem:[#allocation9 + $0x3a8] ss:$16 sps:$4 sm:$0xff]   ;;  %v5964_v26 = vld [vmem:[#allocation9 + $0x3c4] ss:$16 sps:$4 sm:$0xff]  }
 0x304   :  { %2148 = vmatprep.subr.bf16.mxu0 %v5898_v45  ;;  %2230 = vmatprep.subr.bf16.mxu1 %v5901_v46  ;;  %v5967_v45 = vld [vmem:[#allocation9 + $0x3cc] ss:$16 sps:$4 sm:$0xff]   ;;  %v1319_v46 = vmul.f32 %v6959_v54, %v6899_v12 }
 0x307   :  { %2149 = vmatpush1.bf16.msra.mxu0 %v5896_v49  ;;  %2231 = vmatpush1.bf16.msra.mxu1 %v5899_v52  ;;  %v5962_v49 = vld [vmem:[#allocation9 + $0x3c0] ss:$16 sps:$4 sm:$0xff]   ;;  %v5965_v52 = vld [vmem:[#allocation9 + $0x3c8] ss:$16 sps:$4 sm:$0xff]  }
 0x308   :  { %2150 = vmatprep.subr.bf16.mxu0 %v5904_v57  ;;  %2232 = vmatprep.subr.bf16.mxu1 %v5907_v58  ;;  %v1323_v57 = vadd.f32 %v1319_v46, %v6966_v38  ;;  %v5970_v58 = vld [vmem:[#allocation9 + $0x3e4] ss:$16 sps:$4 sm:$0xff]  }
 0x30b   :  { %2151 = vmatpush1.bf16.msra.mxu0 %v5902_v61  ;;  %2233 = vmatpush1.bf16.msra.mxu1 %v5905_v28  ;;  %v5973_v61 = vld [vmem:[#allocation9 + $0x3ec] ss:$16 sps:$4 sm:$0xff]   ;;  %v5968_v28 = vld [vmem:[#allocation9 + $0x3e0] ss:$16 sps:$4 sm:$0xff]  }
 0x30c   :  { %2152 = vmatprep.subr.bf16.mxu0 %v5910_v35  ;;  %2234 = vmatprep.subr.bf16.mxu1 %v5913_v36  ;;  %v5971_v35 = vld [vmem:[#allocation9 + $0x3e8] ss:$16 sps:$4 sm:$0xff]   ;;  %v1327_v36 = vmax.f32 %v1323_v57, 0.0 }
 0x30e   :  { %v1459_v12 = vpack.c.bf16 %v1327_v36, %v1327_v36 }
 0x30f   :  { %2153 = vmatpush1.bf16.msra.mxu0 %v5908_v39  ;;  %2235 = vmatpush1.bf16.msra.mxu1 %v5911_v43 }
 0x310   :  { %2154 = vmatprep.subr.bf16.mxu0 %v5916_v51  ;;  %2236 = vmatprep.subr.bf16.mxu1 %v5919_v53 }
 0x313   :  { %2155 = vmatpush1.bf16.msra.mxu0 %v5914_v56  ;;  %2237 = vmatpush1.bf16.msra.mxu1 %v5917_v62 }
 0x314   :  { %2156 = vmatprep.subr.bf16.mxu0 %v5922_v33  ;;  %2238 = vmatprep.subr.bf16.mxu1 %v5925_v37 }
 0x317   :  { %2157 = vmatpush1.bf16.msra.mxu0 %v5920_v42  ;;  %2239 = vmatpush1.bf16.msra.mxu1 %v5923_v47 }
 0x318   :  { %2158 = vmatprep.subr.bf16.mxu0 %v5928_v55  ;;  %2240 = vmatprep.subr.bf16.mxu1 %v5931_v59 }
 0x31b   :  { %2159 = vmatpush1.bf16.msra.mxu0 %v5926_v60  ;;  %2241 = vmatpush1.bf16.msra.mxu1 %v5929_v31 }
 0x31c   :  { %2160 = vmatprep.subr.bf16.mxu0 %v5934_v44  ;;  %2242 = vmatprep.subr.bf16.mxu1 %v5937_v48 }
 0x31f   :  { %2161 = vmatpush1.bf16.msra.mxu0 %v5932_v41  ;;  %2243 = vmatpush1.bf16.msra.mxu1 %v5935_v63 }
 0x320   :  { %2162 = vmatprep.subr.bf16.mxu0 %v5940_v30  ;;  %2244 = vmatprep.subr.bf16.mxu1 %v5943_v34 }
 0x323   :  { %2163 = vmatpush1.bf16.msra.mxu0 %v5938_v23  ;;  %2245 = vmatpush1.bf16.msra.mxu1 %v5941_v32 }
 0x324   :  { %2164 = vmatprep.subr.bf16.mxu0 %v5946_v22  ;;  %2246 = vmatprep.subr.bf16.mxu1 %v5949_v21 }
 0x327   :  { %2165 = vmatpush1.bf16.msra.mxu0 %v5944_v13  ;;  %2247 = vmatpush1.bf16.msra.mxu1 %v5947_v18 }
 0x328   :  { %2166 = vmatprep.subr.bf16.mxu0 %v5952_v19  ;;  %2248 = vmatprep.subr.bf16.mxu1 %v5955_v14 }
 0x32b   :  { %2167 = vmatpush1.bf16.msra.mxu0 %v5950_v17  ;;  %2249 = vmatpush1.bf16.msra.mxu1 %v5953_v15 }
 0x32c   :  { %2168 = vmatprep.subr.bf16.mxu0 %v5958_v24  ;;  %2250 = vmatprep.subr.bf16.mxu1 %v5961_v25 }
 0x32f   :  { %2169 = vmatpush1.bf16.msra.mxu0 %v5956_v27  ;;  %2251 = vmatpush1.bf16.msra.mxu1 %v5959_v40 }
 0x330   :  { %2170 = vmatprep.subr.bf16.mxu0 %v5964_v26  ;;  %2252 = vmatprep.subr.bf16.mxu1 %v5967_v45 }
 0x333   :  { %2171 = vmatpush1.bf16.msra.mxu0 %v5962_v49  ;;  %2253 = vmatpush1.bf16.msra.mxu1 %v5965_v52 }
 0x334   :  { %2172 = vmatprep.subr.bf16.mxu0 %v5970_v58  ;;  %2254 = vmatprep.subr.bf16.mxu1 %v5973_v61 }
 0x337   :  { %2173 = vmatpush1.bf16.msra.mxu0 %v5968_v28  ;;  %2255 = vmatpush1.bf16.msra.mxu1 %v5971_v35 }
 0x33a   :  { %2175 = vmatmul.mubr.bf16.vlgmr.msra.gmra.mrb[8].mxu0 %v1459_v12  ;;  %2257 = vmatmul.mubr.bf16.vlgmr.msra.gmra.mrb[8].mxu1 %v1459_v12 }
 0x40d   :  { %v2176_v54 = vpop.f32.mrb[8].mxu0  ;;  %v2258_v39 = vpop.f32.mrb[8].mxu1 }
 0x40e   :  { %v2178_v43 = vpop.f32.mrb[9].mxu0  ;;  %v2260_v38 = vpop.f32.mrb[9].mxu1 }
 0x40f   :  { %v2265_v51 = vmax.f32 %v2176_v54, %v2178_v43  ;;  %v2266_v53 = vmax.f32 %v2258_v39, %v2260_v38  ;;  %v2180_v56 = vpop.f32.mrb[10].mxu0  ;;  %v2262_v62 = vpop.f32.mrb[10].mxu1 }
 0x410   :  { %v2181_v33 = vpop.f32.mrb[11].mxu0  ;;  %v2263_v37 = vpop.f32.mrb[11].mxu1 }
 0x411   :  { %v2267_v42 = vmax.f32 %v2265_v51, %v2266_v53 }
 0x412   :  { %6124 = dma.done.wait [#allocation8], 1024 }
 0x413   :  { %6125 = vsyncadd [#allocation8], 4294966272  ;;  %5976 = vset.pattern.permute.xlu0 %v6142_v20  ;;  %5978 = vset.pattern.permute.xlu1 %v6142_v20  ;;  %v6143_v47 = vmov 0.0   ;;  %vm6144_vm1 = vmmov 0   ;;  %v6145_v55 = vmov 0.0|0.0   ;;  %v2328_v20 = vld [vmem:[%s7389_s4] sm:$0xff]  ;;  %v2272_v13 = vpack.c.bf16 %v2267_v42, %v2267_v42 }
 0x414   :  { %5087 = vmatprep.subr.bf16.mxu0 %v6143_v47  ;;  %5103 = vmatprep.mubr.msk.bf16.mxu0 %vm6144_vm1, %v6143_v47  ;;  %v2330_v59 = vld [vmem:[%s7389_s4 + $0x10] sm:$0xff]  ;;  %v2331_v31 = vld [vmem:[%s7389_s4 + $0x18] sm:$0xff]  ;;  %v2332_v44 = vld [vmem:[%s7389_s4 + $0x20] sm:$0xff]  ;;  %vm2510_vm2 = vcmp.lt.s32.totalorder %v6882_v29, 64 }
 0x415   :  { %5088 = vmatpush3.bf16.msra.mxu0 %v6260_v0  ;;  %5517 = vmatprep.subr.bf16.mxu1 %v6145_v55  ;;  %v2329_v0 = vld [vmem:[%s7389_s4 + $0x8] sm:$0xff]  ;;  %v2335_v63 = vld [vmem:[%s7389_s4 + $0x38] sm:$0xff]  ;;  %v4766_v14 = vld [vmem:[%s7391_s6] ss:$0 sm:$0xff] }
 0x416   :  { %5089 = vmatprep.subr.bf16.mxu0 %v6143_v47  ;;  %5139 = vmatprep.mubr.msk.f32.mxu1 %vm6144_vm1, %v6143_v47  ;;  %v5518_v60 = vpack.c.bf16 %v2329_v0, %v2328_v20  ;;  %v2333_v48 = vld [vmem:[%s7389_s4 + $0x28] sm:$0xff]  ;;  %v2339_v32 = vld [vmem:[%s7389_s4 + $0x58] sm:$0xff]  ;;  %v2505_v20 = vld [vmem:[%s7394_s9] sm:$0x1] }
 0x417   :  { %v5524_v41 = vpack.c.bf16 %v2333_v48, %v2332_v44  ;;  %v2337_v34 = vld [vmem:[%s7389_s4 + $0x48] sm:$0xff]  ;;  %v4767_v48 = vsel %vm2510_vm2, 1.0, %v6143_v47 }
 0x418   :  { %5519 = vmatpush3.bf16.msra.mxu1 %v5518_v60  ;;  %v2341_v21 = vld [vmem:[%s7389_s4 + $0x68] sm:$0xff] }
 0x419   :  { %5090 = vmatpush3.bf16.msra.mxu0 %v6265_v1  ;;  %v5521_v1 = vpack.c.bf16 %v2331_v31, %v2330_v59  ;;  %5520 = vmatprep.subr.bf16.mxu1 %v6145_v55 }
 0x41a   :  { %5091 = vmatprep.subr.bf16.mxu0 %v6143_v47 }
 0x41c   :  { %5522 = vmatpush3.bf16.msra.mxu1 %v5521_v1 }
 0x41d   :  { %5092 = vmatpush3.bf16.msra.mxu0 %v6270_v2  ;;  %5523 = vmatprep.subr.bf16.mxu1 %v6145_v55  ;;  %v2334_v2 = vld [vmem:[%s7389_s4 + $0x30] sm:$0xff] }
 0x41e   :  { %5093 = vmatprep.subr.bf16.mxu0 %v6143_v47  ;;  %v5527_v30 = vpack.c.bf16 %v2335_v63, %v2334_v2 }
 0x420   :  { %5525 = vmatpush3.bf16.msra.mxu1 %v5524_v41 }
 0x421   :  { %5094 = vmatpush3.bf16.msra.mxu0 %v6275_v3  ;;  %5526 = vmatprep.subr.bf16.mxu1 %v6145_v55  ;;  %v2336_v3 = vld [vmem:[%s7389_s4 + $0x40] sm:$0xff] }
 0x422   :  { %5095 = vmatprep.subr.bf16.mxu0 %v6143_v47  ;;  %v5530_v23 = vpack.c.bf16 %v2337_v34, %v2336_v3 }
 0x424   :  { %5528 = vmatpush3.bf16.msra.mxu1 %v5527_v30 }
 0x425   :  { %5096 = vmatpush3.bf16.msra.mxu0 %v6280_v4  ;;  %5529 = vmatprep.subr.bf16.mxu1 %v6145_v55  ;;  %v2338_v4 = vld [vmem:[%s7389_s4 + $0x50] sm:$0xff] }
 0x426   :  { %5097 = vmatprep.subr.bf16.mxu0 %v6143_v47  ;;  %v5533_v22 = vpack.c.bf16 %v2339_v32, %v2338_v4 }
 0x428   :  { %5531 = vmatpush3.bf16.msra.mxu1 %v5530_v23 }
 0x429   :  { %5098 = vmatpush3.bf16.msra.mxu0 %v6285_v5  ;;  %5532 = vmatprep.subr.bf16.mxu1 %v6145_v55  ;;  %v2340_v5 = vld [vmem:[%s7389_s4 + $0x60] sm:$0xff] }
 0x42a   :  { %5099 = vmatprep.subr.bf16.mxu0 %v6143_v47  ;;  %v5536_v18 = vpack.c.bf16 %v2341_v21, %v2340_v5 }
 0x42c   :  { %5534 = vmatpush3.bf16.msra.mxu1 %v5533_v22 }
 0x42d   :  { %5100 = vmatpush3.bf16.msra.mxu0 %v6290_v6  ;;  %5535 = vmatprep.subr.bf16.mxu1 %v6145_v55  ;;  %v2342_v6 = vld [vmem:[%s7389_s4 + $0x70] sm:$0xff] }
 0x42e   :  { %5101 = vmatprep.subr.bf16.mxu0 %v6143_v47 }
 0x430   :  { %5537 = vmatpush3.bf16.msra.mxu1 %v5536_v18 }
 0x431   :  { %5102 = vmatpush3.bf16.msra.mxu0 %v6295_v7  ;;  %5538 = vmatprep.subr.bf16.mxu1 %v6145_v55  ;;  %v2343_v7 = vld [vmem:[%s7389_s4 + $0x78] sm:$0xff] }
 0x432   :  { %5541 = vmatprep.subr.bf16.mxu0 %v6145_v55  ;;  %v5539_v19 = vpack.c.bf16 %v2343_v7, %v2342_v6 }
 0x434   :  { %5104 = vmatmul.mubr.bf16.vlgmr.msra.gmra.mrb[12].mxu0 %v2272_v13  ;;  %5540 = vmatpush3.bf16.msra.mxu1 %v5539_v19 }
 0x435   :  { %5543 = vmatpush3.bf16.msra.mxu0 %v5518_v60  ;;  %5174 = vmatprep.mubr.msk.f32.mxu0 %vm6144_vm1, %v6143_v47  ;;  %v2507_v60 = vld [vmem:[%s7395_s10] sm:$0x1] }
 0x436   :  { %5544 = vmatprep.subr.bf16.mxu0 %v6145_v55  ;;  %5177 = vmatprep.subr.bf16.mxu1 %v6143_v47 }
 0x439   :  { %5546 = vmatpush3.bf16.msra.mxu0 %v5521_v1 }
 0x43a   :  { %5547 = vmatprep.subr.bf16.mxu0 %v6145_v55 }
 0x43d   :  { %5549 = vmatpush3.bf16.msra.mxu0 %v5524_v41  ;;  %v2513_v41 = vsub.f32 1.0, %v4767_v48 }
 0x43e   :  { %5550 = vmatprep.subr.bf16.mxu0 %v6145_v55 }
 0x441   :  { %5552 = vmatpush3.bf16.msra.mxu0 %v5527_v30 }
 0x442   :  { %5553 = vmatprep.subr.bf16.mxu0 %v6145_v55 }
 0x445   :  { %5555 = vmatpush3.bf16.msra.mxu0 %v5530_v23 }
 0x446   :  { %5556 = vmatprep.subr.bf16.mxu0 %v6145_v55 }
 0x449   :  { %5558 = vmatpush3.bf16.msra.mxu0 %v5533_v22 }
 0x44a   :  { %5559 = vmatprep.subr.bf16.mxu0 %v6145_v55 }
 0x44d   :  { %5561 = vmatpush3.bf16.msra.mxu0 %v5536_v18 }
 0x44e   :  { %5562 = vmatprep.subr.bf16.mxu0 %v6145_v55 }
 0x451   :  { %5564 = vmatpush3.bf16.msra.mxu0 %v5539_v19 }
 0x507   :  { %v2322_v17 = vpop.f32.mrb[12].mxu0 }
 0x508   :  { %v2323_v15 = vadd.f32 %v4766_v14, %v2322_v17  ;;  %v5105_v24 = vpop.f32.mrb[13].mxu0 }
 0x509   :  { %v2325_v25 = vpop.f32.mrb[14].mxu0 }
 0x50a   :  { %v2414_v27 = vmul.f32 %v2323_v15, %v2323_v15  ;;  %v5106_v40 = vpop.f32.mrb[15].mxu0  ;;  %5140 = vmatmul.mubr.f32.vlgmr.msra.gmra.mrb[12].mxu1 %v2323_v15 }
 0x50b   :  { %5193 = vmatprep.mubr.msk.bf16.mxu1 %vm6144_vm1, %v6143_v47 }
 0x50c   :  { %5175 = vmatmul.mubr.f32.vlgmr.msra.gmra.mrb[16].mxu0 %v2414_v27 }
 0x5dd   :  { %v2410_v26 = vpop.f32.mrb[12].mxu1 }
 0x5de   :  { %v2485_v45 = vsel %vm1204_vm0, %v2410_v26, 0.0  ;;  %v5141_v46 = vpop.f32.mrb[13].mxu1 }
 0x5df   :  { %v2486_v49 = vrot.slane %v2485_v45, 4  ;;  %v2481_v52 = vpop.f32.mrb[16].mxu0 }
 0x5e0   :  { %v2493_v57 = vsel %vm1204_vm0, %v2481_v52, 0.0  ;;  %v5176_v58 = vpop.f32.mrb[17].mxu0 }
 0x5e1   :  { %v2487_v61 = vadd.f32 %v2486_v49, %v2485_v45  ;;  %v2494_v28 = vrot.slane %v2493_v57, 4 }
 0x5e3   :  { %v2488_v35 = vrot.slane %v2487_v61, 2  ;;  %v2495_v36 = vadd.f32 %v2494_v28, %v2493_v57 }
 0x5e5   :  { %v2489_v12 = vadd.f32 %v2488_v35, %v2487_v61  ;;  %v2496_v54 = vrot.slane %v2495_v36, 2 }
 0x5e7   :  { %v2490_v39 = vrot.slane %v2489_v12, 1  ;;  %v2497_v43 = vadd.f32 %v2496_v54, %v2495_v36 }
 0x5e9   :  { %v2491_v38 = vadd.f32 %v2490_v39, %v2489_v12  ;;  %v2498_v51 = vrot.slane %v2497_v43, 1 }
 0x5eb   :  { %v2492_v53 = vmul.f32 0.001953125, %v2491_v38  ;;  %v2499_v56 = vadd.f32 %v2498_v51, %v2497_v43 }
 0x5ed   :  { %v2501_v62 = vmul.f32 %v2492_v53, %v2492_v53  ;;  %v2500_v33 = vmul.f32 0.001953125, %v2499_v56 }
 0x5ef   :  { %v2502_v37 = vsub.f32 %v2500_v33, %v2501_v62 }
 0x5f1   :  { %v2503_v42 = vadd.f32 1e-05, %v2502_v37 }
 0x5f3   :  { %5980 = vrsqrt.f32 %v2503_v42 }
 0x5fd   :  { %v5981_v0 = vpop.eup %5980 }
 0x5fe   :  { %v2506_v59 = vmul.f32 %v5981_v0, %v2505_v20 }
 0x600   :  { %2516 = vperm.xlu0 %5976, %v2506_v59   ;;  %v2508_v31 = vmul.f32 %v2506_v59, %v2492_v53 }
 0x602   :  { %v2509_v1 = vsub.f32 %v2507_v60, %v2508_v31 }
 0x604   :  { %5977 = vset.pattern.permute.xlu0 %v6141_v16  ;;  %2528 = vperm.xlu1 %5978, %v2509_v1  }
 0x605   :  { %2521 = vperm.xlu0 %5977, %v2506_v59  }
 0x608   :  { %5979 = vset.pattern.permute.xlu1 %v6141_v16 }
 0x609   :  { %2537 = vperm.xlu1 %5979, %v2509_v1  }
 0x67f   :  { %v2517_v44 = vpop.permute.xlu0 %2516 }
 0x680   :  { %v2519_v30 = vmul.f32 %v4767_v48, %v2517_v44 }
 0x683   :  { %v2529_v2 = vpop.permute.xlu1 %2528 }
 0x684   :  { %v2522_v63 = vpop.permute.xlu0 %2521  ;;  %v2534_v34 = vrot.slane %v2529_v2, %v6890_v50 }
 0x685   :  { %v2524_v3 = vmul.f32 %v2522_v63, %v2513_v41 }
 0x686   :  { %v2535_v16 = vmul.f32 %v4767_v48, %v2534_v34 }
 0x687   :  { %v2525_v23 = vadd.f32 %v2524_v3, %v2519_v30 }
 0x688   :  { %v2538_v4 = vpop.permute.xlu1 %2537 }
 0x689   :  { %v2549_v32 = vrot.slane %v2525_v23, %v6890_v50  ;;  %v2543_v22 = vrot.slane %v2538_v4, %v6890_v50 }
 0x68b   :  { %v2544_v5 = vmul.f32 %v2543_v22, %v2513_v41  ;;  %v2550_v21 = vmul.f32 %v2549_v32, %v2323_v15 }
 0x68d   :  { %v2545_v13 = vadd.f32 %v2544_v5, %v2535_v16 }
 0x68f   :  { %v2551_v18 = vadd.f32 %v2550_v21, %v2545_v13 }
 0x691   :  { %v2552_v6 = vmax.f32 %v2551_v18, 0.0 }
 0x692   :  { %6126 = dma.done.wait [#allocation8 + $0x1], 1024 }
 0x693   :  { %6127 = vsyncadd [#allocation8 + $0x1], 4294966272  ;;  %5178 = vmatpush3.bf16.msra.mxu1 %v6300_v8  ;;  %v7429_v50 = vld [vmem:[#allocation27_spill] sm:$0xff]  ;;  %v7430_v7 = vld [vmem:[#allocation28_spill] sm:$0xff]  ;;  %s6146_s9 = smov 96   ;;  %vm2614_vm3 = vcmp.ge.s32.totalorder %v6882_v29, 64 }
 0x694   :  { %5179 = vmatprep.subr.bf16.mxu1 %v6143_v47  ;;  %v7431_v8 = vld [vmem:[#allocation29_spill] sm:$0xff]  ;;  %vm2615_vm4 = vcmp.lt.s32.totalorder %v6882_v29, 96  ;;  %s6147_s10 = smov 64  }
 0x695   :  { %vm2616_vm5 = vmand %vm2614_vm3, %vm2615_vm4 }
 0x696   :  { %v7099_v15 = vsel %vm2616_vm5, 1.0, %v6143_v47 }
 0x697   :  { %5180 = vmatpush3.bf16.msra.mxu1 %v6305_v9  ;;  %v2563_v9 = vpack.c.bf16 %v2552_v6, %v2552_v6  ;;  %v7102_v24 = vadd.f32 1.0, %v7099_v15 }
 0x698   :  { %5181 = vmatprep.subr.bf16.mxu1 %v6143_v47 }
 0x69b   :  { %5182 = vmatpush3.bf16.msra.mxu1 %v6310_v10  ;;  %v7432_v10 = vld [vmem:[#allocation30_spill] sm:$0xff] }
 0x69c   :  { %5183 = vmatprep.subr.bf16.mxu1 %v6143_v47 }
 0x69f   :  { %5184 = vmatpush3.bf16.msra.mxu1 %v6315_v11 }
 0x6a0   :  { %5185 = vmatprep.subr.bf16.mxu1 %v6143_v47 }
 0x6a3   :  { %5186 = vmatpush3.bf16.msra.mxu1 %v7429_v50 }
 0x6a4   :  { %5187 = vmatprep.subr.bf16.mxu1 %v6143_v47 }
 0x6a7   :  { %5188 = vmatpush3.bf16.msra.mxu1 %v7430_v7 }
 0x6a8   :  { %5189 = vmatprep.subr.bf16.mxu1 %v6143_v47 }
 0x6ab   :  { %5190 = vmatpush3.bf16.msra.mxu1 %v7431_v8 }
 0x6ac   :  { %5191 = vmatprep.subr.bf16.mxu1 %v6143_v47 }
 0x6af   :  { %5192 = vmatpush3.bf16.msra.mxu1 %v7432_v10 }
 0x6b2   :  { %5194 = vmatmul.mubr.bf16.vlgmr.msra.gmra.mrb[16].mxu1 %v2563_v9 }
 0x785   :  { %v2598_v19 = vpop.f32.mrb[16].mxu1 }
 0x786   :  { %2605 = vrot.lane.b32.xlu0 %v2598_v19, %s6146_s9  ;;  %v5195_v11 = vpop.f32.mrb[17].mxu1 }
 0x787   :  { %v2601_v14 = vpop.f32.mrb[18].mxu1 }
 0x788   :  { %v5196_v17 = vpop.f32.mrb[19].mxu1 }
 0x7f8   :  { %v2606_v25 = vpop.permute.xlu0 %2605 }
 0x7f9   :  { %v2608_v27 = vmax.f32 %v2598_v19, %v2606_v25 }
 0x7fb   :  { %2610 = vrot.lane.b32.xlu0 %v2608_v27, %s6147_s10 }
 0x86d   :  { %v2611_v40 = vpop.permute.xlu0 %2610 }
 0x86e   :  { %v2613_v26 = vmax.f32 %v2608_v27, %v2611_v40 }
 0x86f   :  { %6128 = dma.done.wait [#allocation8 + $0x2], 256 }
 0x870   :  { %6129 = vsyncadd [#allocation8 + $0x2], 4294967040  ;;  %5197 = vmatprep.subr.bf16.mxu0 %v6143_v47  ;;  %5565 = vmatprep.subr.bf16.mxu1 %v6145_v55  ;;  %v7433_v29 = vld [vmem:[#allocation33_spill] sm:$0xff]  ;;  %v7434_v45 = vld [vmem:[#allocation34_spill] sm:$0xff] }
 0x871   :  { %v7109_v46 = vpack.c.bf16 %v7434_v45, %v7433_v29 }
 0x872   :  { %6130 = dma.done.wait [#allocation8 + $0x3], 512 }
 0x873   :  { %6131 = vsyncadd [#allocation8 + $0x3], 4294966784  ;;  %v7435_v49 = vld [vmem:[#allocation31_spill] sm:$0xff]  ;;  %5201 = vmatprep.mubr.msk.bf16.mxu0 %vm6144_vm1, %v6143_v47  ;;  %5567 = vmatpush3.bf16.msra.mxu1 %v7109_v46  ;;  %v7437_v57 = vld [vmem:[#allocation36_spill] sm:$0xff]  ;;  %v2633_v61 = vpack.c.bf16 %v2613_v26, %v2613_v26  ;;  %vm2639_vm6 = vcmask 261120   ;;  %s6148_s24 = smov 32  }
 0x874   :  { %5198 = vmatpush3.bf16.msra.mxu0 %v7435_v49  ;;  %v7436_v52 = vld [vmem:[#allocation35_spill] sm:$0xff]  ;;  %5568 = vmatprep.subr.bf16.mxu1 %v6145_v55  ;;  %v7438_v28 = vld [vmem:[#allocation32_spill] sm:$0xff]  ;;  %v4769_v35 = vld [vmem:[%s7396_s11] ss:$0 sm:$0xff]  ;;  %vm3537_vm7 = vcmask 1040384   ;;  %vm3539_vm8 = vcmask 1041408  }
 0x875   :  { %5199 = vmatprep.subr.bf16.mxu0 %v6143_v47  ;;  %v7118_v58 = vpack.c.bf16 %v7437_v57, %v7436_v52  ;;  %5213 = vmatprep.mubr.msk.f32.mxu1 %vm6144_vm1, %v6143_v47  ;;  %vm3541_vm9 = vcmask 1042432   ;;  %vm3543_vm10 = vcmask 1043456   ;;  %vm3545_vm11 = vcmask 1044480  }
 0x876   :  { %vm3547_vm12 = vcmask 1045504   ;;  %vm3549_vm13 = vcmask 1046528  }
 0x877   :  { %5570 = vmatpush3.bf16.msra.mxu1 %v7118_v58 }
 0x878   :  { %5200 = vmatpush3.bf16.msra.mxu0 %v7438_v28  ;;  %5577 = vmatprep.subr.bf16.mxu1 %v6145_v55 }
 0x879   :  { %5571 = vmatprep.subr.bf16.mxu0 %v6145_v55 }
 0x87a   :  { %5214 = vmatmul.mubr.f32.vlgmr.msra.gmra.mrb[14].mxu1 %v6143_v47 }
 0x87b   :  { %5202 = vmatmul.mubr.msk.bf16.vlgmr.msra.gmra.mrb[20].mxu0 %vm2639_vm6, %v2633_v61  ;;  %5579 = vmatpush3.bf16.msra.mxu1 %v7109_v46 }
 0x87c   :  { %5573 = vmatpush3.bf16.msra.mxu0 %v7109_v46  ;;  %5224 = vmatprep.mubr.msk.f32.mxu0 %vm6144_vm1, %v6143_v47 }
 0x87d   :  { %5574 = vmatprep.subr.bf16.mxu0 %v6145_v55  ;;  %5235 = vmatprep.mubr.msk.f32.mxu1 %vm6144_vm1, %v6143_v47 }
 0x87e   :  { %5580 = vmatprep.subr.bf16.mxu1 %v6145_v55 }
 0x87f   :  { %5582 = vmatpush3.bf16.msra.mxu1 %v7118_v58 }
 0x880   :  { %5576 = vmatpush3.bf16.msra.mxu0 %v7118_v58  ;;  %5589 = vmatprep.subr.bf16.mxu1 %v6145_v55 }
 0x881   :  { %5583 = vmatprep.subr.bf16.mxu0 %v6145_v55 }
 0x94d   :  { %v2752_v39 = vpop.f32.mrb[14].mxu1 }
 0x94e   :  { %v2677_v36 = vpop.f32.mrb[20].mxu0  ;;  %v5215_v38 = vpop.f32.mrb[15].mxu1 }
 0x94f   :  { %v7144_v12 = vadd.f32 %v4769_v35, %v2677_v36  ;;  %v5203_v54 = vpop.f32.mrb[21].mxu0 }
 0x950   :  { %v2680_v43 = vpop.f32.mrb[22].mxu0 }
 0x951   :  { %v2756_v51 = vadd.f32 %v2752_v39, %v7144_v12  ;;  %v5204_v53 = vpop.f32.mrb[23].mxu0 }
 0x953   :  { %v4771_v56 = vmul.f32 -1.442695, %v2756_v51 }
 0x955   :  { %5982 = vpow2.f32 %v4771_v56 }
 0x95f   :  { %v5983_v62 = vpop.eup %5982 }
 0x960   :  { %v2760_v33 = vadd.f32 1.0, %v5983_v62 }
 0x962   :  { %5984 = vrcp.f32 %v2760_v33 }
 0x96c   :  { %v5985_v37 = vpop.eup %5984 }
 0x96d   :  { %v2763_v42 = vmul.f32 %v5985_v37, %v7102_v24 }
 0x96f   :  { %v2764_v20 = vsub.f32 %v2763_v42, %v7099_v15 }
 0x971   :  { %2767 = vrot.lane.b32.xlu0 %v2764_v20, %s6147_s10  ;;  %v2765_v60 = vmul.f32 0.0, %v2764_v20 }
 0x9e3   :  { %v2768_v0 = vpop.permute.xlu0 %2767 }
 0x9e4   :  { %v2770_v59 = vmul.f32 %v2768_v0, %v2764_v20 }
 0x9e6   :  { %2772 = vrot.lane.b32.xlu0 %v2770_v59, %s6148_s24 }
 0xa58   :  { %v2773_v31 = vpop.permute.xlu0 %2772 }
 0xa59   :  { %v2775_v1 = vadd.f32 %v2773_v31, %v2765_v60 }
 0xa5b   :  { %5986 = vtanh.f32 %v2775_v1  ;;  %v2870_v18 = vrot.slane %v2775_v1, 7 }
 0xa65   :  { %v5987_v44 = vpop.eup %5986 }
 0xa66   :  { %2778 = vrot.lane.b32.xlu1 %v5987_v44, %s6147_s10 }
 0xad8   :  { %v2779_v48 = vpop.permute.xlu1 %2778 }
 0xad9   :  { %v7152_v41 = vmul.f32 %v2779_v48, %v2764_v20 }
 0xadb   :  { %2783 = vrot.lane.b32.xlu1 %v7152_v41, %s6148_s24 }
 0xb4d   :  { %v2784_v2 = vpop.permute.xlu1 %2783 }
 0xb4e   :  { %5225 = vmatmul.mubr.msk.f32.vlgmr.msra.gmra.mrb[18].mxu0 %vm2639_vm6, %v2784_v2 }
 0xb4f   :  { %5585 = vmatpush3.bf16.msra.mxu0 %v7109_v46  ;;  %5246 = vmatprep.mubr.msk.f32.mxu0 %vm6144_vm1, %v6143_v47 }
 0xb50   :  { %5586 = vmatprep.subr.bf16.mxu0 %v6145_v55 }
 0xb53   :  { %5588 = vmatpush3.bf16.msra.mxu0 %v7118_v58 }
 0xb54   :  { %5595 = vmatprep.subr.bf16.mxu0 %v6145_v55 }
 0xc21   :  { %v2853_v63 = vpop.f32.mrb[18].mxu0 }
 0xc22   :  { %v2858_v30 = vrot.slane %v2853_v63, 7  ;;  %v5226_v3 = vpop.f32.mrb[19].mxu0 }
 0xc24   :  { %v2860_v34 = vadd.f32 %v2858_v30, %v7144_v12 }
 0xc26   :  { %v4773_v23 = vmul.f32 -1.442695, %v2860_v34 }
 0xc28   :  { %5988 = vpow2.f32 %v4773_v23 }
 0xc32   :  { %v5989_v4 = vpop.eup %5988 }
 0xc33   :  { %v2864_v32 = vadd.f32 1.0, %v5989_v4 }
 0xc35   :  { %5990 = vrcp.f32 %v2864_v32 }
 0xc3f   :  { %v5991_v22 = vpop.eup %5990 }
 0xc40   :  { %v2867_v16 = vmul.f32 %v5991_v22, %v7102_v24 }
 0xc42   :  { %v2868_v5 = vsub.f32 %v2867_v16, %v7099_v15 }
 0xc44   :  { %2874 = vrot.lane.b32.xlu0 %v2868_v5, %s6147_s10  ;;  %v2872_v6 = vmul.f32 %v2870_v18, %v2868_v5 }
 0xcb6   :  { %v2875_v21 = vpop.permute.xlu0 %2874 }
 0xcb7   :  { %v2877_v13 = vmul.f32 %v2875_v21, %v2868_v5 }
 0xcb9   :  { %2879 = vrot.lane.b32.xlu1 %v2877_v13, %s6148_s24 }
 0xd2b   :  { %v2880_v50 = vpop.permute.xlu1 %2879 }
 0xd2c   :  { %v2882_v7 = vadd.f32 %v2880_v50, %v2872_v6 }
 0xd2e   :  { %5992 = vtanh.f32 %v2882_v7  ;;  %v2978_v28 = vrot.slane %v2882_v7, 7 }
 0xd38   :  { %v5993_v8 = vpop.eup %5992 }
 0xd39   :  { %2885 = vrot.lane.b32.xlu0 %v5993_v8, %s6147_s10 }
 0xdab   :  { %v2886_v9 = vpop.permute.xlu0 %2885 }
 0xdac   :  { %v2888_v10 = vmul.f32 %v2886_v9, %v2868_v5 }
 0xdae   :  { %v2890_v19 = vrot.slane %v2888_v10, 1  ;;  %v3538_v51 = vsel %vm3537_vm7, %v7152_v41, %v2888_v10 }
 0xdb0   :  { %2891 = vrot.lane.b32.xlu1 %v2890_v19, %s6148_s24 }
 0xe22   :  { %v2892_v11 = vpop.permute.xlu1 %2891 }
 0xe23   :  { %5236 = vmatmul.mubr.msk.f32.vlgmr.msra.gmra.mrb[20].mxu1 %vm2639_vm6, %v2892_v11 }
 0xe24   :  { %5591 = vmatpush3.bf16.msra.mxu1 %v7109_v46  ;;  %5257 = vmatprep.mubr.msk.f32.mxu1 %vm6144_vm1, %v6143_v47 }
 0xe25   :  { %5592 = vmatprep.subr.bf16.mxu1 %v6145_v55 }
 0xe28   :  { %5594 = vmatpush3.bf16.msra.mxu1 %v7118_v58 }
 0xe29   :  { %5601 = vmatprep.subr.bf16.mxu1 %v6145_v55 }
 0xef6   :  { %v2961_v14 = vpop.f32.mrb[20].mxu1 }
 0xef7   :  { %v2966_v17 = vrot.slane %v2961_v14, 6  ;;  %v5237_v25 = vpop.f32.mrb[21].mxu1 }
 0xef9   :  { %v2968_v27 = vadd.f32 %v2966_v17, %v7144_v12 }
 0xefb   :  { %v4775_v40 = vmul.f32 -1.442695, %v2968_v27 }
 0xefd   :  { %5994 = vpow2.f32 %v4775_v40 }
 0xf07   :  { %v5995_v26 = vpop.eup %5994 }
 0xf08   :  { %v2972_v29 = vadd.f32 1.0, %v5995_v26 }
 0xf0a   :  { %5996 = vrcp.f32 %v2972_v29 }
 0xf14   :  { %v5997_v45 = vpop.eup %5996 }
 0xf15   :  { %v2975_v49 = vmul.f32 %v5997_v45, %v7102_v24 }
 0xf17   :  { %v2976_v52 = vsub.f32 %v2975_v49, %v7099_v15 }
 0xf19   :  { %2982 = vrot.lane.b32.xlu0 %v2976_v52, %s6147_s10  ;;  %v2980_v35 = vmul.f32 %v2978_v28, %v2976_v52 }
 0xf8b   :  { %v2983_v57 = vpop.permute.xlu0 %2982 }
 0xf8c   :  { %v2985_v61 = vmul.f32 %v2983_v57, %v2976_v52 }
 0xf8e   :  { %2987 = vrot.lane.b32.xlu1 %v2985_v61, %s6148_s24 }
0x1000   :  { %v2988_v36 = vpop.permute.xlu1 %2987 }
0x1001   :  { %v2990_v54 = vadd.f32 %v2988_v36, %v2980_v35 }
0x1003   :  { %5998 = vtanh.f32 %v2990_v54  ;;  %v3086_v2 = vrot.slane %v2990_v54, 7 }
0x100d   :  { %v5999_v39 = vpop.eup %5998 }
0x100e   :  { %2993 = vrot.lane.b32.xlu0 %v5999_v39, %s6147_s10 }
0x1080   :  { %v2994_v43 = vpop.permute.xlu0 %2993 }
0x1081   :  { %v2996_v38 = vmul.f32 %v2994_v43, %v2976_v52 }
0x1083   :  { %v2998_v53 = vrot.slane %v2996_v38, 2  ;;  %v3540_v56 = vsel %vm3539_vm8, %v3538_v51, %v2996_v38 }
0x1085   :  { %2999 = vrot.lane.b32.xlu1 %v2998_v53, %s6148_s24 }
0x10f7   :  { %v3000_v62 = vpop.permute.xlu1 %2999 }
0x10f8   :  { %5247 = vmatmul.mubr.msk.f32.vlgmr.msra.gmra.mrb[24].mxu0 %vm2639_vm6, %v3000_v62 }
0x10f9   :  { %5597 = vmatpush3.bf16.msra.mxu0 %v7109_v46  ;;  %5268 = vmatprep.mubr.msk.f32.mxu0 %vm6144_vm1, %v6143_v47 }
0x10fa   :  { %5598 = vmatprep.subr.bf16.mxu0 %v6145_v55 }
0x10fd   :  { %5600 = vmatpush3.bf16.msra.mxu0 %v7118_v58 }
0x10fe   :  { %5607 = vmatprep.subr.bf16.mxu0 %v6145_v55 }
0x11cb   :  { %v3069_v33 = vpop.f32.mrb[24].mxu0 }
0x11cc   :  { %v3074_v37 = vrot.slane %v3069_v33, 5  ;;  %v5248_v42 = vpop.f32.mrb[25].mxu0 }
0x11ce   :  { %v3076_v20 = vadd.f32 %v3074_v37, %v7144_v12 }
0x11d0   :  { %v4777_v0 = vmul.f32 -1.442695, %v3076_v20 }
0x11d2   :  { %6000 = vpow2.f32 %v4777_v0 }
0x11dc   :  { %v6001_v59 = vpop.eup %6000 }
0x11dd   :  { %v3080_v60 = vadd.f32 1.0, %v6001_v59 }
0x11df   :  { %6002 = vrcp.f32 %v3080_v60 }
0x11e9   :  { %v6003_v31 = vpop.eup %6002 }
0x11ea   :  { %v3083_v1 = vmul.f32 %v6003_v31, %v7102_v24 }
0x11ec   :  { %v3084_v44 = vsub.f32 %v3083_v1, %v7099_v15 }
0x11ee   :  { %3090 = vrot.lane.b32.xlu0 %v3084_v44, %s6147_s10  ;;  %v3088_v63 = vmul.f32 %v3086_v2, %v3084_v44 }
0x1260   :  { %v3091_v48 = vpop.permute.xlu0 %3090 }
0x1261   :  { %v3093_v41 = vmul.f32 %v3091_v48, %v3084_v44 }
0x1263   :  { %3095 = vrot.lane.b32.xlu1 %v3093_v41, %s6148_s24 }
0x12d5   :  { %v3096_v30 = vpop.permute.xlu1 %3095 }
0x12d6   :  { %v3098_v3 = vadd.f32 %v3096_v30, %v3088_v63 }
0x12d8   :  { %6004 = vtanh.f32 %v3098_v3  ;;  %v3194_v14 = vrot.slane %v3098_v3, 7 }
0x12e2   :  { %v6005_v34 = vpop.eup %6004 }
0x12e3   :  { %3101 = vrot.lane.b32.xlu0 %v6005_v34, %s6147_s10 }
0x1355   :  { %v3102_v23 = vpop.permute.xlu0 %3101 }
0x1356   :  { %v3104_v4 = vmul.f32 %v3102_v23, %v3084_v44 }
0x1358   :  { %v3106_v32 = vrot.slane %v3104_v4, 3  ;;  %v3542_v22 = vsel %vm3541_vm9, %v3540_v56, %v3104_v4 }
0x135a   :  { %3107 = vrot.lane.b32.xlu1 %v3106_v32, %s6148_s24 }
0x13cc   :  { %v3108_v16 = vpop.permute.xlu1 %3107 }
0x13cd   :  { %5258 = vmatmul.mubr.msk.f32.vlgmr.msra.gmra.mrb[22].mxu1 %vm2639_vm6, %v3108_v16 }
0x13ce   :  { %5603 = vmatpush3.bf16.msra.mxu1 %v7109_v46  ;;  %5279 = vmatprep.mubr.msk.f32.mxu1 %vm6144_vm1, %v6143_v47 }
0x13cf   :  { %5604 = vmatprep.subr.bf16.mxu1 %v6145_v55 }
0x13d2   :  { %5606 = vmatpush3.bf16.msra.mxu1 %v7118_v58 }
0x14a0   :  { %v3177_v5 = vpop.f32.mrb[22].mxu1 }
0x14a1   :  { %v3182_v21 = vrot.slane %v3177_v5, 4  ;;  %v5259_v13 = vpop.f32.mrb[23].mxu1 }
0x14a3   :  { %v3184_v18 = vadd.f32 %v3182_v21, %v7144_v12 }
0x14a5   :  { %v4779_v6 = vmul.f32 -1.442695, %v3184_v18 }
0x14a7   :  { %6006 = vpow2.f32 %v4779_v6 }
0x14b1   :  { %v6007_v50 = vpop.eup %6006 }
0x14b2   :  { %v3188_v7 = vadd.f32 1.0, %v6007_v50 }
0x14b4   :  { %6008 = vrcp.f32 %v3188_v7 }
0x14be   :  { %v6009_v8 = vpop.eup %6008 }
0x14bf   :  { %v3191_v9 = vmul.f32 %v6009_v8, %v7102_v24 }
0x14c1   :  { %v3192_v10 = vsub.f32 %v3191_v9, %v7099_v15 }
0x14c3   :  { %3198 = vrot.lane.b32.xlu0 %v3192_v10, %s6147_s10  ;;  %v3196_v17 = vmul.f32 %v3194_v14, %v3192_v10 }
0x1535   :  { %v3199_v19 = vpop.permute.xlu0 %3198 }
0x1536   :  { %v3201_v11 = vmul.f32 %v3199_v19, %v3192_v10 }
0x1538   :  { %3203 = vrot.lane.b32.xlu1 %v3201_v11, %s6148_s24 }
0x15aa   :  { %v3204_v25 = vpop.permute.xlu1 %3203 }
0x15ab   :  { %v3206_v27 = vadd.f32 %v3204_v25, %v3196_v17 }
0x15ad   :  { %6010 = vtanh.f32 %v3206_v27 }
0x15b7   :  { %v6011_v40 = vpop.eup %6010 }
0x15b8   :  { %3209 = vrot.lane.b32.xlu0 %v6011_v40, %s6147_s10 }
0x162a   :  { %v3210_v26 = vpop.permute.xlu0 %3209 }
0x162b   :  { %v3212_v29 = vmul.f32 %v3210_v26, %v3192_v10 }
0x162d   :  { %v3214_v45 = vrot.slane %v3212_v29, 4  ;;  %v3544_v49 = vsel %vm3543_vm10, %v3542_v22, %v3212_v29 }
0x162f   :  { %3215 = vrot.lane.b32.xlu1 %v3214_v45, %s6148_s24 }
0x16a1   :  { %v3216_v52 = vpop.permute.xlu1 %3215 }
0x16a2   :  { %5269 = vmatmul.mubr.msk.f32.vlgmr.msra.gmra.mrb[26].mxu0 %vm2639_vm6, %v3216_v52 }
0x16a3   :  { %5609 = vmatpush3.bf16.msra.mxu0 %v7109_v46  ;;  %5290 = vmatprep.mubr.msk.f32.mxu0 %vm6144_vm1, %v6143_v47 }
0x16a4   :  { %5610 = vmatprep.subr.bf16.mxu0 %v6145_v55 }
0x16a7   :  { %5612 = vmatpush3.bf16.msra.mxu0 %v7118_v58  ;;  %v3302_v58 = vrot.slane %v3206_v27, 7 }
0x1775   :  { %v3285_v57 = vpop.f32.mrb[26].mxu0 }
0x1776   :  { %v3290_v61 = vrot.slane %v3285_v57, 3  ;;  %v5270_v28 = vpop.f32.mrb[27].mxu0 }
0x1778   :  { %v3292_v35 = vadd.f32 %v3290_v61, %v7144_v12 }
0x177a   :  { %v4781_v36 = vmul.f32 -1.442695, %v3292_v35 }
0x177c   :  { %6012 = vpow2.f32 %v4781_v36 }
0x1786   :  { %v6013_v54 = vpop.eup %6012 }
0x1787   :  { %v3296_v39 = vadd.f32 1.0, %v6013_v54 }
0x1789   :  { %6014 = vrcp.f32 %v3296_v39 }
0x1793   :  { %v6015_v43 = vpop.eup %6014 }
0x1794   :  { %v3299_v46 = vmul.f32 %v6015_v43, %v7102_v24 }
0x1796   :  { %v3300_v38 = vsub.f32 %v3299_v46, %v7099_v15 }
0x1798   :  { %3306 = vrot.lane.b32.xlu0 %v3300_v38, %s6147_s10  ;;  %v3304_v56 = vmul.f32 %v3302_v58, %v3300_v38 }
0x180a   :  { %v3307_v51 = vpop.permute.xlu0 %3306 }
0x180b   :  { %v3309_v53 = vmul.f32 %v3307_v51, %v3300_v38 }
0x180d   :  { %3311 = vrot.lane.b32.xlu1 %v3309_v53, %s6148_s24 }
0x187f   :  { %v3312_v62 = vpop.permute.xlu1 %3311 }
0x1880   :  { %v3314_v33 = vadd.f32 %v3312_v62, %v3304_v56 }
0x1882   :  { %6016 = vtanh.f32 %v3314_v33  ;;  %v3410_v32 = vrot.slane %v3314_v33, 7 }
0x188c   :  { %v6017_v37 = vpop.eup %6016 }
0x188d   :  { %3317 = vrot.lane.b32.xlu0 %v6017_v37, %s6147_s10 }
0x18ff   :  { %v3318_v42 = vpop.permute.xlu0 %3317 }
0x1900   :  { %v3320_v20 = vmul.f32 %v3318_v42, %v3300_v38 }
0x1902   :  { %v3322_v0 = vrot.slane %v3320_v20, 5  ;;  %v3546_v59 = vsel %vm3545_vm11, %v3544_v49, %v3320_v20 }
0x1904   :  { %3323 = vrot.lane.b32.xlu1 %v3322_v0, %s6148_s24 }
0x1976   :  { %v3324_v60 = vpop.permute.xlu1 %3323 }
0x1977   :  { %5280 = vmatmul.mubr.msk.f32.vlgmr.msra.gmra.mrb[24].mxu1 %vm2639_vm6, %v3324_v60 }
0x1a4a   :  { %v3393_v31 = vpop.f32.mrb[24].mxu1 }
0x1a4b   :  { %v3398_v1 = vrot.slane %v3393_v31, 2  ;;  %v5281_v44 = vpop.f32.mrb[25].mxu1 }
0x1a4d   :  { %v3400_v48 = vadd.f32 %v3398_v1, %v7144_v12 }
0x1a4f   :  { %v4783_v41 = vmul.f32 -1.442695, %v3400_v48 }
0x1a51   :  { %6018 = vpow2.f32 %v4783_v41 }
0x1a5b   :  { %v6019_v2 = vpop.eup %6018 }
0x1a5c   :  { %v3404_v63 = vadd.f32 1.0, %v6019_v2 }
0x1a5e   :  { %6020 = vrcp.f32 %v3404_v63 }
0x1a68   :  { %v6021_v30 = vpop.eup %6020 }
0x1a69   :  { %v3407_v3 = vmul.f32 %v6021_v30, %v7102_v24 }
0x1a6b   :  { %v3408_v34 = vsub.f32 %v3407_v3, %v7099_v15 }
0x1a6d   :  { %3414 = vrot.lane.b32.xlu0 %v3408_v34, %s6147_s10  ;;  %v3412_v22 = vmul.f32 %v3410_v32, %v3408_v34 }
0x1adf   :  { %v3415_v23 = vpop.permute.xlu0 %3414 }
0x1ae0   :  { %v3417_v4 = vmul.f32 %v3415_v23, %v3408_v34 }
0x1ae2   :  { %3419 = vrot.lane.b32.xlu1 %v3417_v4, %s6148_s24 }
0x1b54   :  { %v3420_v16 = vpop.permute.xlu1 %3419 }
0x1b55   :  { %v3422_v5 = vadd.f32 %v3420_v16, %v3412_v22 }
0x1b57   :  { %6022 = vtanh.f32 %v3422_v5  ;;  %v3518_v45 = vrot.slane %v3422_v5, 7 }
0x1b61   :  { %v6023_v21 = vpop.eup %6022 }
0x1b62   :  { %3425 = vrot.lane.b32.xlu0 %v6023_v21, %s6147_s10 }
0x1bd4   :  { %v3426_v13 = vpop.permute.xlu0 %3425 }
0x1bd5   :  { %v3428_v18 = vmul.f32 %v3426_v13, %v3408_v34 }
0x1bd7   :  { %v3430_v6 = vrot.slane %v3428_v18, 6  ;;  %v3548_v50 = vsel %vm3547_vm12, %v3546_v59, %v3428_v18 }
0x1bd9   :  { %3431 = vrot.lane.b32.xlu1 %v3430_v6, %s6148_s24 }
0x1c4b   :  { %v3432_v7 = vpop.permute.xlu1 %3431 }
0x1c4c   :  { %5291 = vmatmul.mubr.msk.f32.vlgmr.msra.gmra.mrb[28].mxu0 %vm2639_vm6, %v3432_v7 }
0x1d1f   :  { %v3501_v8 = vpop.f32.mrb[28].mxu0 }
0x1d20   :  { %v3506_v9 = vrot.slane %v3501_v8, 1  ;;  %v5292_v10 = vpop.f32.mrb[29].mxu0 }
0x1d22   :  { %v3508_v19 = vadd.f32 %v3506_v9, %v7144_v12 }
0x1d24   :  { %v4785_v11 = vmul.f32 -1.442695, %v3508_v19 }
0x1d26   :  { %6024 = vpow2.f32 %v4785_v11 }
0x1d30   :  { %v6025_v14 = vpop.eup %6024 }
0x1d31   :  { %v3512_v17 = vadd.f32 1.0, %v6025_v14 }
0x1d33   :  { %6026 = vrcp.f32 %v3512_v17 }
0x1d3d   :  { %v6027_v25 = vpop.eup %6026 }
0x1d3e   :  { %v3515_v27 = vmul.f32 %v6027_v25, %v7102_v24 }
0x1d40   :  { %v3516_v40 = vsub.f32 %v3515_v27, %v7099_v15 }
0x1d42   :  { %3522 = vrot.lane.b32.xlu0 %v3516_v40, %s6147_s10  ;;  %v3520_v49 = vmul.f32 %v3518_v45, %v3516_v40 }
0x1db4   :  { %v3523_v26 = vpop.permute.xlu0 %3522 }
0x1db5   :  { %v3525_v29 = vmul.f32 %v3523_v26, %v3516_v40 }
0x1db7   :  { %3527 = vrot.lane.b32.xlu1 %v3525_v29, %s6148_s24 }
0x1e29   :  { %v3528_v52 = vpop.permute.xlu1 %3527 }
0x1e2a   :  { %v3530_v12 = vadd.f32 %v3528_v52, %v3520_v49 }
0x1e2c   :  { %6028 = vtanh.f32 %v3530_v12 }
0x1e36   :  { %v6029_v57 = vpop.eup %6028 }
0x1e37   :  { %3533 = vrot.lane.b32.xlu0 %v6029_v57, %s6147_s10 }
0x1ea9   :  { %v3534_v61 = vpop.permute.xlu0 %3533 }
0x1eaa   :  { %v3536_v28 = vmul.f32 %v3534_v61, %v3516_v40 }
0x1eac   :  { %v3550_v35 = vsel %vm3549_vm13, %v3548_v50, %v3536_v28 }
0x1ead   :  { %6132 = dma.done.wait [#allocation8 + $0x4], 256 }
0x1eae   :  { %6133 = vsyncadd [#allocation8 + $0x4], 4294967040  ;;  %v3561_v36 = vpack.c.bf16 %v3550_v35, %v3550_v35  ;;  %5293 = vmatprep.subr.bf16.mxu1 %v6143_v47  ;;  %5613 = vmatprep.subr.bf16.mxu0 %v6145_v55  ;;  %v7439_v54 = vld [vmem:[#allocation39_spill] sm:$0xff]  ;;  %v7440_v39 = vld [vmem:[#allocation40_spill] sm:$0xff] }
0x1eaf   :  { %v7244_v43 = vpack.c.bf16 %v7440_v39, %v7439_v54 }
0x1eb0   :  { %6134 = dma.done.wait [#allocation8 + $0x5], 512 }
0x1eb1   :  { %6135 = vsyncadd [#allocation8 + $0x5], 4294966784  ;;  %v7441_v46 = vld [vmem:[#allocation37_spill] sm:$0xff]  ;;  %5297 = vmatprep.mubr.msk.bf16.mxu1 %vm6144_vm1, %v6143_v47  ;;  %3568 = vrot.lane.b32.xlu0 %v3561_v36, %s6148_s24  ;;  %v7443_v51 = vld [vmem:[#allocation42_spill] sm:$0xff]  ;;  %vm4468_vm14 = vcmask 261127  }
0x1eb2   :  { %5294 = vmatpush3.bf16.msra.mxu1 %v7441_v46  ;;  %5615 = vmatpush3.bf16.msra.mxu0 %v7244_v43  ;;  %v7442_v38 = vld [vmem:[#allocation41_spill] sm:$0xff]  ;;  %v7444_v58 = vld [vmem:[#allocation38_spill] sm:$0xff] }
0x1eb3   :  { %v7253_v53 = vpack.c.bf16 %v7443_v51, %v7442_v38  ;;  %5295 = vmatprep.subr.bf16.mxu1 %v6143_v47  ;;  %5616 = vmatprep.subr.bf16.mxu0 %v6145_v55  ;;  %v4786_v37 = vld [vmem:[%s7396_s11 + $0x1] ss:$0 sm:$0xff]  ;;  %s6149_s11 = smov [#allocation12]  }
0x1eb4   :  { %5309 = vmatprep.mubr.msk.f32.mxu0 %vm6144_vm1, %v6143_v47  ;;  %s4476_s27 = sshll.u32 %s6149_s11, 4  ;;  %s4477_s27 = int_to_ptr.vmem [resolvable:$true] %s4476_s27 }
0x1eb5   :  { %s6100_s15 = scalar_lea.vmem %s4477_s27, 16  ;;  %s6104_s30 = scalar_lea.vmem %s4477_s27, 32 }
0x1eb6   :  { %5296 = vmatpush3.bf16.msra.mxu1 %v7444_v58  ;;  %5618 = vmatpush3.bf16.msra.mxu0 %v7253_v53  ;;  %p6101_p8 = scmp.ne.s32.totalorder %s4477_s27, %s6100_s15  ;;  %p6105_p9 = scmp.lt.s32.totalorder %s4477_s27, %s4477_s27 }
0x1eb7   :  { %5619 = vmatprep.subr.bf16.mxu1 %v6145_v55  ;;  %5625 = vmatprep.subr.bf16.mxu0 %v6145_v55  ;;  %p6106_p10 = scmp.lt.s32.totalorder %s6104_s30, %s6100_s15 }
0x1eb9   :  { %5310 = vmatmul.mubr.f32.vlgmr.msra.gmra.mrb[30].mxu0 %v6143_v47  ;;  %p6107_p11 = por %p6106_p10, %p6105_p9 }
0x1eba   :  { %5627 = vmatpush3.bf16.msra.mxu0 %v7244_v43  ;;  %5331 = vmatprep.mubr.msk.f32.mxu0 %vm6144_vm1, %v6143_v47 }
0x1ebb   :  { %5628 = vmatprep.subr.bf16.mxu0 %v6145_v55  ;;  %p6108_p12 = pnand %p6107_p11, %p6101_p8 }
0x1ebe   :  { %5630 = vmatpush3.bf16.msra.mxu0 %v7253_v53 }
0x1ebf   :  { %5637 = vmatprep.subr.bf16.mxu0 %v6145_v55 }
0x1f23   :  { %v3569_v56 = vpop.permute.xlu0 %3568 }
0x1f24   :  { %5298 = vmatmul.mubr.msk.bf16.vlgmr.msra.gmra.mrb[28].mxu1 %vm2639_vm6, %v3569_v56 }
0x1f25   :  { %5621 = vmatpush3.bf16.msra.mxu1 %v7244_v43  ;;  %5320 = vmatprep.mubr.msk.f32.mxu1 %vm6144_vm1, %v6143_v47 }
0x1f26   :  { %5622 = vmatprep.subr.bf16.mxu1 %v6145_v55 }
0x1f29   :  { %5624 = vmatpush3.bf16.msra.mxu1 %v7253_v53 }
0x1f2a   :  { %5631 = vmatprep.subr.bf16.mxu1 %v6145_v55 }
0x1f8c   :  { %v3679_v62 = vpop.f32.mrb[30].mxu0 }
0x1f8d   :  { %v5311_v33 = vpop.f32.mrb[31].mxu0 }
0x1ff7   :  { %v3607_v42 = vpop.f32.mrb[28].mxu1 }
0x1ff8   :  { %v7280_v20 = vadd.f32 %v4786_v37, %v3607_v42  ;;  %v5299_v0 = vpop.f32.mrb[29].mxu1 }
0x1ff9   :  { %v3610_v59 = vpop.f32.mrb[30].mxu1 }
0x1ffa   :  { %v3683_v60 = vadd.f32 %v3679_v62, %v7280_v20  ;;  %v5300_v31 = vpop.f32.mrb[31].mxu1 }
0x1ffc   :  { %v4788_v1 = vmul.f32 -1.442695, %v3683_v60 }
0x1ffe   :  { %6030 = vpow2.f32 %v4788_v1 }
0x2008   :  { %v6031_v44 = vpop.eup %6030 }
0x2009   :  { %v3687_v48 = vadd.f32 1.0, %v6031_v44 }
0x200b   :  { %6032 = vrcp.f32 %v3687_v48 }
0x2015   :  { %v6033_v41 = vpop.eup %6032 }
0x2016   :  { %v3690_v2 = vmul.f32 %v6033_v41, %v7102_v24 }
0x2018   :  { %v3691_v63 = vsub.f32 %v3690_v2, %v7099_v15 }
0x201a   :  { %3694 = vrot.lane.b32.xlu0 %v3691_v63, %s6147_s10  ;;  %v3692_v34 = vmul.f32 0.0, %v3691_v63 }
0x208c   :  { %v3695_v30 = vpop.permute.xlu0 %3694 }
0x208d   :  { %v3697_v3 = vmul.f32 %v3695_v30, %v3691_v63 }
0x208f   :  { %3699 = vrot.lane.b32.xlu1 %v3697_v3, %s6148_s24 }
0x2101   :  { %v3700_v23 = vpop.permute.xlu1 %3699 }
0x2102   :  { %v3702_v4 = vadd.f32 %v3700_v23, %v3692_v34 }
0x2104   :  { %6034 = vtanh.f32 %v3702_v4  ;;  %v3797_v17 = vrot.slane %v3702_v4, 7 }
0x210e   :  { %v6035_v32 = vpop.eup %6034 }
0x210f   :  { %3705 = vrot.lane.b32.xlu1 %v6035_v32, %s6147_s10 }
0x2181   :  { %v3706_v22 = vpop.permute.xlu1 %3705 }
0x2182   :  { %v3708_v16 = vmul.f32 %v3706_v22, %v3691_v63 }
0x2184   :  { %3710 = vrot.lane.b32.xlu0 %v3708_v16, %s6148_s24 }
0x21f6   :  { %v3711_v5 = vpop.permute.xlu0 %3710 }
0x21f7   :  { %5321 = vmatmul.mubr.msk.f32.vlgmr.msra.gmra.mrb[26].mxu1 %vm2639_vm6, %v3711_v5 }
0x21f8   :  { %5633 = vmatpush3.bf16.msra.mxu1 %v7244_v43  ;;  %5342 = vmatprep.mubr.msk.f32.mxu1 %vm6144_vm1, %v6143_v47 }
0x21f9   :  { %5634 = vmatprep.subr.bf16.mxu1 %v6145_v55 }
0x21fc   :  { %5636 = vmatpush3.bf16.msra.mxu1 %v7253_v53 }
0x21fd   :  { %5643 = vmatprep.subr.bf16.mxu1 %v6145_v55 }
0x22ca   :  { %v3780_v21 = vpop.f32.mrb[26].mxu1 }
0x22cb   :  { %v3785_v13 = vrot.slane %v3780_v21, 7  ;;  %v5322_v18 = vpop.f32.mrb[27].mxu1 }
0x22cd   :  { %v3787_v6 = vadd.f32 %v3785_v13, %v7280_v20 }
0x22cf   :  { %v4790_v50 = vmul.f32 -1.442695, %v3787_v6 }
0x22d1   :  { %6036 = vpow2.f32 %v4790_v50 }
0x22db   :  { %v6037_v7 = vpop.eup %6036 }
0x22dc   :  { %v3791_v8 = vadd.f32 1.0, %v6037_v7 }
0x22de   :  { %6038 = vrcp.f32 %v3791_v8 }
0x22e8   :  { %v6039_v9 = vpop.eup %6038 }
0x22e9   :  { %v3794_v10 = vmul.f32 %v6039_v9, %v7102_v24 }
0x22eb   :  { %v3795_v19 = vsub.f32 %v3794_v10, %v7099_v15 }
0x22ed   :  { %3801 = vrot.lane.b32.xlu1 %v3795_v19, %s6147_s10  ;;  %v3799_v25 = vmul.f32 %v3797_v17, %v3795_v19 }
0x235f   :  { %v3802_v11 = vpop.permute.xlu1 %3801 }
0x2360   :  { %v3804_v14 = vmul.f32 %v3802_v11, %v3795_v19 }
0x2362   :  { %3806 = vrot.lane.b32.xlu0 %v3804_v14, %s6148_s24 }
0x23d4   :  { %v3807_v27 = vpop.permute.xlu0 %3806 }
0x23d5   :  { %v3809_v40 = vadd.f32 %v3807_v27, %v3799_v25 }
0x23d7   :  { %6040 = vtanh.f32 %v3809_v40  ;;  %v3905_v56 = vrot.slane %v3809_v40, 7 }
0x23e1   :  { %v6041_v26 = vpop.eup %6040 }
0x23e2   :  { %3812 = vrot.lane.b32.xlu1 %v6041_v26, %s6147_s10 }
0x2454   :  { %v3813_v29 = vpop.permute.xlu1 %3812 }
0x2455   :  { %v3815_v45 = vmul.f32 %v3813_v29, %v3795_v19 }
0x2457   :  { %v3817_v49 = vrot.slane %v3815_v45, 1 }
0x2459   :  { %3818 = vrot.lane.b32.xlu0 %v3817_v49, %s6148_s24 }
0x24cb   :  { %v3819_v52 = vpop.permute.xlu0 %3818 }
0x24cc   :  { %5332 = vmatmul.mubr.msk.f32.vlgmr.msra.gmra.mrb[32].mxu0 %vm2639_vm6, %v3819_v52 }
0x24cd   :  { %5639 = vmatpush3.bf16.msra.mxu0 %v7244_v43  ;;  %5353 = vmatprep.mubr.msk.f32.mxu0 %vm6144_vm1, %v6143_v47 }
0x24ce   :  { %5640 = vmatprep.subr.bf16.mxu0 %v6145_v55 }
0x24d1   :  { %5642 = vmatpush3.bf16.msra.mxu0 %v7253_v53 }
0x24d2   :  { %5649 = vmatprep.subr.bf16.mxu0 %v6145_v55 }
0x259f   :  { %v3888_v12 = vpop.f32.mrb[32].mxu0 }
0x25a0   :  { %v3893_v57 = vrot.slane %v3888_v12, 6  ;;  %v5333_v61 = vpop.f32.mrb[33].mxu0 }
0x25a2   :  { %v3895_v28 = vadd.f32 %v3893_v57, %v7280_v20 }
0x25a4   :  { %v4792_v35 = vmul.f32 -1.442695, %v3895_v28 }
0x25a6   :  { %6042 = vpow2.f32 %v4792_v35 }
0x25b0   :  { %v6043_v36 = vpop.eup %6042 }
0x25b1   :  { %v3899_v54 = vadd.f32 1.0, %v6043_v36 }
0x25b3   :  { %6044 = vrcp.f32 %v3899_v54 }
0x25bd   :  { %v6045_v39 = vpop.eup %6044 }
0x25be   :  { %v3902_v46 = vmul.f32 %v6045_v39, %v7102_v24 }
0x25c0   :  { %v3903_v38 = vsub.f32 %v3902_v46, %v7099_v15 }
0x25c2   :  { %3909 = vrot.lane.b32.xlu1 %v3903_v38, %s6147_s10  ;;  %v3907_v62 = vmul.f32 %v3905_v56, %v3903_v38 }
0x2634   :  { %v3910_v51 = vpop.permute.xlu1 %3909 }
0x2635   :  { %v3912_v58 = vmul.f32 %v3910_v51, %v3903_v38 }
0x2637   :  { %3914 = vrot.lane.b32.xlu0 %v3912_v58, %s6148_s24 }
0x26a9   :  { %v3915_v33 = vpop.permute.xlu0 %3914 }
0x26aa   :  { %v3917_v37 = vadd.f32 %v3915_v33, %v3907_v62 }
0x26ac   :  { %6046 = vtanh.f32 %v3917_v37  ;;  %v4013_v22 = vrot.slane %v3917_v37, 7 }
0x26b6   :  { %v6047_v42 = vpop.eup %6046 }
0x26b7   :  { %3920 = vrot.lane.b32.xlu1 %v6047_v42, %s6147_s10 }
0x2729   :  { %v3921_v0 = vpop.permute.xlu1 %3920 }
0x272a   :  { %v3923_v59 = vmul.f32 %v3921_v0, %v3903_v38 }
0x272c   :  { %v3925_v60 = vrot.slane %v3923_v59, 2 }
0x272e   :  { %3926 = vrot.lane.b32.xlu0 %v3925_v60, %s6148_s24 }
0x27a0   :  { %v3927_v31 = vpop.permute.xlu0 %3926 }
0x27a1   :  { %5343 = vmatmul.mubr.msk.f32.vlgmr.msra.gmra.mrb[32].mxu1 %vm2639_vm6, %v3927_v31 }
0x27a2   :  { %5645 = vmatpush3.bf16.msra.mxu1 %v7244_v43  ;;  %5364 = vmatprep.mubr.msk.f32.mxu1 %vm6144_vm1, %v6143_v47 }
0x27a3   :  { %5646 = vmatprep.subr.bf16.mxu1 %v6145_v55 }
0x27a6   :  { %5648 = vmatpush3.bf16.msra.mxu1 %v7253_v53 }
0x27a7   :  { %5655 = vmatprep.subr.bf16.mxu1 %v6145_v55 }
0x2874   :  { %v3996_v1 = vpop.f32.mrb[32].mxu1 }
0x2875   :  { %v4001_v44 = vrot.slane %v3996_v1, 5  ;;  %v5344_v48 = vpop.f32.mrb[33].mxu1 }
0x2877   :  { %v4003_v41 = vadd.f32 %v4001_v44, %v7280_v20 }
0x2879   :  { %v4794_v2 = vmul.f32 -1.442695, %v4003_v41 }
0x287b   :  { %6048 = vpow2.f32 %v4794_v2 }
0x2885   :  { %v6049_v63 = vpop.eup %6048 }
0x2886   :  { %v4007_v30 = vadd.f32 1.0, %v6049_v63 }
0x2888   :  { %6050 = vrcp.f32 %v4007_v30 }
0x2892   :  { %v6051_v3 = vpop.eup %6050 }
0x2893   :  { %v4010_v34 = vmul.f32 %v6051_v3, %v7102_v24 }
0x2895   :  { %v4011_v23 = vsub.f32 %v4010_v34, %v7099_v15 }
0x2897   :  { %4017 = vrot.lane.b32.xlu1 %v4011_v23, %s6147_s10  ;;  %v4015_v16 = vmul.f32 %v4013_v22, %v4011_v23 }
0x2909   :  { %v4018_v4 = vpop.permute.xlu1 %4017 }
0x290a   :  { %v4020_v32 = vmul.f32 %v4018_v4, %v4011_v23 }
0x290c   :  { %4022 = vrot.lane.b32.xlu0 %v4020_v32, %s6148_s24 }
0x297e   :  { %v4023_v5 = vpop.permute.xlu0 %4022 }
0x297f   :  { %v4025_v21 = vadd.f32 %v4023_v5, %v4015_v16 }
0x2981   :  { %6052 = vtanh.f32 %v4025_v21  ;;  %v4121_v45 = vrot.slane %v4025_v21, 7 }
0x298b   :  { %v6053_v13 = vpop.eup %6052 }
0x298c   :  { %4028 = vrot.lane.b32.xlu1 %v6053_v13, %s6147_s10 }
0x29fe   :  { %v4029_v18 = vpop.permute.xlu1 %4028 }
0x29ff   :  { %v4031_v6 = vmul.f32 %v4029_v18, %v4011_v23 }
0x2a01   :  { %v4033_v50 = vrot.slane %v4031_v6, 3 }
0x2a03   :  { %4034 = vrot.lane.b32.xlu0 %v4033_v50, %s6148_s24 }
0x2a75   :  { %v4035_v7 = vpop.permute.xlu0 %4034 }
0x2a76   :  { %5354 = vmatmul.mubr.msk.f32.vlgmr.msra.gmra.mrb[34].mxu0 %vm2639_vm6, %v4035_v7 }
0x2a77   :  { %5651 = vmatpush3.bf16.msra.mxu0 %v7244_v43  ;;  %5375 = vmatprep.mubr.msk.f32.mxu0 %vm6144_vm1, %v6143_v47 }
0x2a78   :  { %5652 = vmatprep.subr.bf16.mxu0 %v6145_v55 }
0x2a7b   :  { %5654 = vmatpush3.bf16.msra.mxu0 %v7253_v53 }
0x2b49   :  { %v4104_v8 = vpop.f32.mrb[34].mxu0 }
0x2b4a   :  { %v4109_v9 = vrot.slane %v4104_v8, 4  ;;  %v5355_v10 = vpop.f32.mrb[35].mxu0 }
0x2b4c   :  { %v4111_v19 = vadd.f32 %v4109_v9, %v7280_v20 }
0x2b4e   :  { %v4796_v11 = vmul.f32 -1.442695, %v4111_v19 }
0x2b50   :  { %6054 = vpow2.f32 %v4796_v11 }
0x2b5a   :  { %v6055_v14 = vpop.eup %6054 }
0x2b5b   :  { %v4115_v17 = vadd.f32 1.0, %v6055_v14 }
0x2b5d   :  { %6056 = vrcp.f32 %v4115_v17 }
0x2b67   :  { %v6057_v25 = vpop.eup %6056 }
0x2b68   :  { %v4118_v27 = vmul.f32 %v6057_v25, %v7102_v24 }
0x2b6a   :  { %v4119_v40 = vsub.f32 %v4118_v27, %v7099_v15 }
0x2b6c   :  { %4125 = vrot.lane.b32.xlu1 %v4119_v40, %s6147_s10  ;;  %v4123_v49 = vmul.f32 %v4121_v45, %v4119_v40 }
0x2bde   :  { %v4126_v26 = vpop.permute.xlu1 %4125 }
0x2bdf   :  { %v4128_v29 = vmul.f32 %v4126_v26, %v4119_v40 }
0x2be1   :  { %4130 = vrot.lane.b32.xlu0 %v4128_v29, %s6148_s24 }
0x2c53   :  { %v4131_v52 = vpop.permute.xlu0 %4130 }
0x2c54   :  { %v4133_v12 = vadd.f32 %v4131_v52, %v4123_v49 }
0x2c56   :  { %6058 = vtanh.f32 %v4133_v12 }
0x2c60   :  { %v6059_v57 = vpop.eup %6058 }
0x2c61   :  { %4136 = vrot.lane.b32.xlu1 %v6059_v57, %s6147_s10 }
0x2cd3   :  { %v4137_v61 = vpop.permute.xlu1 %4136 }
0x2cd4   :  { %v4139_v28 = vmul.f32 %v4137_v61, %v4119_v40 }
0x2cd6   :  { %v4141_v35 = vrot.slane %v4139_v28, 4 }
0x2cd8   :  { %4142 = vrot.lane.b32.xlu0 %v4141_v35, %s6148_s24 }
0x2d4a   :  { %v4143_v36 = vpop.permute.xlu0 %4142 }
0x2d4b   :  { %5365 = vmatmul.mubr.msk.f32.vlgmr.msra.gmra.mrb[34].mxu1 %vm2639_vm6, %v4143_v36 }
0x2d4c   :  { %5657 = vmatpush3.bf16.msra.mxu1 %v7244_v43  ;;  %5386 = vmatprep.mubr.msk.f32.mxu1 %vm6144_vm1, %v6143_v47 }
0x2d4d   :  { %5658 = vmatprep.subr.bf16.mxu1 %v6145_v55 }
0x2d50   :  { %5660 = vmatpush3.bf16.msra.mxu1 %v7253_v53  ;;  %v4229_v53 = vrot.slane %v4133_v12, 7 }
0x2e1e   :  { %v4212_v54 = vpop.f32.mrb[34].mxu1 }
0x2e1f   :  { %v4217_v39 = vrot.slane %v4212_v54, 3  ;;  %v5366_v46 = vpop.f32.mrb[35].mxu1 }
0x2e21   :  { %v4219_v38 = vadd.f32 %v4217_v39, %v7280_v20 }
0x2e23   :  { %v4798_v51 = vmul.f32 -1.442695, %v4219_v38 }
0x2e25   :  { %6060 = vpow2.f32 %v4798_v51 }
0x2e2f   :  { %v6061_v58 = vpop.eup %6060 }
0x2e30   :  { %v4223_v56 = vadd.f32 1.0, %v6061_v58 }
0x2e32   :  { %6062 = vrcp.f32 %v4223_v56 }
0x2e3c   :  { %v6063_v62 = vpop.eup %6062 }
0x2e3d   :  { %v4226_v43 = vmul.f32 %v6063_v62, %v7102_v24 }
0x2e3f   :  { %v4227_v33 = vsub.f32 %v4226_v43, %v7099_v15 }
0x2e41   :  { %4233 = vrot.lane.b32.xlu1 %v4227_v33, %s6147_s10  ;;  %v4231_v37 = vmul.f32 %v4229_v53, %v4227_v33 }
0x2eb3   :  { %v4234_v47 = vpop.permute.xlu1 %4233 }
0x2eb4   :  { %v4236_v55 = vmul.f32 %v4234_v47, %v4227_v33 }
0x2eb6   :  { %4238 = vrot.lane.b32.xlu0 %v4236_v55, %s6148_s24 }
0x2f28   :  { %v4239_v42 = vpop.permute.xlu0 %4238 }
0x2f29   :  { %v4241_v0 = vadd.f32 %v4239_v42, %v4231_v37 }
0x2f2b   :  { %6064 = vtanh.f32 %v4241_v0  ;;  %v4337_v5 = vrot.slane %v4241_v0, 7 }
0x2f35   :  { %v6065_v59 = vpop.eup %6064 }
0x2f36   :  { %4244 = vrot.lane.b32.xlu1 %v6065_v59, %s6147_s10 }
0x2fa8   :  { %v4245_v60 = vpop.permute.xlu1 %4244 }
0x2fa9   :  { %v4247_v31 = vmul.f32 %v4245_v60, %v4227_v33 }
0x2fab   :  { %v4249_v1 = vrot.slane %v4247_v31, 5 }
0x2fad   :  { %4250 = vrot.lane.b32.xlu0 %v4249_v1, %s6148_s24 }
0x301f   :  { %v4251_v44 = vpop.permute.xlu0 %4250 }
0x3020   :  { %5376 = vmatmul.mubr.msk.f32.vlgmr.msra.gmra.mrb[36].mxu0 %vm2639_vm6, %v4251_v44 }
0x30f3   :  { %v4320_v48 = vpop.f32.mrb[36].mxu0 }
0x30f4   :  { %v4325_v41 = vrot.slane %v4320_v48, 2  ;;  %v5377_v2 = vpop.f32.mrb[37].mxu0 }
0x30f6   :  { %v4327_v63 = vadd.f32 %v4325_v41, %v7280_v20 }
0x30f8   :  { %v4800_v30 = vmul.f32 -1.442695, %v4327_v63 }
0x30fa   :  { %6066 = vpow2.f32 %v4800_v30 }
0x3104   :  { %v6067_v3 = vpop.eup %6066 }
0x3105   :  { %v4331_v34 = vadd.f32 1.0, %v6067_v3 }
0x3107   :  { %6068 = vrcp.f32 %v4331_v34 }
0x3111   :  { %v6069_v23 = vpop.eup %6068 }
0x3112   :  { %v4334_v4 = vmul.f32 %v6069_v23, %v7102_v24 }
0x3114   :  { %v4335_v32 = vsub.f32 %v4334_v4, %v7099_v15 }
0x3116   :  { %4341 = vrot.lane.b32.xlu1 %v4335_v32, %s6147_s10  ;;  %v4339_v21 = vmul.f32 %v4337_v5, %v4335_v32 }
0x3188   :  { %v4342_v22 = vpop.permute.xlu1 %4341 }
0x3189   :  { %v4344_v16 = vmul.f32 %v4342_v22, %v4335_v32 }
0x318b   :  { %4346 = vrot.lane.b32.xlu0 %v4344_v16, %s6148_s24 }
0x31fd   :  { %v4347_v13 = vpop.permute.xlu0 %4346 }
0x31fe   :  { %v4349_v18 = vadd.f32 %v4347_v13, %v4339_v21 }
0x3200   :  { %6070 = vtanh.f32 %v4349_v18  ;;  %v4445_v52 = vrot.slane %v4349_v18, 7 }
0x320a   :  { %v6071_v6 = vpop.eup %6070 }
0x320b   :  { %4352 = vrot.lane.b32.xlu1 %v6071_v6, %s6147_s10 }
0x327d   :  { %v4353_v50 = vpop.permute.xlu1 %4352 }
0x327e   :  { %v4355_v7 = vmul.f32 %v4353_v50, %v4335_v32 }
0x3280   :  { %v4357_v8 = vrot.slane %v4355_v7, 6 }
0x3282   :  { %4358 = vrot.lane.b32.xlu0 %v4357_v8, %s6148_s24 }
0x32f4   :  { %v4359_v9 = vpop.permute.xlu0 %4358 }
0x32f5   :  { %5387 = vmatmul.mubr.msk.f32.vlgmr.msra.gmra.mrb[36].mxu1 %vm2639_vm6, %v4359_v9 }
0x33c8   :  { %v4428_v10 = vpop.f32.mrb[36].mxu1 }
0x33c9   :  { %v4433_v19 = vrot.slane %v4428_v10, 1  ;;  %v5388_v11 = vpop.f32.mrb[37].mxu1 }
0x33cb   :  { %v4435_v14 = vadd.f32 %v4433_v19, %v7280_v20 }
0x33cd   :  { %v4802_v17 = vmul.f32 -1.442695, %v4435_v14 }
0x33cf   :  { %6072 = vpow2.f32 %v4802_v17 }
0x33d9   :  { %v6073_v25 = vpop.eup %6072 }
0x33da   :  { %v4439_v27 = vadd.f32 1.0, %v6073_v25 }
0x33dc   :  { %6074 = vrcp.f32 %v4439_v27 }
0x33e6   :  { %v6075_v40 = vpop.eup %6074 }
0x33e7   :  { %v4442_v26 = vmul.f32 %v6075_v40, %v7102_v24 }
0x33e9   :  { %v4443_v29 = vsub.f32 %v4442_v26, %v7099_v15 }
0x33eb   :  { %4449 = vrot.lane.b32.xlu1 %v4443_v29, %s6147_s10  ;;  %v4447_v12 = vmul.f32 %v4445_v52, %v4443_v29 }
0x345d   :  { %v4450_v45 = vpop.permute.xlu1 %4449 }
0x345e   :  { %v4452_v49 = vmul.f32 %v4450_v45, %v4443_v29 }
0x3460   :  { %4454 = vrot.lane.b32.xlu0 %v4452_v49, %s6148_s24 }
0x34d2   :  { %v4455_v57 = vpop.permute.xlu0 %4454 }
0x34d3   :  { %v4457_v20 = vadd.f32 %v4455_v57, %v4447_v12 }
0x34d5   :  { %6076 = vtanh.f32 %v4457_v20 }
0x34df   :  { %v6077_v61 = vpop.eup %6076 }
0x34e0   :  { %4460 = vrot.lane.b32.xlu1 %v6077_v61, %s6147_s10 }
0x3552   :  { %v4461_v28 = vpop.permute.xlu1 %4460 }
0x3553   :  { %v4463_v35 = vmul.f32 %v4461_v28, %v4443_v29 }
0x3555   :  { %4465 = vrot.lane.b32.xlu0 %v4463_v35, %s6148_s24 }
0x35c7   :  { %v4466_v15 = vpop.permute.xlu0 %4465 }
0x35c8   :  { %4469 = vst.msk [vmem:[#allocation12 - $0x7] sm:$0x80] %vm4468_vm14, %v4466_v15 }
0x35c9   :  { %6111 = shalt.err (!%p6108_p12)
}
0x35ca   :  { %s6112_s5 = scalar_lea.hbm %s7403_s18, 16 }
0x35cb   :  { %p6113_p13 = scmp.ne.s32.totalorder %s7403_s18, %s6112_s5  ;;  %p6116_p0 = scmp.lt.u32.totalorder %s6112_s5, %s7403_s18 }
0x35cd   :  { %p6118_p1 = pnand %p6116_p0, %p6113_p13 }
0x35cf   :  { %6121 = shalt.err (!%p6118_p1)
}
0x35d0   :  { %4479 = dma.vmem_to_hbm [thread:$0]  %s4477_s27, 16, %s7403_s18, [#allocation11]  }
0x35d1   :  { %6136 = dma.done.wait [#allocation11], 16  }
0x35d2   :  { %6137 = vsyncadd [#allocation11], 4294967280 }
0x35d3   :  { %4483 = vsyncpa [#allocation10], 1 }
0x35d4   :  { %4484 = vsyncpa [#allocation11], 1 }
0x35d5   :  { %4485 = vsyncmov [#allocation8] }
0x35d8   :  { %s4486_s13 = vpop.sfrf %4485 }
0x35d9   :  { %p4803_p2 = scmp.ne.s32.totalorder %s4486_s13, 0 }
0x35db   :  { %4490 = shalt.err (%p4803_p2)  }
0x35dc   :  { %4492 = vsyncmov [#allocation8 + $0x1] }
0x35df   :  { %s4493_s28 = vpop.sfrf %4492 }
0x35e0   :  { %p4804_p3 = scmp.ne.s32.totalorder %s4493_s28, 0 }
0x35e2   :  { %4497 = shalt.err (%p4804_p3)  }
0x35e3   :  { %4499 = vsyncmov [#allocation8 + $0x2] }
0x35e6   :  { %s4500_s12 = vpop.sfrf %4499 }
0x35e7   :  { %p4805_p4 = scmp.ne.s32.totalorder %s4500_s12, 0 }
0x35e9   :  { %4504 = shalt.err (%p4805_p4)  }
0x35ea   :  { %4506 = vsyncmov [#allocation8 + $0x3] }
0x35ed   :  { %s4507_s0 = vpop.sfrf %4506 }
0x35ee   :  { %p4806_p5 = scmp.ne.s32.totalorder %s4507_s0, 0 }
0x35f0   :  { %4511 = shalt.err (%p4806_p5)  }
0x35f1   :  { %4513 = vsyncmov [#allocation8 + $0x4] }
0x35f4   :  { %s4514_s18 = vpop.sfrf %4513 }
0x35f5   :  { %p4807_p6 = scmp.ne.s32.totalorder %s4514_s18, 0 }
0x35f7   :  { %4518 = shalt.err (%p4807_p6)  }
0x35f8   :  { %4520 = vsyncmov [#allocation8 + $0x5] }
0x35fb   :  { %s4521_s2 = vpop.sfrf %4520 }
0x35fc   :  { %p4808_p7 = scmp.ne.s32.totalorder %s4521_s2, 0 }
0x35fe   :  { %4525 = shalt.err (%p4808_p7)  }

</bundles_post_ra>
